<compile_context>
chip_gen: v5e
topology: v5e:2x2
jax: 0.10.0
libtpu: 0.0.40
codegen_flags: <defaults>
</compile_context>

<pallas_src>
import jax
import jax.numpy as jnp
from jax.experimental import pallas as pl
from jax.experimental.pallas import tpu as pltpu

EPS = 1e-5


# ----------------------------------------------------------------------------
# Kernels
# ----------------------------------------------------------------------------
def _conv3x3_core(x, w_ref, b_ref, o_ref, sum_ref, sq_ref, xpad_ref):
    """Shared 3x3 conv core (stride 1, pad 1) + BN-stat epilogue.

    x        : (H, W, Cin) f32 value (already BN/ReLU'd for conv2's prologue)
    w_ref    : (9*Cin, Cout)   tap-major flattened HWIO filter
    b_ref    : (1, Cout)
    o_ref    : (1, H, W, Cout)
    sum_ref  : (1, 1, Cout)    per-image channel sum of the conv output
    sq_ref   : (1, 1, Cout)    per-image channel sum of squares
    xpad_ref : VMEM scratch (H+2, W+2, Cin) -- in-kernel zero halo
    """
    H, W, Cin = x.shape
    Cout = o_ref.shape[-1]

    # In-kernel halo: zero the scratch, drop the tile in the interior.  This
    # replaces a wrapper-level jnp.pad (an extra HBM read+write per conv).
    xpad_ref[...] = jnp.zeros_like(xpad_ref)
    xpad_ref[1:H + 1, 1:W + 1, :] = x

    # 9 whole-image matmuls (one per filter tap) instead of a per-row loop:
    # cuts MXU instruction count ~16x vs the previous 144 tiny matmuls.
    acc = jnp.zeros((H * W, Cout), jnp.float32)
    for t in range(9):
        dy, dx = divmod(t, 3)
        slab = xpad_ref[dy:dy + H, dx:dx + W, :].reshape(H * W, Cin)
        w_t = w_ref[t * Cin:(t + 1) * Cin, :].astype(jnp.float32)
        acc += jnp.dot(slab, w_t, preferred_element_type=jnp.float32)

    y = acc + b_ref[...].astype(jnp.float32)              # (H*W, Cout)
    o_ref[0] = y.reshape(H, W, Cout).astype(o_ref.dtype)

    # Fused BN-stat epilogue: per-image partial sums; reduced over N outside so
    # the batch grid axis can stay "parallel" (megacore-safe, no accumulator).
    sum_ref[...] = jnp.sum(y, axis=0, keepdims=True).reshape(1, 1, Cout)
    sq_ref[...] = jnp.sum(y * y, axis=0, keepdims=True).reshape(1, 1, Cout)


def conv3x3_stats_kernel(x_ref, w_ref, b_ref, o_ref, sum_ref, sq_ref, xpad_ref):
    _conv3x3_core(x_ref[0].astype(jnp.float32),
                  w_ref, b_ref, o_ref, sum_ref, sq_ref, xpad_ref)


def bnrelu_conv3x3_stats_kernel(x_ref, scale_ref, shift_ref, w_ref, b_ref,
                                o_ref, sum_ref, sq_ref, xpad_ref):
    """Previous layer's BN affine + ReLU fused into the conv prologue."""
    x = x_ref[0].astype(jnp.float32)
    x = jnp.maximum(x * scale_ref[...] + shift_ref[...], 0.0)
    _conv3x3_core(x, w_ref, b_ref, o_ref, sum_ref, sq_ref, xpad_ref)


def bn_add_relu_kernel(x_ref, scale_ref, shift_ref, res_ref, o_ref):
    """y = relu(x * scale + shift + residual), lane-dense (1, H, W*C) blocks."""
    y = (x_ref[...].astype(jnp.float32) * scale_ref[...] + shift_ref[...]
         + res_ref[...].astype(jnp.float32))
    o_ref[...] = jnp.maximum(y, 0.0).astype(o_ref.dtype)


# ----------------------------------------------------------------------------
# Pallas-call wrappers
# ----------------------------------------------------------------------------
def conv3x3_fused(x_nhwc, w_flat, b, scale=None, shift=None):
    """3x3 conv (+optional fused input BN-ReLU) returning (y, mean, var)."""
    N, H, W, Cin = x_nhwc.shape
    Cout = w_flat.shape[-1]

    args = [x_nhwc]
    in_specs = [pl.BlockSpec((1, H, W, Cin), lambda n: (n, 0, 0, 0))]
    if scale is None:
        kernel = conv3x3_stats_kernel
    else:
        kernel = bnrelu_conv3x3_stats_kernel
        args += [scale.reshape(1, Cin), shift.reshape(1, Cin)]
        in_specs += [pl.BlockSpec((1, Cin), lambda n: (0, 0)),
                     pl.BlockSpec((1, Cin), lambda n: (0, 0))]
    args += [w_flat, b.reshape(1, Cout)]
    in_specs += [pl.BlockSpec((9 * Cin, Cout), lambda n: (0, 0)),
                 pl.BlockSpec((1, Cout), lambda n: (0, 0))]

    # NOTE: for real ResNet shapes (C up to 512, H=W up to 56) tile over H with
    # a 1-row halo and set vmem_limit_bytes explicitly (v7x has 64 MiB VMEM).
    y, s, q = pl.pallas_call(
        kernel,
        out_shape=(jax.ShapeDtypeStruct((N, H, W, Cout), jnp.float32),
                   jax.ShapeDtypeStruct((N, 1, Cout), jnp.float32),
                   jax.ShapeDtypeStruct((N, 1, Cout), jnp.float32)),
        grid=(N,),
        in_specs=in_specs,
        out_specs=(pl.BlockSpec((1, H, W, Cout), lambda n: (n, 0, 0, 0)),
                   pl.BlockSpec((1, 1, Cout), lambda n: (n, 0, 0)),
                   pl.BlockSpec((1, 1, Cout), lambda n: (n, 0, 0))),
        scratch_shapes=[pltpu.VMEM((H + 2, W + 2, Cin), jnp.float32)],
        compiler_params=pltpu.CompilerParams(
            dimension_semantics=("parallel",)),
    )(*args)

    cnt = N * H * W
    mean = jnp.sum(s, axis=(0, 1)) / cnt
    # Guard against tiny negative variance from E[x^2]-E[x]^2 cancellation.
    var = jnp.maximum(jnp.sum(q, axis=(0, 1)) / cnt - mean * mean, 0.0)
    return y, mean, var


def bn_scale_shift(mean, var, gamma, beta):
    scale = gamma * jax.lax.rsqrt(var + EPS)
    shift = beta - mean * scale
    return scale, shift


def bn_add_relu(x_nhwc, scale, shift, residual_nhwc):
    N, H, W, C = x_nhwc.shape
    # Lane-dense layout: fold W into the channel axis (W*C = 128 here) so the
    # elementwise kernel issues full-width stores; reshapes are free (same
    # contiguous memory), scale/shift are tiled once on the host side.
    x2 = x_nhwc.reshape(N, H, W * C)
    r2 = residual_nhwc.reshape(N, H, W * C)
    scale_t = jnp.tile(scale, W).reshape(1, W * C)
    shift_t = jnp.tile(shift, W).reshape(1, W * C)
    out = pl.pallas_call(
        bn_add_relu_kernel,
        out_shape=jax.ShapeDtypeStruct((N, H, W * C), jnp.float32),
        grid=(N,),
        in_specs=[pl.BlockSpec((1, H, W * C), lambda n: (n, 0, 0)),
                  pl.BlockSpec((1, W * C), lambda n: (0, 0)),
                  pl.BlockSpec((1, W * C), lambda n: (0, 0)),
                  pl.BlockSpec((1, H, W * C), lambda n: (n, 0, 0))],
        out_specs=pl.BlockSpec((1, H, W * C), lambda n: (n, 0, 0)),
        compiler_params=pltpu.CompilerParams(
            dimension_semantics=("parallel",)),
    )(x2, scale_t, shift_t, r2)
    return out.reshape(N, H, W, C)


@jax.jit
def block_forward(x_nchw, params):
    """Pallas implementation of Block.forward (identity_downsample=None, stride=1)."""
    x = jnp.transpose(x_nchw, (0, 2, 3, 1))             # NCHW -> NHWC
    identity = x

    # conv1 + fused batch-stat epilogue
    y1, mean1, var1 = conv3x3_fused(x, params["w1"], params["b1"])
    scale1, shift1 = bn_scale_shift(mean1, var1, params["g1"], params["beta1"])

    # BN1 + ReLU fused into conv2's prologue; conv2 + fused stat epilogue
    y2, mean2, var2 = conv3x3_fused(y1, params["w2"], params["b2"],
                                    scale=scale1, shift=shift1)
    scale2, shift2 = bn_scale_shift(mean2, var2, params["g2"], params["beta2"])

    # BN2 + residual add + ReLU (lane-dense elementwise kernel)
    out = bn_add_relu(y2, scale2, shift2, identity)
    return jnp.transpose(out, (0, 3, 1, 2))             # NHWC -> NCHW


# ----------------------------------------------------------------------------
# Pure-JAX reference (correctness check only)
# ----------------------------------------------------------------------------
def ref_block(x_nchw, p):
    def conv(x, w, b):
        y = jax.lax.conv_general_dilated(
            x, w, (1, 1), ((1, 1), (1, 1)),
            dimension_numbers=("NCHW", "OIHW", "NCHW"))
        return y + b[None, :, None, None]

    def bn(x, g, b):
        mean = x.mean(axis=(0, 2, 3), keepdims=True)
        var = x.var(axis=(0, 2, 3), keepdims=True)       # biased, training mode
        return (x - mean) / jnp.sqrt(var + EPS) * g[None, :, None, None] \
            + b[None, :, None, None]

    identity = x_nchw
    h = jax.nn.relu(bn(conv(x_nchw, p["w1"], p["b1"]), p["g1"], p["beta1"]))
    h = bn(conv(h, p["w2"], p["b2"]), p["g2"], p["beta2"])
    return jax.nn.relu(h + identity)


# ----------------------------------------------------------------------------
if __name__ == "__main__":
    N, C, H, W = 2, 8, 16, 16                 # in_channels == out_channels
    key = jax.random.PRNGKey(0)
    kx, k1, k2, k3, k4 = jax.random.split(key, 5)

    x = jax.random.normal(kx, (N, C, H, W), jnp.float32)

    # Deterministic parameter init (shapes per nn.Conv2d / nn.BatchNorm2d).
    w1_oihw = jax.random.normal(k1, (C, C, 3, 3), jnp.float32) * 0.1
    b1 = jax.random.normal(k2, (C,), jnp.float32) * 0.1
    w2_oihw = jax.random.normal(k3, (C, C, 3, 3), jnp.float32) * 0.1
    b2 = jax.random.normal(k4, (C,), jnp.float32) * 0.1
    g1 = jnp.ones((C,), jnp.float32)
    beta1 = jnp.zeros((C,), jnp.float32)
    g2 = jnp.ones((C,), jnp.float32)
    beta2 = jnp.zeros((C,), jnp.float32)

    def flatten_oihw(w_oihw):
        # OIHW -> HWIO -> (9*Cin, Cout); rows ordered (dy, dx, ci) = tap-major.
        cout, cin = w_oihw.shape[0], w_oihw.shape[1]
        return jnp.transpose(w_oihw, (2, 3, 1, 0)).reshape(9 * cin, cout)

    params = {"w1": flatten_oihw(w1_oihw), "b1": b1,
              "w2": flatten_oihw(w2_oihw), "b2": b2,
              "g1": g1, "beta1": beta1, "g2": g2, "beta2": beta2}
    params_ref = {"w1": w1_oihw, "b1": b1, "w2": w2_oihw, "b2": b2,
                  "g1": g1, "beta1": beta1, "g2": g2, "beta2": beta2}

    out = block_forward(x, params)
    jax.block_until_ready(out)

    ref = ref_block(x, params_ref)
    err = float(jnp.max(jnp.abs(out - ref)))
    assert out.shape == (N, C, H, W)
    assert err < 1e-4, f"mismatch vs reference: {err}"

    # TODO(synk): identity_downsample is None in this configuration (stride=1),
    # so no downsample path is instantiated.
    print("KERNEL_OK")
</pallas_src>

<mosaic_0001>
module attributes {stable_mosaic.version = 11 : i64} {
  func.func @conv3x3_stats_kernel(%arg0: i32, %arg1: memref<1x16x16x8xf32, #tpu.memory_space<vmem>>, %arg2: memref<72x8xf32, #tpu.memory_space<vmem>>, %arg3: memref<1x8xf32, #tpu.memory_space<vmem>>, %arg4: memref<1x16x16x8xf32, #tpu.memory_space<vmem>>, %arg5: memref<1x1x8xf32, #tpu.memory_space<vmem>>, %arg6: memref<1x1x8xf32, #tpu.memory_space<vmem>>, %arg7: memref<18x18x8xf32, #tpu.memory_space<vmem>>) attributes {dimension_semantics = [#tpu.dimension_semantics<parallel>], iteration_bounds = array<i64: 2>, scalar_prefetch = 0 : i64, scratch_operands = 1 : i64, tpu.core_type = #tpu.core_type<tc>, window_params = [{transform_indices = @transform_0, window_bounds = array<i64: 1, 16, 16, 8>}, {pipeline_mode = #tpu.pipeline_mode<synchronous>, transform_indices = @transform_1, window_bounds = array<i64: 72, 8>}, {pipeline_mode = #tpu.pipeline_mode<synchronous>, transform_indices = @transform_2, window_bounds = array<i64: 1, 8>}, {transform_indices = @transform_3, window_bounds = array<i64: 1, 16, 16, 8>}, {transform_indices = @transform_4, window_bounds = array<i64: 1, 1, 8>}, {transform_indices = @transform_5, window_bounds = array<i64: 1, 1, 8>}]} {
    %c0 = arith.constant 0 : index
    %c0_0 = arith.constant 0 : index
    %c0_1 = arith.constant 0 : index
    %c0_2 = arith.constant 0 : index
    %0 = vector.load %arg1[%c0, %c0_0, %c0_1, %c0_2] : memref<1x16x16x8xf32, #tpu.memory_space<vmem>>, vector<1x16x16x8xf32>
    %1 = vector.shape_cast %0 : vector<1x16x16x8xf32> to vector<16x16x8xf32>
    %cst = arith.constant 0.000000e+00 : f32
    %2 = vector.broadcast %cst : f32 to vector<18x18x8xf32>
    %c0_3 = arith.constant 0 : index
    %c0_4 = arith.constant 0 : index
    %c0_5 = arith.constant 0 : index
    %3 = vector.load %arg7[%c0_3, %c0_4, %c0_5] : memref<18x18x8xf32, #tpu.memory_space<vmem>>, vector<18x18x8xf32>
    tpu.vector_store %arg7[%c0_3, %c0_4, %c0_5], %2 {strides = array<i32>} : memref<18x18x8xf32, #tpu.memory_space<vmem>>, vector<18x18x8xf32>,
    %c1 = arith.constant 1 : index
    %c1_6 = arith.constant 1 : index
    %c0_7 = arith.constant 0 : index
    %4 = vector.load %arg7[%c1, %c1_6, %c0_7] : memref<18x18x8xf32, #tpu.memory_space<vmem>>, vector<16x16x8xf32>
    tpu.vector_store %arg7[%c1, %c1_6, %c0_7], %1 {strides = array<i32>} : memref<18x18x8xf32, #tpu.memory_space<vmem>>, vector<16x16x8xf32>,
    %cst_8 = arith.constant 0.000000e+00 : f32
    %5 = vector.broadcast %cst_8 : f32 to vector<256x8xf32>
    %c0_9 = arith.constant 0 : index
    %c0_10 = arith.constant 0 : index
    %c0_11 = arith.constant 0 : index
    %6 = vector.load %arg7[%c0_9, %c0_10, %c0_11] : memref<18x18x8xf32, #tpu.memory_space<vmem>>, vector<16x16x8xf32>
    %7 = vector.shape_cast %6 : vector<16x16x8xf32> to vector<256x8xf32>
    %c0_12 = arith.constant 0 : index
    %c0_13 = arith.constant 0 : index
    %8 = vector.load %arg2[%c0_12, %c0_13] : memref<72x8xf32, #tpu.memory_space<vmem>>, vector<8x8xf32>
    %cst_14 = arith.constant dense<0.000000e+00> : vector<256x8xf32>
    %9 = tpu.matmul %7, %8, %cst_14 {dimension_numbers = #tpu.dot_dimension_numbers<[1], [0], [0], [1], [0, 0, 1, 1], [], []>} : vector<256x8xf32>, vector<8x8xf32>, vector<256x8xf32> -> vector<256x8xf32>
    %10 = arith.addf %5, %9 : vector<256x8xf32>
    %c0_15 = arith.constant 0 : index
    %c1_16 = arith.constant 1 : index
    %c0_17 = arith.constant 0 : index
    %11 = vector.load %arg7[%c0_15, %c1_16, %c0_17] : memref<18x18x8xf32, #tpu.memory_space<vmem>>, vector<16x16x8xf32>
    %12 = vector.shape_cast %11 : vector<16x16x8xf32> to vector<256x8xf32>
    %c8 = arith.constant 8 : index
    %c0_18 = arith.constant 0 : index
    %13 = vector.load %arg2[%c8, %c0_18] : memref<72x8xf32, #tpu.memory_space<vmem>>, vector<8x8xf32>
    %cst_19 = arith.constant dense<0.000000e+00> : vector<256x8xf32>
    %14 = tpu.matmul %12, %13, %cst_19 {dimension_numbers = #tpu.dot_dimension_numbers<[1], [0], [0], [1], [0, 0, 1, 1], [], []>} : vector<256x8xf32>, vector<8x8xf32>, vector<256x8xf32> -> vector<256x8xf32>
    %15 = arith.addf %10, %14 : vector<256x8xf32>
    %c0_20 = arith.constant 0 : index
    %c2 = arith.constant 2 : index
    %c0_21 = arith.constant 0 : index
    %16 = vector.load %arg7[%c0_20, %c2, %c0_21] : memref<18x18x8xf32, #tpu.memory_space<vmem>>, vector<16x16x8xf32>
    %17 = vector.shape_cast %16 : vector<16x16x8xf32> to vector<256x8xf32>
    %c16 = arith.constant 16 : index
    %c0_22 = arith.constant 0 : index
    %18 = vector.load %arg2[%c16, %c0_22] : memref<72x8xf32, #tpu.memory_space<vmem>>, vector<8x8xf32>
    %cst_23 = arith.constant dense<0.000000e+00> : vector<256x8xf32>
    %19 = tpu.matmul %17, %18, %cst_23 {dimension_numbers = #tpu.dot_dimension_numbers<[1], [0], [0], [1], [0, 0, 1, 1], [], []>} : vector<256x8xf32>, vector<8x8xf32>, vector<256x8xf32> -> vector<256x8xf32>
    %20 = arith.addf %15, %19 : vector<256x8xf32>
    %c1_24 = arith.constant 1 : index
    %c0_25 = arith.constant 0 : index
    %c0_26 = arith.constant 0 : index
    %21 = vector.load %arg7[%c1_24, %c0_25, %c0_26] : memref<18x18x8xf32, #tpu.memory_space<vmem>>, vector<16x16x8xf32>
    %22 = vector.shape_cast %21 : vector<16x16x8xf32> to vector<256x8xf32>
    %c24 = arith.constant 24 : index
    %c0_27 = arith.constant 0 : index
    %23 = vector.load %arg2[%c24, %c0_27] : memref<72x8xf32, #tpu.memory_space<vmem>>, vector<8x8xf32>
    %cst_28 = arith.constant dense<0.000000e+00> : vector<256x8xf32>
    %24 = tpu.matmul %22, %23, %cst_28 {dimension_numbers = #tpu.dot_dimension_numbers<[1], [0], [0], [1], [0, 0, 1, 1], [], []>} : vector<256x8xf32>, vector<8x8xf32>, vector<256x8xf32> -> vector<256x8xf32>
    %25 = arith.addf %20, %24 : vector<256x8xf32>
    %c1_29 = arith.constant 1 : index
    %c1_30 = arith.constant 1 : index
    %c0_31 = arith.constant 0 : index
    %26 = vector.load %arg7[%c1_29, %c1_30, %c0_31] : memref<18x18x8xf32, #tpu.memory_space<vmem>>, vector<16x16x8xf32>
    %27 = vector.shape_cast %26 : vector<16x16x8xf32> to vector<256x8xf32>
    %c32 = arith.constant 32 : index
    %c0_32 = arith.constant 0 : index
    %28 = vector.load %arg2[%c32, %c0_32] : memref<72x8xf32, #tpu.memory_space<vmem>>, vector<8x8xf32>
    %cst_33 = arith.constant dense<0.000000e+00> : vector<256x8xf32>
    %29 = tpu.matmul %27, %28, %cst_33 {dimension_numbers = #tpu.dot_dimension_numbers<[1], [0], [0], [1], [0, 0, 1, 1], [], []>} : vector<256x8xf32>, vector<8x8xf32>, vector<256x8xf32> -> vector<256x8xf32>
    %30 = arith.addf %25, %29 : vector<256x8xf32>
    %c1_34 = arith.constant 1 : index
    %c2_35 = arith.constant 2 : index
    %c0_36 = arith.constant 0 : index
    %31 = vector.load %arg7[%c1_34, %c2_35, %c0_36] : memref<18x18x8xf32, #tpu.memory_space<vmem>>, vector<16x16x8xf32>
    %32 = vector.shape_cast %31 : vector<16x16x8xf32> to vector<256x8xf32>
    %c40 = arith.constant 40 : index
    %c0_37 = arith.constant 0 : index
    %33 = vector.load %arg2[%c40, %c0_37] : memref<72x8xf32, #tpu.memory_space<vmem>>, vector<8x8xf32>
    %cst_38 = arith.constant dense<0.000000e+00> : vector<256x8xf32>
    %34 = tpu.matmul %32, %33, %cst_38 {dimension_numbers = #tpu.dot_dimension_numbers<[1], [0], [0], [1], [0, 0, 1, 1], [], []>} : vector<256x8xf32>, vector<8x8xf32>, vector<256x8xf32> -> vector<256x8xf32>
    %35 = arith.addf %30, %34 : vector<256x8xf32>
    %c2_39 = arith.constant 2 : index
    %c0_40 = arith.constant 0 : index
    %c0_41 = arith.constant 0 : index
    %36 = vector.load %arg7[%c2_39, %c0_40, %c0_41] : memref<18x18x8xf32, #tpu.memory_space<vmem>>, vector<16x16x8xf32>
    %37 = vector.shape_cast %36 : vector<16x16x8xf32> to vector<256x8xf32>
    %c48 = arith.constant 48 : index
    %c0_42 = arith.constant 0 : index
    %38 = vector.load %arg2[%c48, %c0_42] : memref<72x8xf32, #tpu.memory_space<vmem>>, vector<8x8xf32>
    %cst_43 = arith.constant dense<0.000000e+00> : vector<256x8xf32>
    %39 = tpu.matmul %37, %38, %cst_43 {dimension_numbers = #tpu.dot_dimension_numbers<[1], [0], [0], [1], [0, 0, 1, 1], [], []>} : vector<256x8xf32>, vector<8x8xf32>, vector<256x8xf32> -> vector<256x8xf32>
    %40 = arith.addf %35, %39 : vector<256x8xf32>
    %c2_44 = arith.constant 2 : index
    %c1_45 = arith.constant 1 : index
    %c0_46 = arith.constant 0 : index
    %41 = vector.load %arg7[%c2_44, %c1_45, %c0_46] : memref<18x18x8xf32, #tpu.memory_space<vmem>>, vector<16x16x8xf32>
    %42 = vector.shape_cast %41 : vector<16x16x8xf32> to vector<256x8xf32>
    %c56 = arith.constant 56 : index
    %c0_47 = arith.constant 0 : index
    %43 = vector.load %arg2[%c56, %c0_47] : memref<72x8xf32, #tpu.memory_space<vmem>>, vector<8x8xf32>
    %cst_48 = arith.constant dense<0.000000e+00> : vector<256x8xf32>
    %44 = tpu.matmul %42, %43, %cst_48 {dimension_numbers = #tpu.dot_dimension_numbers<[1], [0], [0], [1], [0, 0, 1, 1], [], []>} : vector<256x8xf32>, vector<8x8xf32>, vector<256x8xf32> -> vector<256x8xf32>
    %45 = arith.addf %40, %44 : vector<256x8xf32>
    %c2_49 = arith.constant 2 : index
    %c2_50 = arith.constant 2 : index
    %c0_51 = arith.constant 0 : index
    %46 = vector.load %arg7[%c2_49, %c2_50, %c0_51] : memref<18x18x8xf32, #tpu.memory_space<vmem>>, vector<16x16x8xf32>
    %47 = vector.shape_cast %46 : vector<16x16x8xf32> to vector<256x8xf32>
    %c64 = arith.constant 64 : index
    %c0_52 = arith.constant 0 : index
    %48 = vector.load %arg2[%c64, %c0_52] : memref<72x8xf32, #tpu.memory_space<vmem>>, vector<8x8xf32>
    %cst_53 = arith.constant dense<0.000000e+00> : vector<256x8xf32>
    %49 = tpu.matmul %47, %48, %cst_53 {dimension_numbers = #tpu.dot_dimension_numbers<[1], [0], [0], [1], [0, 0, 1, 1], [], []>} : vector<256x8xf32>, vector<8x8xf32>, vector<256x8xf32> -> vector<256x8xf32>
    %50 = arith.addf %45, %49 : vector<256x8xf32>
    %c0_54 = arith.constant 0 : index
    %c0_55 = arith.constant 0 : index
    %51 = vector.load %arg3[%c0_54, %c0_55] : memref<1x8xf32, #tpu.memory_space<vmem>>, vector<1x8xf32>
    %52 = vector.broadcast %51 : vector<1x8xf32> to vector<256x8xf32>
    %53 = arith.addf %50, %52 : vector<256x8xf32>
    %54 = vector.shape_cast %53 : vector<256x8xf32> to vector<16x16x8xf32>
    %c0_56 = arith.constant 0 : index
    %c0_57 = arith.constant 0 : index
    %c0_58 = arith.constant 0 : index
    %c0_59 = arith.constant 0 : index
    %55 = vector.load %arg4[%c0_56, %c0_57, %c0_58, %c0_59] : memref<1x16x16x8xf32, #tpu.memory_space<vmem>>, vector<1x16x16x8xf32>
    %56 = vector.shape_cast %55 : vector<1x16x16x8xf32> to vector<16x16x8xf32>
    %57 = vector.shape_cast %54 : vector<16x16x8xf32> to vector<1x16x16x8xf32>
    tpu.vector_store %arg4[%c0_56, %c0_57, %c0_58, %c0_59], %57 {strides = array<i32>} : memref<1x16x16x8xf32, #tpu.memory_space<vmem>>, vector<1x16x16x8xf32>,
    %cst_60 = arith.constant dense<0.000000e+00> : vector<8xf32>
    %58 = vector.multi_reduction <add>, %53, %cst_60 [0] : vector<256x8xf32> to vector<8xf32>
    %59 = vector.shape_cast %58 : vector<8xf32> to vector<1x8xf32>
    %60 = vector.shape_cast %59 : vector<1x8xf32> to vector<1x1x8xf32>
    %c0_61 = arith.constant 0 : index
    %c0_62 = arith.constant 0 : index
    %c0_63 = arith.constant 0 : index
    %61 = vector.load %arg5[%c0_61, %c0_62, %c0_63] : memref<1x1x8xf32, #tpu.memory_space<vmem>>, vector<1x1x8xf32>
    tpu.vector_store %arg5[%c0_61, %c0_62, %c0_63], %60 {strides = array<i32>} : memref<1x1x8xf32, #tpu.memory_space<vmem>>, vector<1x1x8xf32>,
    %62 = arith.mulf %53, %53 : vector<256x8xf32>
    %cst_64 = arith.constant dense<0.000000e+00> : vector<8xf32>
    %63 = vector.multi_reduction <add>, %62, %cst_64 [0] : vector<256x8xf32> to vector<8xf32>
    %64 = vector.shape_cast %63 : vector<8xf32> to vector<1x8xf32>
    %65 = vector.shape_cast %64 : vector<1x8xf32> to vector<1x1x8xf32>
    %c0_65 = arith.constant 0 : index
    %c0_66 = arith.constant 0 : index
    %c0_67 = arith.constant 0 : index
    %66 = vector.load %arg6[%c0_65, %c0_66, %c0_67] : memref<1x1x8xf32, #tpu.memory_space<vmem>>, vector<1x1x8xf32>
    tpu.vector_store %arg6[%c0_65, %c0_66, %c0_67], %65 {strides = array<i32>} : memref<1x1x8xf32, #tpu.memory_space<vmem>>, vector<1x1x8xf32>,
    return
  }
  func.func @transform_0(%arg0: i32) -> (i32, i32, i32, i32) {
    %c0_i32 = arith.constant 0 : i32
    %c0_i32_0 = arith.constant 0 : i32
    %c0_i32_1 = arith.constant 0 : i32
    %c0_i32_2 = arith.constant 0 : i32
    return %arg0, %c0_i32, %c0_i32_0, %c0_i32_1 : i32, i32, i32, i32
  }
  func.func @transform_1(%arg0: i32) -> (i32, i32) {
    %c0_i32 = arith.constant 0 : i32
    %c0_i32_0 = arith.constant 0 : i32
    %c0_i32_1 = arith.constant 0 : i32
    return %c0_i32, %c0_i32_0 : i32, i32
  }
  func.func @transform_2(%arg0: i32) -> (i32, i32) {
    %c0_i32 = arith.constant 0 : i32
    %c0_i32_0 = arith.constant 0 : i32
    %c0_i32_1 = arith.constant 0 : i32
    return %c0_i32, %c0_i32_0 : i32, i32
  }
  func.func @transform_3(%arg0: i32) -> (i32, i32, i32, i32) {
    %c0_i32 = arith.constant 0 : i32
    %c0_i32_0 = arith.constant 0 : i32
    %c0_i32_1 = arith.constant 0 : i32
    %c0_i32_2 = arith.constant 0 : i32
    return %arg0, %c0_i32, %c0_i32_0, %c0_i32_1 : i32, i32, i32, i32
  }
  func.func @transform_4(%arg0: i32) -> (i32, i32, i32) {
    %c0_i32 = arith.constant 0 : i32
    %c0_i32_0 = arith.constant 0 : i32
    %c0_i32_1 = arith.constant 0 : i32
    return %arg0, %c0_i32, %c0_i32_0 : i32, i32, i32
  }
  func.func @transform_5(%arg0: i32) -> (i32, i32, i32) {
    %c0_i32 = arith.constant 0 : i32
    %c0_i32_0 = arith.constant 0 : i32
    %c0_i32_1 = arith.constant 0 : i32
    return %arg0, %c0_i32, %c0_i32_0 : i32, i32, i32
  }
}

module attributes {stable_mosaic.version = 11 : i64} {
  func.func @bnrelu_conv3x3_stats_kernel(%arg0: i32, %arg1: memref<1x16x16x8xf32, #tpu.memory_space<vmem>>, %arg2: memref<1x8xf32, #tpu.memory_space<vmem>>, %arg3: memref<1x8xf32, #tpu.memory_space<vmem>>, %arg4: memref<72x8xf32, #tpu.memory_space<vmem>>, %arg5: memref<1x8xf32, #tpu.memory_space<vmem>>, %arg6: memref<1x16x16x8xf32, #tpu.memory_space<vmem>>, %arg7: memref<1x1x8xf32, #tpu.memory_space<vmem>>, %arg8: memref<1x1x8xf32, #tpu.memory_space<vmem>>, %arg9: memref<18x18x8xf32, #tpu.memory_space<vmem>>) attributes {dimension_semantics = [#tpu.dimension_semantics<parallel>], iteration_bounds = array<i64: 2>, scalar_prefetch = 0 : i64, scratch_operands = 1 : i64, tpu.core_type = #tpu.core_type<tc>, window_params = [{transform_indices = @transform_0, window_bounds = array<i64: 1, 16, 16, 8>}, {pipeline_mode = #tpu.pipeline_mode<synchronous>, transform_indices = @transform_1, window_bounds = array<i64: 1, 8>}, {pipeline_mode = #tpu.pipeline_mode<synchronous>, transform_indices = @transform_2, window_bounds = array<i64: 1, 8>}, {pipeline_mode = #tpu.pipeline_mode<synchronous>, transform_indices = @transform_3, window_bounds = array<i64: 72, 8>}, {pipeline_mode = #tpu.pipeline_mode<synchronous>, transform_indices = @transform_4, window_bounds = array<i64: 1, 8>}, {transform_indices = @transform_5, window_bounds = array<i64: 1, 16, 16, 8>}, {transform_indices = @transform_6, window_bounds = array<i64: 1, 1, 8>}, {transform_indices = @transform_7, window_bounds = array<i64: 1, 1, 8>}]} {
    %c0 = arith.constant 0 : index
    %c0_0 = arith.constant 0 : index
    %c0_1 = arith.constant 0 : index
    %c0_2 = arith.constant 0 : index
    %0 = vector.load %arg1[%c0, %c0_0, %c0_1, %c0_2] : memref<1x16x16x8xf32, #tpu.memory_space<vmem>>, vector<1x16x16x8xf32>
    %1 = vector.shape_cast %0 : vector<1x16x16x8xf32> to vector<16x16x8xf32>
    %c0_3 = arith.constant 0 : index
    %c0_4 = arith.constant 0 : index
    %2 = vector.load %arg2[%c0_3, %c0_4] : memref<1x8xf32, #tpu.memory_space<vmem>>, vector<1x8xf32>
    %3 = vector.shape_cast %2 : vector<1x8xf32> to vector<1x1x8xf32>
    %4 = vector.broadcast %3 : vector<1x1x8xf32> to vector<16x16x8xf32>
    %5 = arith.mulf %1, %4 : vector<16x16x8xf32>
    %c0_5 = arith.constant 0 : index
    %c0_6 = arith.constant 0 : index
    %6 = vector.load %arg3[%c0_5, %c0_6] : memref<1x8xf32, #tpu.memory_space<vmem>>, vector<1x8xf32>
    %7 = vector.shape_cast %6 : vector<1x8xf32> to vector<1x1x8xf32>
    %8 = vector.broadcast %7 : vector<1x1x8xf32> to vector<16x16x8xf32>
    %9 = arith.addf %5, %8 : vector<16x16x8xf32>
    %cst = arith.constant 0.000000e+00 : f32
    %10 = vector.broadcast %cst : f32 to vector<16x16x8xf32>
    %11 = arith.maximumf %9, %10 : vector<16x16x8xf32>
    %cst_7 = arith.constant 0.000000e+00 : f32
    %12 = vector.broadcast %cst_7 : f32 to vector<18x18x8xf32>
    %c0_8 = arith.constant 0 : index
    %c0_9 = arith.constant 0 : index
    %c0_10 = arith.constant 0 : index
    %13 = vector.load %arg9[%c0_8, %c0_9, %c0_10] : memref<18x18x8xf32, #tpu.memory_space<vmem>>, vector<18x18x8xf32>
    tpu.vector_store %arg9[%c0_8, %c0_9, %c0_10], %12 {strides = array<i32>} : memref<18x18x8xf32, #tpu.memory_space<vmem>>, vector<18x18x8xf32>,
    %c1 = arith.constant 1 : index
    %c1_11 = arith.constant 1 : index
    %c0_12 = arith.constant 0 : index
    %14 = vector.load %arg9[%c1, %c1_11, %c0_12] : memref<18x18x8xf32, #tpu.memory_space<vmem>>, vector<16x16x8xf32>
    tpu.vector_store %arg9[%c1, %c1_11, %c0_12], %11 {strides = array<i32>} : memref<18x18x8xf32, #tpu.memory_space<vmem>>, vector<16x16x8xf32>,
    %cst_13 = arith.constant 0.000000e+00 : f32
    %15 = vector.broadcast %cst_13 : f32 to vector<256x8xf32>
    %c0_14 = arith.constant 0 : index
    %c0_15 = arith.constant 0 : index
    %c0_16 = arith.constant 0 : index
    %16 = vector.load %arg9[%c0_14, %c0_15, %c0_16] : memref<18x18x8xf32, #tpu.memory_space<vmem>>, vector<16x16x8xf32>
    %17 = vector.shape_cast %16 : vector<16x16x8xf32> to vector<256x8xf32>
    %c0_17 = arith.constant 0 : index
    %c0_18 = arith.constant 0 : index
    %18 = vector.load %arg4[%c0_17, %c0_18] : memref<72x8xf32, #tpu.memory_space<vmem>>, vector<8x8xf32>
    %cst_19 = arith.constant dense<0.000000e+00> : vector<256x8xf32>
    %19 = tpu.matmul %17, %18, %cst_19 {dimension_numbers = #tpu.dot_dimension_numbers<[1], [0], [0], [1], [0, 0, 1, 1], [], []>} : vector<256x8xf32>, vector<8x8xf32>, vector<256x8xf32> -> vector<256x8xf32>
    %20 = arith.addf %15, %19 : vector<256x8xf32>
    %c0_20 = arith.constant 0 : index
    %c1_21 = arith.constant 1 : index
    %c0_22 = arith.constant 0 : index
    %21 = vector.load %arg9[%c0_20, %c1_21, %c0_22] : memref<18x18x8xf32, #tpu.memory_space<vmem>>, vector<16x16x8xf32>
    %22 = vector.shape_cast %21 : vector<16x16x8xf32> to vector<256x8xf32>
    %c8 = arith.constant 8 : index
    %c0_23 = arith.constant 0 : index
    %23 = vector.load %arg4[%c8, %c0_23] : memref<72x8xf32, #tpu.memory_space<vmem>>, vector<8x8xf32>
    %cst_24 = arith.constant dense<0.000000e+00> : vector<256x8xf32>
    %24 = tpu.matmul %22, %23, %cst_24 {dimension_numbers = #tpu.dot_dimension_numbers<[1], [0], [0], [1], [0, 0, 1, 1], [], []>} : vector<256x8xf32>, vector<8x8xf32>, vector<256x8xf32> -> vector<256x8xf32>
    %25 = arith.addf %20, %24 : vector<256x8xf32>
    %c0_25 = arith.constant 0 : index
    %c2 = arith.constant 2 : index
    %c0_26 = arith.constant 0 : index
    %26 = vector.load %arg9[%c0_25, %c2, %c0_26] : memref<18x18x8xf32, #tpu.memory_space<vmem>>, vector<16x16x8xf32>
    %27 = vector.shape_cast %26 : vector<16x16x8xf32> to vector<256x8xf32>
    %c16 = arith.constant 16 : index
    %c0_27 = arith.constant 0 : index
    %28 = vector.load %arg4[%c16, %c0_27] : memref<72x8xf32, #tpu.memory_space<vmem>>, vector<8x8xf32>
    %cst_28 = arith.constant dense<0.000000e+00> : vector<256x8xf32>
    %29 = tpu.matmul %27, %28, %cst_28 {dimension_numbers = #tpu.dot_dimension_numbers<[1], [0], [0], [1], [0, 0, 1, 1], [], []>} : vector<256x8xf32>, vector<8x8xf32>, vector<256x8xf32> -> vector<256x8xf32>
    %30 = arith.addf %25, %29 : vector<256x8xf32>
    %c1_29 = arith.constant 1 : index
    %c0_30 = arith.constant 0 : index
    %c0_31 = arith.constant 0 : index
    %31 = vector.load %arg9[%c1_29, %c0_30, %c0_31] : memref<18x18x8xf32, #tpu.memory_space<vmem>>, vector<16x16x8xf32>
    %32 = vector.shape_cast %31 : vector<16x16x8xf32> to vector<256x8xf32>
    %c24 = arith.constant 24 : index
    %c0_32 = arith.constant 0 : index
    %33 = vector.load %arg4[%c24, %c0_32] : memref<72x8xf32, #tpu.memory_space<vmem>>, vector<8x8xf32>
    %cst_33 = arith.constant dense<0.000000e+00> : vector<256x8xf32>
    %34 = tpu.matmul %32, %33, %cst_33 {dimension_numbers = #tpu.dot_dimension_numbers<[1], [0], [0], [1], [0, 0, 1, 1], [], []>} : vector<256x8xf32>, vector<8x8xf32>, vector<256x8xf32> -> vector<256x8xf32>
    %35 = arith.addf %30, %34 : vector<256x8xf32>
    %c1_34 = arith.constant 1 : index
    %c1_35 = arith.constant 1 : index
    %c0_36 = arith.constant 0 : index
    %36 = vector.load %arg9[%c1_34, %c1_35, %c0_36] : memref<18x18x8xf32, #tpu.memory_space<vmem>>, vector<16x16x8xf32>
    %37 = vector.shape_cast %36 : vector<16x16x8xf32> to vector<256x8xf32>
    %c32 = arith.constant 32 : index
    %c0_37 = arith.constant 0 : index
    %38 = vector.load %arg4[%c32, %c0_37] : memref<72x8xf32, #tpu.memory_space<vmem>>, vector<8x8xf32>
    %cst_38 = arith.constant dense<0.000000e+00> : vector<256x8xf32>
    %39 = tpu.matmul %37, %38, %cst_38 {dimension_numbers = #tpu.dot_dimension_numbers<[1], [0], [0], [1], [0, 0, 1, 1], [], []>} : vector<256x8xf32>, vector<8x8xf32>, vector<256x8xf32> -> vector<256x8xf32>
    %40 = arith.addf %35, %39 : vector<256x8xf32>
    %c1_39 = arith.constant 1 : index
    %c2_40 = arith.constant 2 : index
    %c0_41 = arith.constant 0 : index
    %41 = vector.load %arg9[%c1_39, %c2_40, %c0_41] : memref<18x18x8xf32, #tpu.memory_space<vmem>>, vector<16x16x8xf32>
    %42 = vector.shape_cast %41 : vector<16x16x8xf32> to vector<256x8xf32>
    %c40 = arith.constant 40 : index
    %c0_42 = arith.constant 0 : index
    %43 = vector.load %arg4[%c40, %c0_42] : memref<72x8xf32, #tpu.memory_space<vmem>>, vector<8x8xf32>
    %cst_43 = arith.constant dense<0.000000e+00> : vector<256x8xf32>
    %44 = tpu.matmul %42, %43, %cst_43 {dimension_numbers = #tpu.dot_dimension_numbers<[1], [0], [0], [1], [0, 0, 1, 1], [], []>} : vector<256x8xf32>, vector<8x8xf32>, vector<256x8xf32> -> vector<256x8xf32>
    %45 = arith.addf %40, %44 : vector<256x8xf32>
    %c2_44 = arith.constant 2 : index
    %c0_45 = arith.constant 0 : index
    %c0_46 = arith.constant 0 : index
    %46 = vector.load %arg9[%c2_44, %c0_45, %c0_46] : memref<18x18x8xf32, #tpu.memory_space<vmem>>, vector<16x16x8xf32>
    %47 = vector.shape_cast %46 : vector<16x16x8xf32> to vector<256x8xf32>
    %c48 = arith.constant 48 : index
    %c0_47 = arith.constant 0 : index
    %48 = vector.load %arg4[%c48, %c0_47] : memref<72x8xf32, #tpu.memory_space<vmem>>, vector<8x8xf32>
    %cst_48 = arith.constant dense<0.000000e+00> : vector<256x8xf32>
    %49 = tpu.matmul %47, %48, %cst_48 {dimension_numbers = #tpu.dot_dimension_numbers<[1], [0], [0], [1], [0, 0, 1, 1], [], []>} : vector<256x8xf32>, vector<8x8xf32>, vector<256x8xf32> -> vector<256x8xf32>
    %50 = arith.addf %45, %49 : vector<256x8xf32>
    %c2_49 = arith.constant 2 : index
    %c1_50 = arith.constant 1 : index
    %c0_51 = arith.constant 0 : index
    %51 = vector.load %arg9[%c2_49, %c1_50, %c0_51] : memref<18x18x8xf32, #tpu.memory_space<vmem>>, vector<16x16x8xf32>
    %52 = vector.shape_cast %51 : vector<16x16x8xf32> to vector<256x8xf32>
    %c56 = arith.constant 56 : index
    %c0_52 = arith.constant 0 : index
    %53 = vector.load %arg4[%c56, %c0_52] : memref<72x8xf32, #tpu.memory_space<vmem>>, vector<8x8xf32>
    %cst_53 = arith.constant dense<0.000000e+00> : vector<256x8xf32>
    %54 = tpu.matmul %52, %53, %cst_53 {dimension_numbers = #tpu.dot_dimension_numbers<[1], [0], [0], [1], [0, 0, 1, 1], [], []>} : vector<256x8xf32>, vector<8x8xf32>, vector<256x8xf32> -> vector<256x8xf32>
    %55 = arith.addf %50, %54 : vector<256x8xf32>
    %c2_54 = arith.constant 2 : index
    %c2_55 = arith.constant 2 : index
    %c0_56 = arith.constant 0 : index
    %56 = vector.load %arg9[%c2_54, %c2_55, %c0_56] : memref<18x18x8xf32, #tpu.memory_space<vmem>>, vector<16x16x8xf32>
    %57 = vector.shape_cast %56 : vector<16x16x8xf32> to vector<256x8xf32>
    %c64 = arith.constant 64 : index
    %c0_57 = arith.constant 0 : index
    %58 = vector.load %arg4[%c64, %c0_57] : memref<72x8xf32, #tpu.memory_space<vmem>>, vector<8x8xf32>
    %cst_58 = arith.constant dense<0.000000e+00> : vector<256x8xf32>
    %59 = tpu.matmul %57, %58, %cst_58 {dimension_numbers = #tpu.dot_dimension_numbers<[1], [0], [0], [1], [0, 0, 1, 1], [], []>} : vector<256x8xf32>, vector<8x8xf32>, vector<256x8xf32> -> vector<256x8xf32>
    %60 = arith.addf %55, %59 : vector<256x8xf32>
    %c0_59 = arith.constant 0 : index
    %c0_60 = arith.constant 0 : index
    %61 = vector.load %arg5[%c0_59, %c0_60] : memref<1x8xf32, #tpu.memory_space<vmem>>, vector<1x8xf32>
    %62 = vector.broadcast %61 : vector<1x8xf32> to vector<256x8xf32>
    %63 = arith.addf %60, %62 : vector<256x8xf32>
    %64 = vector.shape_cast %63 : vector<256x8xf32> to vector<16x16x8xf32>
    %c0_61 = arith.constant 0 : index
    %c0_62 = arith.constant 0 : index
    %c0_63 = arith.constant 0 : index
    %c0_64 = arith.constant 0 : index
    %65 = vector.load %arg6[%c0_61, %c0_62, %c0_63, %c0_64] : memref<1x16x16x8xf32, #tpu.memory_space<vmem>>, vector<1x16x16x8xf32>
    %66 = vector.shape_cast %65 : vector<1x16x16x8xf32> to vector<16x16x8xf32>
    %67 = vector.shape_cast %64 : vector<16x16x8xf32> to vector<1x16x16x8xf32>
    tpu.vector_store %arg6[%c0_61, %c0_62, %c0_63, %c0_64], %67 {strides = array<i32>} : memref<1x16x16x8xf32, #tpu.memory_space<vmem>>, vector<1x16x16x8xf32>,
    %cst_65 = arith.constant dense<0.000000e+00> : vector<8xf32>
    %68 = vector.multi_reduction <add>, %63, %cst_65 [0] : vector<256x8xf32> to vector<8xf32>
    %69 = vector.shape_cast %68 : vector<8xf32> to vector<1x8xf32>
    %70 = vector.shape_cast %69 : vector<1x8xf32> to vector<1x1x8xf32>
    %c0_66 = arith.constant 0 : index
    %c0_67 = arith.constant 0 : index
    %c0_68 = arith.constant 0 : index
    %71 = vector.load %arg7[%c0_66, %c0_67, %c0_68] : memref<1x1x8xf32, #tpu.memory_space<vmem>>, vector<1x1x8xf32>
    tpu.vector_store %arg7[%c0_66, %c0_67, %c0_68], %70 {strides = array<i32>} : memref<1x1x8xf32, #tpu.memory_space<vmem>>, vector<1x1x8xf32>,
    %72 = arith.mulf %63, %63 : vector<256x8xf32>
    %cst_69 = arith.constant dense<0.000000e+00> : vector<8xf32>
    %73 = vector.multi_reduction <add>, %72, %cst_69 [0] : vector<256x8xf32> to vector<8xf32>
    %74 = vector.shape_cast %73 : vector<8xf32> to vector<1x8xf32>
    %75 = vector.shape_cast %74 : vector<1x8xf32> to vector<1x1x8xf32>
    %c0_70 = arith.constant 0 : index
    %c0_71 = arith.constant 0 : index
    %c0_72 = arith.constant 0 : index
    %76 = vector.load %arg8[%c0_70, %c0_71, %c0_72] : memref<1x1x8xf32, #tpu.memory_space<vmem>>, vector<1x1x8xf32>
    tpu.vector_store %arg8[%c0_70, %c0_71, %c0_72], %75 {strides = array<i32>} : memref<1x1x8xf32, #tpu.memory_space<vmem>>, vector<1x1x8xf32>,
    return
  }
  func.func @transform_0(%arg0: i32) -> (i32, i32, i32, i32) {
    %c0_i32 = arith.constant 0 : i32
    %c0_i32_0 = arith.constant 0 : i32
    %c0_i32_1 = arith.constant 0 : i32
    %c0_i32_2 = arith.constant 0 : i32
    return %arg0, %c0_i32, %c0_i32_0, %c0_i32_1 : i32, i32, i32, i32
  }
  func.func @transform_1(%arg0: i32) -> (i32, i32) {
    %c0_i32 = arith.constant 0 : i32
    %c0_i32_0 = arith.constant 0 : i32
    %c0_i32_1 = arith.constant 0 : i32
    return %c0_i32, %c0_i32_0 : i32, i32
  }
  func.func @transform_2(%arg0: i32) -> (i32, i32) {
    %c0_i32 = arith.constant 0 : i32
    %c0_i32_0 = arith.constant 0 : i32
    %c0_i32_1 = arith.constant 0 : i32
    return %c0_i32, %c0_i32_0 : i32, i32
  }
  func.func @transform_3(%arg0: i32) -> (i32, i32) {
    %c0_i32 = arith.constant 0 : i32
    %c0_i32_0 = arith.constant 0 : i32
    %c0_i32_1 = arith.constant 0 : i32
    return %c0_i32, %c0_i32_0 : i32, i32
  }
  func.func @transform_4(%arg0: i32) -> (i32, i32) {
    %c0_i32 = arith.constant 0 : i32
    %c0_i32_0 = arith.constant 0 : i32
    %c0_i32_1 = arith.constant 0 : i32
    return %c0_i32, %c0_i32_0 : i32, i32
  }
  func.func @transform_5(%arg0: i32) -> (i32, i32, i32, i32) {
    %c0_i32 = arith.constant 0 : i32
    %c0_i32_0 = arith.constant 0 : i32
    %c0_i32_1 = arith.constant 0 : i32
    %c0_i32_2 = arith.constant 0 : i32
    return %arg0, %c0_i32, %c0_i32_0, %c0_i32_1 : i32, i32, i32, i32
  }
  func.func @transform_6(%arg0: i32) -> (i32, i32, i32) {
    %c0_i32 = arith.constant 0 : i32
    %c0_i32_0 = arith.constant 0 : i32
    %c0_i32_1 = arith.constant 0 : i32
    return %arg0, %c0_i32, %c0_i32_0 : i32, i32, i32
  }
  func.func @transform_7(%arg0: i32) -> (i32, i32, i32) {
    %c0_i32 = arith.constant 0 : i32
    %c0_i32_0 = arith.constant 0 : i32
    %c0_i32_1 = arith.constant 0 : i32
    return %arg0, %c0_i32, %c0_i32_0 : i32, i32, i32
  }
}

module attributes {stable_mosaic.version = 11 : i64} {
  func.func @bn_add_relu_kernel(%arg0: i32, %arg1: memref<1x16x128xf32, #tpu.memory_space<vmem>>, %arg2: memref<1x128xf32, #tpu.memory_space<vmem>>, %arg3: memref<1x128xf32, #tpu.memory_space<vmem>>, %arg4: memref<1x16x128xf32, #tpu.memory_space<vmem>>, %arg5: memref<1x16x128xf32, #tpu.memory_space<vmem>>) attributes {dimension_semantics = [#tpu.dimension_semantics<parallel>], iteration_bounds = array<i64: 2>, scalar_prefetch = 0 : i64, scratch_operands = 0 : i64, tpu.core_type = #tpu.core_type<tc>, window_params = [{transform_indices = @transform_0, window_bounds = array<i64: 1, 16, 128>}, {pipeline_mode = #tpu.pipeline_mode<synchronous>, transform_indices = @transform_1, window_bounds = array<i64: 1, 128>}, {pipeline_mode = #tpu.pipeline_mode<synchronous>, transform_indices = @transform_2, window_bounds = array<i64: 1, 128>}, {transform_indices = @transform_3, window_bounds = array<i64: 1, 16, 128>}, {transform_indices = @transform_4, window_bounds = array<i64: 1, 16, 128>}]} {
    %c0 = arith.constant 0 : index
    %c0_0 = arith.constant 0 : index
    %c0_1 = arith.constant 0 : index
    %0 = vector.load %arg1[%c0, %c0_0, %c0_1] : memref<1x16x128xf32, #tpu.memory_space<vmem>>, vector<1x16x128xf32>
    %c0_2 = arith.constant 0 : index
    %c0_3 = arith.constant 0 : index
    %1 = vector.load %arg2[%c0_2, %c0_3] : memref<1x128xf32, #tpu.memory_space<vmem>>, vector<1x128xf32>
    %2 = vector.shape_cast %1 : vector<1x128xf32> to vector<1x1x128xf32>
    %3 = vector.broadcast %2 : vector<1x1x128xf32> to vector<1x16x128xf32>
    %4 = arith.mulf %0, %3 : vector<1x16x128xf32>
    %c0_4 = arith.constant 0 : index
    %c0_5 = arith.constant 0 : index
    %5 = vector.load %arg3[%c0_4, %c0_5] : memref<1x128xf32, #tpu.memory_space<vmem>>, vector<1x128xf32>
    %6 = vector.shape_cast %5 : vector<1x128xf32> to vector<1x1x128xf32>
    %7 = vector.broadcast %6 : vector<1x1x128xf32> to vector<1x16x128xf32>
    %8 = arith.addf %4, %7 : vector<1x16x128xf32>
    %c0_6 = arith.constant 0 : index
    %c0_7 = arith.constant 0 : index
    %c0_8 = arith.constant 0 : index
    %9 = vector.load %arg4[%c0_6, %c0_7, %c0_8] : memref<1x16x128xf32, #tpu.memory_space<vmem>>, vector<1x16x128xf32>
    %10 = arith.addf %8, %9 : vector<1x16x128xf32>
    %cst = arith.constant 0.000000e+00 : f32
    %11 = vector.broadcast %cst : f32 to vector<1x16x128xf32>
    %12 = arith.maximumf %10, %11 : vector<1x16x128xf32>
    %c0_9 = arith.constant 0 : index
    %c0_10 = arith.constant 0 : index
    %c0_11 = arith.constant 0 : index
    %13 = vector.load %arg5[%c0_9, %c0_10, %c0_11] : memref<1x16x128xf32, #tpu.memory_space<vmem>>, vector<1x16x128xf32>
    tpu.vector_store %arg5[%c0_9, %c0_10, %c0_11], %12 {strides = array<i32>} : memref<1x16x128xf32, #tpu.memory_space<vmem>>, vector<1x16x128xf32>,
    return
  }
  func.func @transform_0(%arg0: i32) -> (i32, i32, i32) {
    %c0_i32 = arith.constant 0 : i32
    %c0_i32_0 = arith.constant 0 : i32
    %c0_i32_1 = arith.constant 0 : i32
    return %arg0, %c0_i32, %c0_i32_0 : i32, i32, i32
  }
  func.func @transform_1(%arg0: i32) -> (i32, i32) {
    %c0_i32 = arith.constant 0 : i32
    %c0_i32_0 = arith.constant 0 : i32
    %c0_i32_1 = arith.constant 0 : i32
    return %c0_i32, %c0_i32_0 : i32, i32
  }
  func.func @transform_2(%arg0: i32) -> (i32, i32) {
    %c0_i32 = arith.constant 0 : i32
    %c0_i32_0 = arith.constant 0 : i32
    %c0_i32_1 = arith.constant 0 : i32
    return %c0_i32, %c0_i32_0 : i32, i32
  }
  func.func @transform_3(%arg0: i32) -> (i32, i32, i32) {
    %c0_i32 = arith.constant 0 : i32
    %c0_i32_0 = arith.constant 0 : i32
    %c0_i32_1 = arith.constant 0 : i32
    return %arg0, %c0_i32, %c0_i32_0 : i32, i32, i32
  }
  func.func @transform_4(%arg0: i32) -> (i32, i32, i32) {
    %c0_i32 = arith.constant 0 : i32
    %c0_i32_0 = arith.constant 0 : i32
    %c0_i32_1 = arith.constant 0 : i32
    return %arg0, %c0_i32, %c0_i32_0 : i32, i32, i32
  }
}

</mosaic_0001>

<bundles_post_ra>
// kernel: tile.13
= control target key start
LH: loop header
LB: loop body
LE: loop exit
PB: predicated region body
PF: predicated region fallthrough
CT: control target
= control target key end

     0   :  { %s28_s0 = inlined_call_operand.vmem [shape: f32[8], index: 0, kind: input, shape index: {}]   ;;  %s29_s1 = inlined_call_operand.vmem [shape: f32[16,8], index: 1, kind: output, shape index: {}]  }
   0x1   :  { %v4_v0 = vld [vmem:[%s28_s0] ss:$0 sm:$0xff] }
   0x2   :  { %5 = vst [vmem:[%s29_s1] sm:$0xff] %v4_v0 }
   0x3   :  { %8 = vst [vmem:[%s29_s1 + $0x8] sm:$0xff] %v4_v0 }

// kernel: tile.14
= control target key start
LH: loop header
LB: loop body
LE: loop exit
PB: predicated region body
PF: predicated region fallthrough
CT: control target
= control target key end

     0   :  { %s131_s10 = smov 120   ;;  %s132_s11 = smov 104   ;;  %vm3_vm0 = vcmask 64512   ;;  %vm9_vm1 = vcmask 1048512   ;;  %vm15_vm2 = vcmask 982912   ;;  %vm21_vm3 = vcmask 917312   ;;  %s207_s0 = inlined_call_operand.vmem [shape: f32[16,8], index: 0, kind: input, shape index: {}]   ;;  %s208_s1 = inlined_call_operand.vmem [shape: f32[1,128], index: 1, kind: output, shape index: {}]  }
   0x1   :  { %v101_v0 = vld [vmem:[%s207_s0 + $0xf] sm:$0x1]   ;;  %v103_v1 = vld [vmem:[%s207_s0 + $0xd] sm:$0x1]   ;;  %v105_v2 = vld [vmem:[%s207_s0 + $0xb] sm:$0x1]  }
   0x2   :  { %7 = vrot.lane.b32.xlu0 %v101_v0, %s131_s10  ;;  %19 = vrot.lane.b32.xlu1 %v103_v1, %s132_s11  ;;  %s133_s14 = smov 88   ;;  %v102_v3 = vld [vmem:[%s207_s0 + $0xe] sm:$0x1]   ;;  %v104_v4 = vld [vmem:[%s207_s0 + $0xc] sm:$0x1]   ;;  %s134_s19 = smov 112  }
   0x3   :  { %31 = vrot.lane.b32.xlu2 %v105_v2, %s133_s14  ;;  %s135_s20 = smov 96   ;;  %v106_v5 = vld [vmem:[%s207_s0 + $0xa] sm:$0x1]   ;;  %s136_s23 = smov 80   ;;  %v107_v6 = vld [vmem:[%s207_s0 + $0x9] sm:$0x1]  }
   0x4   :  { %v108_v7 = vld [vmem:[%s207_s0 + $0x8] sm:$0x1]   ;;  %s137_s28 = smov 72   ;;  %s138_s29 = smov 64   ;;  %v109_v8 = vld [vmem:[%s207_s0 + $0x7] sm:$0x1]  }
   0x5   :  { %s139_s3 = smov 56   ;;  %v110_v9 = vld [vmem:[%s207_s0 + $0x6] sm:$0x1]   ;;  %v111_v10 = vld [vmem:[%s207_s0 + $0x5] sm:$0x1]   ;;  %s140_s8 = smov 48  }
   0x6   :  { %s141_s9 = smov 40   ;;  %v112_v11 = vld [vmem:[%s207_s0 + $0x4] sm:$0x1]   ;;  %s142_s12 = smov 32   ;;  %v113_v12 = vld [vmem:[%s207_s0 + $0x3] sm:$0x1]  }
   0x7   :  { %v114_v13 = vld [vmem:[%s207_s0 + $0x2] sm:$0x1]   ;;  %s143_s17 = smov 24   ;;  %s144_s18 = smov 16   ;;  %v115_v14 = vld [vmem:[%s207_s0 + $0x1] sm:$0x1]  }
   0x8   :  { %s145_s21 = smov 8   ;;  %v2_v15 = vld [vmem:[%s207_s0] sm:$0x1]   ;;  %vm27_vm4 = vcmask 851712   ;;  %vm33_vm5 = vcmask 786112   ;;  %vm39_vm6 = vcmask 720512  }
   0x9   :  { %4 = vst.msk [vmem:[#allocation0] sm:$0x1] %vm3_vm0, %v2_v15   ;;  %vm45_vm7 = vcmask 654912   ;;  %vm51_vm8 = vcmask 589312   ;;  %vm57_vm9 = vcmask 523712   ;;  %vm63_vm10 = vcmask 458112  }
   0xa   :  { %13 = vrot.lane.b32.xlu0 %v102_v3, %s134_s19  ;;  %25 = vrot.lane.b32.xlu1 %v104_v4, %s135_s20  ;;  %vm69_vm11 = vcmask 392512   ;;  %vm75_vm12 = vcmask 326912   ;;  %vm81_vm13 = vcmask 261312   ;;  %vm87_vm14 = vcmask 195712  }
   0xb   :  { %37 = vrot.lane.b32.xlu2 %v106_v5, %s136_s23  ;;  %vm93_vm15 = vcmask 130112  }
  0x12   :  { %43 = vrot.lane.b32.xlu0 %v107_v6, %s137_s28  ;;  %49 = vrot.lane.b32.xlu1 %v108_v7, %s138_s29 }
  0x13   :  { %55 = vrot.lane.b32.xlu2 %v109_v8, %s139_s3 }
  0x1a   :  { %61 = vrot.lane.b32.xlu0 %v110_v9, %s140_s8  ;;  %67 = vrot.lane.b32.xlu1 %v111_v10, %s141_s9 }
  0x1b   :  { %73 = vrot.lane.b32.xlu2 %v112_v11, %s142_s12 }
  0x22   :  { %79 = vrot.lane.b32.xlu0 %v113_v12, %s143_s17  ;;  %85 = vrot.lane.b32.xlu1 %v114_v13, %s144_s18 }
  0x23   :  { %91 = vrot.lane.b32.xlu2 %v115_v14, %s145_s21 }
  0x5d   :  { %v32_v16 = vpop.permute.xlu2 %31  }
  0x65   :  { %v38_v17 = vpop.permute.xlu2 %37  }
  0x6d   :  { %v56_v18 = vpop.permute.xlu2 %55  }
  0x74   :  { %v8_v19 = vpop.permute.xlu0 %7   ;;  %v20_v20 = vpop.permute.xlu1 %19  }
  0x75   :  { %10 = vst.msk [vmem:[#allocation0] sm:$0x1] %vm9_vm1, %v8_v19   ;;  %v74_v21 = vpop.permute.xlu2 %73  }
  0x7c   :  { %v14_v22 = vpop.permute.xlu0 %13   ;;  %v26_v23 = vpop.permute.xlu1 %25  }
  0x7d   :  { %16 = vst.msk [vmem:[#allocation0] sm:$0x1] %vm15_vm2, %v14_v22   ;;  %v92_v24 = vpop.permute.xlu2 %91  }
  0x7e   :  { %22 = vst.msk [vmem:[#allocation0] sm:$0x1] %vm21_vm3, %v20_v20  }
  0x7f   :  { %28 = vst.msk [vmem:[#allocation0] sm:$0x1] %vm27_vm4, %v26_v23  }
  0x80   :  { %34 = vst.msk [vmem:[#allocation0] sm:$0x1] %vm33_vm5, %v32_v16  }
  0x81   :  { %40 = vst.msk [vmem:[#allocation0] sm:$0x1] %vm39_vm6, %v38_v17  }
  0x84   :  { %v44_v25 = vpop.permute.xlu0 %43   ;;  %v50_v26 = vpop.permute.xlu1 %49  }
  0x85   :  { %46 = vst.msk [vmem:[#allocation0] sm:$0x1] %vm45_vm7, %v44_v25  }
  0x86   :  { %52 = vst.msk [vmem:[#allocation0] sm:$0x1] %vm51_vm8, %v50_v26  }
  0x87   :  { %58 = vst.msk [vmem:[#allocation0] sm:$0x1] %vm57_vm9, %v56_v18  }
  0x8c   :  { %v62_v27 = vpop.permute.xlu0 %61   ;;  %v68_v28 = vpop.permute.xlu1 %67  }
  0x8d   :  { %64 = vst.msk [vmem:[#allocation0] sm:$0x1] %vm63_vm10, %v62_v27  }
  0x8e   :  { %70 = vst.msk [vmem:[#allocation0] sm:$0x1] %vm69_vm11, %v68_v28  }
  0x8f   :  { %76 = vst.msk [vmem:[#allocation0] sm:$0x1] %vm75_vm12, %v74_v21  }
  0x94   :  { %v80_v29 = vpop.permute.xlu0 %79   ;;  %v86_v30 = vpop.permute.xlu1 %85  }
  0x95   :  { %82 = vst.msk [vmem:[#allocation0] sm:$0x1] %vm81_vm13, %v80_v29  }
  0x96   :  { %88 = vst.msk [vmem:[#allocation0] sm:$0x1] %vm87_vm14, %v86_v30  }
  0x97   :  { %94 = vst.msk [vmem:[#allocation0] sm:$0x1] %vm93_vm15, %v92_v24  }
  0x9e   :  { %v97_v31 = vld [vmem:[#allocation0] sm:$0x1] }
  0x9f   :  { %100 = vst [vmem:[%s208_s1] sm:$0x1] %v97_v31 }

// kernel: block_forward.5
= control target key start
LH: loop header
LB: loop body
LE: loop exit
PB: predicated region body
PF: predicated region fallthrough
CT: control target
= control target key end

     0   :  { %s366_s15 = smov 0   ;;  %s392_s0 = inlined_call_operand.vmem [shape: f32[2,16,128], index: 0, kind: input, shape index: {}]   ;;  %s393_s1 = inlined_call_operand.vmem [shape: f32[1,128], index: 1, kind: input, shape index: {}]   ;;  %s394_s2 = inlined_call_operand.vmem [shape: f32[1,128], index: 2, kind: input, shape index: {}]   ;;  %s395_s3 = inlined_call_operand.vmem [shape: f32[2,16,128], index: 3, kind: input, shape index: {}]   ;;  %s396_s4 = inlined_call_operand.vmem [shape: f32[2,16,128], index: 4, kind: output, shape index: {}]  }
   0x1 LB: > { %s307_s16 = sadd.s32 4294967295, %s339_s15   ;;  %p311_p0 = scmp.ge.s32.totalorder %s339_s15, 1  ;;  %s339_s15 = sphi %s366_s15, %s14_s15  }
   0x2   : > { %p172_p1 = scmp.lt.s32.totalorder %s339_s15, 3 }
   0x4   : > { %p173_p2 = pnand %p311_p0, %p172_p1 }
   0x5   : > { %p203_p3 = scmp.lt.s32.totalorder (!%p173_p2), %s307_s16, 1 }
   0x6   : > { %176 = sbr.rel (%p173_p2) target bundleno = 25 (0x19), region = 36 }
   0xb   : > { %s398_s16 = smov (!%p203_p3, %s307_s16), 1  ;;  %v331_v0 = vld [vmem:[%s393_s1] ss:$0 sm:$0xff] }
   0xc   : > { %s320_s19 = sshll.u32 %s398_s16, 4  ;;  %v332_v1 = vld [vmem:[%s394_s2] ss:$0 sm:$0xff] }
   0xd   : > { %s207_s22 = scalar_lea.vmem %s392_s0, %s320_s19  ;;  %s212_s25 = scalar_lea.vmem %s395_s3, %s320_s19 }
   0xe   : > { %v218_v2 = vld [vmem:[%s207_s22] sm:$0xff]  ;;  %v219_v3 = vld [vmem:[%s207_s22 + $0x8] sm:$0xff]  ;;  %s217_s30 = scalar_lea.vmem %s396_s4, %s320_s19 }
   0xf   : > { %v224_v4 = vmul.f32 %v331_v0, %v218_v2  ;;  %v225_v5 = vmul.f32 %v331_v0, %v219_v3  ;;  %v232_v6 = vld [vmem:[%s212_s25] sm:$0xff]  ;;  %v233_v7 = vld [vmem:[%s212_s25 + $0x8] sm:$0xff] }
  0x11   : > { %v230_v8 = vadd.f32 %v332_v1, %v224_v4  ;;  %v231_v9 = vadd.f32 %v332_v1, %v225_v5 }
  0x13   : > { %v234_v10 = vadd.f32 %v232_v6, %v230_v8  ;;  %v235_v11 = vadd.f32 %v233_v7, %v231_v9 }
  0x15   : > { %v236_v12 = vmax.f32 %v234_v10, 0.0  ;;  %v237_v13 = vmax.f32 %v235_v11, 0.0 }
  0x17   : > { %238 = vst [vmem:[%s217_s30] sm:$0xff] %v236_v12 }
  0x18   : > { %239 = vst [vmem:[%s217_s30 + $0x8] sm:$0xff] %v237_v13 }
  0x19 PF: > { %s14_s15 = sadd.s32 1, %s339_s15  }
  0x1a   : > { %p11_p4 = scmp.ge.s32.totalorder %s14_s15, 4  }
  0x1c   :  { %13 = sbr.rel (!%p11_p4) target bundleno = 1 (0x1), region = 69 }

// kernel: block_forward.3
= control target key start
LH: loop header
LB: loop body
LE: loop exit
PB: predicated region body
PF: predicated region fallthrough
CT: control target
= control target key end

     0   :  { %s3466_s18 = smov 0   ;;  %s4685_s0 = inlined_call_operand.vmem [shape: f32[2,16,16,8], index: 0, kind: input, shape index: {}]   ;;  %s4686_s1 = inlined_call_operand.vmem [shape: f32[72,8], index: 1, kind: input, shape index: {}]   ;;  %s4687_s2 = inlined_call_operand.vmem [shape: f32[1,8], index: 2, kind: input, shape index: {}]   ;;  %s4688_s3 = inlined_call_operand.vmem [shape: f32[2,16,16,8], index: 3, kind: output, shape index: {0}]   ;;  %s4689_s4 = inlined_call_operand.vmem [shape: f32[2,1,8], index: 4, kind: output, shape index: {1}]   ;;  %s4690_s5 = inlined_call_operand.vmem [shape: f32[2,1,8], index: 5, kind: output, shape index: {2}]  }
   0x1 LB: > { %s3112_s19 = sadd.s32 4294967295, %s3433_s18   ;;  %p3116_p0 = scmp.ge.s32.totalorder %s3433_s18, 1  ;;  %s3433_s18 = sphi %s3466_s18, %s16_s18  }
   0x2   : > { %p192_p1 = scmp.lt.s32.totalorder %s3433_s18, 3 }
   0x4   : > { %p193_p2 = pnand %p3116_p0, %p192_p1 }
   0x6   : > { %196 = sbr.rel (%p193_p2) target bundleno = 796 (0x31c), region = 32 }
   0xb   : > { %v428_v0 = vld [vmem:[%s4686_s1 + $0x8] sm:$0xff]  ;;  %p226_p3 = scmp.lt.s32.totalorder %s3112_s19, 1  ;;  %vm274_vm0 = vcmask 64512   ;;  %v3435_v1 = vmov 0.0   ;;  %v879_v4 = vld [vmem:[%s4686_s1 + $0x10] sm:$0xff]  ;;  %v1153_v5 = vld [vmem:[%s4686_s1 + $0x18] sm:$0xff] }
   0xc   : > { %3413 = vmatpush.msra.mxu1 %v428_v0  ;;  %3414 = vmatpush.msra.mxu2 %v428_v0  ;;  %288 = vst.msk [vmem:[#allocation2 + $0x60] sm:$0xff] %vm274_vm0, %v3435_v1  ;;  %v395_v6 = vld [vmem:[%s4686_s1] sm:$0xff]  ;;  %vm277_vm1 = vcmask 58368   ;;  %v1976_v57 = vld [vmem:[%s4686_s1 + $0x30] sm:$0xff]  ;;  %v2250_v58 = vld [vmem:[%s4686_s1 + $0x38] sm:$0xff]  ;;  %vm2903_vm2 = vcmask 57344  }
   0xd   : > { %s4792_s19 = smov (!%p226_p3, %s3112_s19), 1  ;;  %289 = vst.msk [vmem:[#allocation2 + $0x68] sm:$0xff] %vm274_vm0, %v3435_v1  ;;  %3415 = vmatpush.msra.mxu3 %v428_v0  ;;  %540 = vmatpush.msra.mxu0 %v428_v0  ;;  %v1427_v10 = vld [vmem:[%s4686_s1 + $0x20] sm:$0xff]  ;;  %v1701_v59 = vld [vmem:[%s4686_s1 + $0x28] sm:$0xff] }
   0xe   : > { %275 = vst.msk [vmem:[#allocation2] sm:$0xff] %vm274_vm0, %v3435_v1  ;;  %s3411_s22 = sshll.u32 %s4792_s19, 8  ;;  %991 = vmatpush.msrb.mxu2 %v879_v4  ;;  %749 = vmatpush.msrb.mxu1 %v395_v6  ;;  %v2524_v0 = vld [vmem:[%s4686_s1 + $0x40] sm:$0xff]  ;;  %s238_s28 = scalar_lea.vmem %s4689_s4, %s4792_s19 }
   0xf   : > { %276 = vst.msk [vmem:[#allocation2 + $0x8] sm:$0xff] %vm274_vm0, %v3435_v1  ;;  %s3493_s25 = scalar_lea.vmem %s4685_s0, %s3411_s22  ;;  %1265 = vmatpush.msrb.mxu3 %v1153_v5  ;;  %1539 = vmatpush.msrb.mxu0 %v1427_v10  ;;  %s4416_s24 = scalar_lea.vmem %s4688_s3, %s3411_s22 }
  0x10   : > { %279 = vst.msk [vmem:[#allocation2 + $0x18] sm:$0xff] %vm274_vm0, %v3435_v1  ;;  %v248_v2 = vld [vmem:[%s3493_s25 + $0x30] sm:$0xff]  ;;  %v249_v11 = vld [vmem:[%s3493_s25 + $0x38] sm:$0xff]  ;;  %v250_v18 = vld [vmem:[%s3493_s25 + $0x40] sm:$0xff]  ;;  %s241_s6 = scalar_lea.vmem %s4690_s5, %s4792_s19 }
  0x11   : > { %280 = vst.msk [vmem:[#allocation2 + $0x20] sm:$0xff] %vm274_vm0, %v3435_v1  ;;  %v256_v7 = vld [vmem:[%s3493_s25 + $0x70] sm:$0xff]  ;;  %v257_v16 = vld [vmem:[%s3493_s25 + $0x78] sm:$0xff]  ;;  %v258_v19 = vld [vmem:[%s3493_s25 + $0x80] sm:$0xff] }
  0x12   : > { %337 = vst.msk [vmem:[#allocation2 + $0x61] sm:$0xff] %vm274_vm0, %v248_v2  ;;  %v264_v9 = vld [vmem:[%s3493_s25 + $0xb0] sm:$0xff]  ;;  %v265_v17 = vld [vmem:[%s3493_s25 + $0xb8] sm:$0xff]  ;;  %v266_v20 = vld [vmem:[%s3493_s25 + $0xc0] sm:$0xff] }
  0x13   : > { %282 = vst.msk [vmem:[#allocation2 + $0x30] sm:$0xff] %vm274_vm0, %v3435_v1  ;;  %v251_v21 = vld [vmem:[%s3493_s25 + $0x48] sm:$0xff]  ;;  %v242_v23 = vld [vmem:[%s3493_s25] sm:$0xff]  ;;  %v252_v25 = vld [vmem:[%s3493_s25 + $0x50] sm:$0xff] }
  0x14   : > { %283 = vst.msk [vmem:[#allocation2 + $0x38] sm:$0xff] %vm274_vm0, %v3435_v1  ;;  %v259_v22 = vld [vmem:[%s3493_s25 + $0x88] sm:$0xff]  ;;  %v260_v27 = vld [vmem:[%s3493_s25 + $0x90] sm:$0xff]  ;;  %v253_v32 = vld [vmem:[%s3493_s25 + $0x58] sm:$0xff] }
  0x15   : > { %285 = vst.msk [vmem:[#allocation2 + $0x48] sm:$0xff] %vm274_vm0, %v3435_v1  ;;  %v267_v24 = vld [vmem:[%s3493_s25 + $0xc8] sm:$0xff]  ;;  %v268_v31 = vld [vmem:[%s3493_s25 + $0xd0] sm:$0xff]  ;;  %v261_v33 = vld [vmem:[%s3493_s25 + $0x98] sm:$0xff] }
  0x16   : > { %286 = vst.msk [vmem:[#allocation2 + $0x50] sm:$0xff] %vm274_vm0, %v3435_v1  ;;  %v396_v8 = vld [vmem:[#allocation2 + $0x1] sm:$0xff]  ;;  %v244_v34 = vld [vmem:[%s3493_s25 + $0x10] sm:$0xff]  ;;  %v269_v36 = vld [vmem:[%s3493_s25 + $0xd8] sm:$0xff] }
  0x17   : > { %291 = vst.msk [vmem:[#allocation2 + $0x78] sm:$0xff] %vm274_vm0, %v3435_v1  ;;  %3121 = vmatmul.msk.f32.vlgmr.msra.gmra.mxu0 %vm274_vm0, %v396_v8  ;;  %v243_v29 = vld [vmem:[%s3493_s25 + $0x8] sm:$0xff]  ;;  %v254_v39 = vld [vmem:[%s3493_s25 + $0x60] sm:$0xff]  ;;  %v245_v42 = vld [vmem:[%s3493_s25 + $0x18] sm:$0xff] }
  0x18   : > { %292 = vst.msk [vmem:[#allocation2 + $0x80] sm:$0xff] %vm274_vm0, %v3435_v1  ;;  %v262_v41 = vld [vmem:[%s3493_s25 + $0xa0] sm:$0xff]  ;;  %v255_v44 = vld [vmem:[%s3493_s25 + $0x68] sm:$0xff]  ;;  %2636 = vmatpush.msra.mxu0 %v2524_v0 }
  0x19   : > { %v3513_v3 = vld [vmem:[#allocation2 + $0x61] sm:$0xff]  ;;  %294 = vst.msk [vmem:[#allocation2 + $0x90] sm:$0xff] %vm274_vm0, %v3435_v1 }
  0x1a   : > { %3129 = vmatmul.msk.f32.vlgmr.msra.gmra.mxu1 %vm274_vm0, %v3513_v3  ;;  %295 = vst.msk [vmem:[#allocation2 + $0x98] sm:$0xff] %vm274_vm0, %v3435_v1  ;;  %v270_v43 = vld [vmem:[%s3493_s25 + $0xe0] sm:$0xff]  ;;  %v263_v45 = vld [vmem:[%s3493_s25 + $0xa8] sm:$0xff] }
  0x1b   : > { %297 = vst.msk [vmem:[#allocation2 + $0xa8] sm:$0xff] %vm274_vm0, %v3435_v1  ;;  %v246_v47 = vld [vmem:[%s3493_s25 + $0x20] sm:$0xff]  ;;  %v271_v49 = vld [vmem:[%s3493_s25 + $0xe8] sm:$0xff]  ;;  %1813 = vmatpush.msra.mxu1 %v1701_v59 }
  0x1c   : > { %298 = vst.msk [vmem:[#allocation2 + $0xb0] sm:$0xff] %vm274_vm0, %v3435_v1  ;;  %v247_v52 = vld [vmem:[%s3493_s25 + $0x28] sm:$0xff] }
  0x1d   : > { %300 = vst.msk [vmem:[#allocation2 + $0xc0] sm:$0xff] %vm274_vm0, %v3435_v1  ;;  %v847_v10 = vld [vmem:[#allocation2 + $0x2] sm:$0xff] }
  0x1e   : > { %301 = vst.msk [vmem:[#allocation2 + $0xc8] sm:$0xff] %vm274_vm0, %v3435_v1 }
  0x1f   : > { %303 = vst.msk [vmem:[#allocation2 + $0xd8] sm:$0xff] %vm274_vm0, %v3435_v1 }
  0x20   : > { %304 = vst.msk [vmem:[#allocation2 + $0xe0] sm:$0xff] %vm274_vm0, %v3435_v1 }
  0x21   : > { %306 = vst.msk [vmem:[#allocation2 + $0xf0] sm:$0xff] %vm274_vm0, %v3435_v1 }
  0x22   : > { %307 = vst.msk [vmem:[#allocation2 + $0xf8] sm:$0xff] %vm274_vm0, %v3435_v1 }
  0x23   : > { %309 = vst.msk [vmem:[#allocation2 + $0x108] sm:$0xff] %vm274_vm0, %v3435_v1 }
  0x24   : > { %310 = vst.msk [vmem:[#allocation2 + $0x110] sm:$0xff] %vm274_vm0, %v3435_v1 }
  0x25   : > { %312 = vst.msk [vmem:[#allocation2 + $0x120] sm:$0xff] %vm274_vm0, %v3435_v1 }
  0x26   : > { %313 = vst.msk [vmem:[#allocation2 + $0x128] sm:$0xff] %vm274_vm0, %v3435_v1 }
  0x27   : > { %315 = vst.msk [vmem:[#allocation2 + $0x138] sm:$0xff] %vm274_vm0, %v3435_v1 }
  0x28   : > { %316 = vst.msk [vmem:[#allocation2 + $0x140] sm:$0xff] %vm274_vm0, %v3435_v1 }
  0x29   : > { %318 = vst.msk [vmem:[#allocation2 + $0x150] sm:$0xff] %vm274_vm0, %v3435_v1 }
  0x2a   : > { %319 = vst.msk [vmem:[#allocation2 + $0x158] sm:$0xff] %vm274_vm0, %v3435_v1 }
  0x2b   : > { %321 = vst.msk [vmem:[#allocation2 + $0x168] sm:$0xff] %vm274_vm0, %v3435_v1 }
  0x2c   : > { %322 = vst.msk [vmem:[#allocation2 + $0x170] sm:$0xff] %vm274_vm0, %v3435_v1 }
  0x2d   : > { %324 = vst.msk [vmem:[#allocation2 + $0x180] sm:$0xff] %vm274_vm0, %v3435_v1 }
  0x2e   : > { %325 = vst.msk [vmem:[#allocation2 + $0x188] sm:$0xff] %vm274_vm0, %v3435_v1 }
  0x2f   : > { %327 = vst.msk [vmem:[#allocation2 + $0x198] sm:$0xff] %vm274_vm0, %v3435_v1 }
  0x30   : > { %328 = vst.msk [vmem:[#allocation2 + $0x1a0] sm:$0xff] %vm274_vm0, %v3435_v1 }
  0x31   : > { %345 = vst.msk [vmem:[#allocation2 + $0xc1] sm:$0xff] %vm274_vm0, %v256_v7 }
  0x32   : > { %353 = vst.msk [vmem:[#allocation2 + $0x121] sm:$0xff] %vm274_vm0, %v264_v9  ;;  %v363_v9 = vld [vmem:[#allocation2] sm:$0xff] }
  0x33   : > { %290 = vst.msk [vmem:[#allocation2 + $0x70] sm:$0x3] %vm277_vm1, %v3435_v1 }
  0x34   : > { %338 = vst.msk [vmem:[#allocation2 + $0x69] sm:$0xff] %vm274_vm0, %v249_v11 }
  0x35   : > { %278 = vst.msk [vmem:[#allocation2 + $0x10] sm:$0x3] %vm277_vm1, %v3435_v1 }
  0x36   : > { %281 = vst.msk [vmem:[#allocation2 + $0x28] sm:$0x3] %vm277_vm1, %v3435_v1 }
  0x37   : > { %284 = vst.msk [vmem:[#allocation2 + $0x40] sm:$0x3] %vm277_vm1, %v3435_v1 }
  0x38   : > { %v3592_v12 = vld [vmem:[#allocation2 + $0xc1] sm:$0xff]  ;;  %287 = vst.msk [vmem:[#allocation2 + $0x58] sm:$0x3] %vm277_vm1, %v3435_v1 }
  0x39   : > { %3137 = vmatmul.msk.f32.vlgmr.msra.gmra.mxu2 %vm274_vm0, %v3592_v12  ;;  %v3598_v13 = vld [vmem:[#allocation2 + $0x121] sm:$0xff]  ;;  %293 = vst.msk [vmem:[#allocation2 + $0x88] sm:$0x3] %vm277_vm1, %v3435_v1 }
  0x3a   : > { %3145 = vmatmul.msk.f32.vlgmr.msra.gmra.mxu3 %vm274_vm0, %v3598_v13  ;;  %296 = vst.msk [vmem:[#allocation2 + $0xa0] sm:$0x3] %vm277_vm1, %v3435_v1  ;;  %2088 = vmatpush.msra.mxu2 %v1976_v57 }
  0x3b   : > { %v3606_v14 = vld [vmem:[#allocation2 + $0x69] sm:$0xff]  ;;  %299 = vst.msk [vmem:[#allocation2 + $0xb8] sm:$0x3] %vm277_vm1, %v3435_v1  ;;  %2362 = vmatpush.msra.mxu3 %v2250_v58 }
  0x3c   : > { %3130 = vmatmul.msk.f32.gmra.mxu1 %vm274_vm0, %v3606_v14  ;;  %302 = vst.msk [vmem:[#allocation2 + $0xd0] sm:$0x3] %vm277_vm1, %v3435_v1  ;;  %v397_v15 = vld [vmem:[#allocation2 + $0x9] sm:$0xff] }
  0x3d   : > { %305 = vst.msk [vmem:[#allocation2 + $0xe8] sm:$0x3] %vm277_vm1, %v3435_v1  ;;  %3122 = vmatmul.msk.f32.gmra.mxu0 %vm274_vm0, %v397_v15  ;;  %v364_v15 = vld [vmem:[#allocation2 + $0x8] sm:$0xff] }
  0x3e   : > { %308 = vst.msk [vmem:[#allocation2 + $0x100] sm:$0x3] %vm277_vm1, %v3435_v1 }
  0x3f   : > { %311 = vst.msk [vmem:[#allocation2 + $0x118] sm:$0x3] %vm277_vm1, %v3435_v1 }
  0x40   : > { %314 = vst.msk [vmem:[#allocation2 + $0x130] sm:$0x3] %vm277_vm1, %v3435_v1 }
  0x41   : > { %317 = vst.msk [vmem:[#allocation2 + $0x148] sm:$0x3] %vm277_vm1, %v3435_v1 }
  0x42   : > { %320 = vst.msk [vmem:[#allocation2 + $0x160] sm:$0x3] %vm277_vm1, %v3435_v1 }
  0x43   : > { %323 = vst.msk [vmem:[#allocation2 + $0x178] sm:$0x3] %vm277_vm1, %v3435_v1 }
  0x44   : > { %326 = vst.msk [vmem:[#allocation2 + $0x190] sm:$0x3] %vm277_vm1, %v3435_v1 }
  0x45   : > { %329 = vst.msk [vmem:[#allocation2 + $0x1a8] sm:$0x3] %vm277_vm1, %v3435_v1 }
  0x46   : > { %346 = vst.msk [vmem:[#allocation2 + $0xc9] sm:$0xff] %vm274_vm0, %v257_v16  ;;  %v848_v16 = vld [vmem:[#allocation2 + $0xa] sm:$0xff] }
  0x47   : > { %354 = vst.msk [vmem:[#allocation2 + $0x129] sm:$0xff] %vm274_vm0, %v265_v17 }
  0x48   : > { %339 = vst.msk [vmem:[#allocation2 + $0x79] sm:$0xff] %vm274_vm0, %v250_v18 }
  0x49   : > { %347 = vst.msk [vmem:[#allocation2 + $0xd9] sm:$0xff] %vm274_vm0, %v258_v19 }
  0x4a   : > { %355 = vst.msk [vmem:[#allocation2 + $0x139] sm:$0xff] %vm274_vm0, %v266_v20 }
  0x4b   : > { %340 = vst.msk [vmem:[#allocation2 + $0x81] sm:$0xff] %vm274_vm0, %v251_v21 }
  0x4c   : > { %348 = vst.msk [vmem:[#allocation2 + $0xe1] sm:$0xff] %vm274_vm0, %v259_v22 }
  0x4d   : > { %v3650_v26 = vld [vmem:[#allocation2 + $0xc9] sm:$0xff]  ;;  %331 = vst.msk [vmem:[#allocation2 + $0x19] sm:$0xff] %vm274_vm0, %v242_v23 }
  0x4e   : > { %3138 = vmatmul.msk.f32.gmra.mxu2 %vm274_vm0, %v3650_v26  ;;  %v3656_v28 = vld [vmem:[#allocation2 + $0x129] sm:$0xff]  ;;  %356 = vst.msk [vmem:[#allocation2 + $0x141] sm:$0xff] %vm274_vm0, %v267_v24 }
  0x4f   : > { %3146 = vmatmul.msk.f32.gmra.mxu3 %vm274_vm0, %v3656_v28  ;;  %v3662_v30 = vld [vmem:[#allocation2 + $0x79] sm:$0xff]  ;;  %341 = vst.msk [vmem:[#allocation2 + $0x91] sm:$0xff] %vm274_vm0, %v252_v25 }
  0x50   : > { %3131 = vmatmul.msk.f32.gmra.mxu1 %vm274_vm0, %v3662_v30  ;;  %349 = vst.msk [vmem:[#allocation2 + $0xf1] sm:$0xff] %vm274_vm0, %v260_v27  ;;  %v3674_v35 = vld [vmem:[#allocation2 + $0xd9] sm:$0xff] }
  0x51   : > { %332 = vst.msk [vmem:[#allocation2 + $0x21] sm:$0xff] %vm274_vm0, %v243_v29  ;;  %v3678_v37 = vld [vmem:[#allocation2 + $0x139] sm:$0xff] }
  0x52   : > { %357 = vst.msk [vmem:[#allocation2 + $0x151] sm:$0xff] %vm274_vm0, %v268_v31  ;;  %v3684_v40 = vld [vmem:[#allocation2 + $0x81] sm:$0xff] }
  0x53   : > { %342 = vst.msk [vmem:[#allocation2 + $0x99] sm:$0xff] %vm274_vm0, %v253_v32  ;;  %v3708_v48 = vld [vmem:[#allocation2 + $0xe1] sm:$0xff] }
  0x54   : > { %v3680_v38 = vld [vmem:[#allocation2 + $0x19] sm:$0xff]  ;;  %350 = vst.msk [vmem:[#allocation2 + $0xf9] sm:$0xff] %vm274_vm0, %v261_v33  ;;  %v3875_v33 = vld [vmem:[#allocation2 + $0x68] sm:$0xff] }
  0x55   : > { %3123 = vmatmul.msk.f32.gmra.mxu0 %vm274_vm0, %v3680_v38  ;;  %333 = vst.msk [vmem:[#allocation2 + $0x31] sm:$0xff] %vm274_vm0, %v244_v34  ;;  %v3712_v50 = vld [vmem:[#allocation2 + $0x141] sm:$0xff]  ;;  %v1121_v11 = vld [vmem:[#allocation2 + $0x18] sm:$0xff] }
  0x56   : > { %3139 = vmatmul.msk.f32.gmra.mxu2 %vm274_vm0, %v3674_v35  ;;  %358 = vst.msk [vmem:[#allocation2 + $0x159] sm:$0xff] %vm274_vm0, %v269_v36  ;;  %v3715_v51 = vld [vmem:[#allocation2 + $0x91] sm:$0xff]  ;;  %v3861_v29 = vld [vmem:[#allocation2 + $0x60] sm:$0xff] }
  0x57   : > { %3147 = vmatmul.msk.f32.gmra.mxu3 %vm274_vm0, %v3678_v37  ;;  %343 = vst.msk [vmem:[#allocation2 + $0xa9] sm:$0xff] %vm274_vm0, %v254_v39  ;;  %v3731_v54 = vld [vmem:[#allocation2 + $0xf1] sm:$0xff]  ;;  %v3887_v34 = vld [vmem:[#allocation2 + $0x62] sm:$0xff] }
  0x58   : > { %3132 = vmatmul.msk.f32.gmra.mxu1 %vm274_vm0, %v3684_v40  ;;  %351 = vst.msk [vmem:[#allocation2 + $0x109] sm:$0xff] %vm274_vm0, %v262_v41  ;;  %v3704_v46 = vld [vmem:[#allocation2 + $0x21] sm:$0xff] }
  0x59   : > { %334 = vst.msk [vmem:[#allocation2 + $0x39] sm:$0xff] %vm274_vm0, %v245_v42  ;;  %v3733_v55 = vld [vmem:[#allocation2 + $0x151] sm:$0xff]  ;;  %v1122_v17 = vld [vmem:[#allocation2 + $0x20] sm:$0xff] }
  0x5a   : > { %359 = vst.msk [vmem:[#allocation2 + $0x169] sm:$0xff] %vm274_vm0, %v270_v43  ;;  %v3735_v56 = vld [vmem:[#allocation2 + $0x99] sm:$0xff]  ;;  %v3823_v20 = vld [vmem:[#allocation2 + $0x22] sm:$0xff]  ;;  %v3907_v42 = vld [vmem:[#allocation2 + $0x6a] sm:$0xff] }
  0x5b   : > { %344 = vst.msk [vmem:[#allocation2 + $0xb1] sm:$0xff] %vm274_vm0, %v255_v44  ;;  %v3756_v61 = vld [vmem:[#allocation2 + $0xf9] sm:$0xff]  ;;  %v3947_v59 = vld [vmem:[#allocation2 + $0x82] sm:$0xff] }
  0x5c   : > { %352 = vst.msk [vmem:[#allocation2 + $0x111] sm:$0xff] %vm274_vm0, %v263_v45  ;;  %v3729_v53 = vld [vmem:[#allocation2 + $0x31] sm:$0xff]  ;;  %v3812_v18 = vld [vmem:[#allocation2 + $0x1a] sm:$0xff] }
  0x5d   : > { %3124 = vmatmul.msk.f32.gmra.mxu0 %vm274_vm0, %v3704_v46  ;;  %335 = vst.msk [vmem:[#allocation2 + $0x49] sm:$0xff] %vm274_vm0, %v246_v47  ;;  %v3758_v62 = vld [vmem:[#allocation2 + $0x159] sm:$0xff]  ;;  %v3814_v19 = vld [vmem:[#allocation2 + $0x30] sm:$0xff] }
  0x5e   : > { %3140 = vmatmul.msk.f32.gmra.mxu2 %vm274_vm0, %v3708_v48  ;;  %360 = vst.msk [vmem:[#allocation2 + $0x171] sm:$0xff] %vm274_vm0, %v271_v49  ;;  %v3760_v63 = vld [vmem:[#allocation2 + $0xa9] sm:$0xff]  ;;  %v3909_v43 = vld [vmem:[#allocation2 + $0x80] sm:$0xff]  ;;  %v3949_v0 = vld [vmem:[#allocation2 + $0x98] sm:$0xff] }
  0x5f   : > { %3148 = vmatmul.msk.f32.gmra.mxu3 %vm274_vm0, %v3712_v50  ;;  %336 = vst.msk [vmem:[#allocation2 + $0x51] sm:$0xff] %vm274_vm0, %v247_v52  ;;  %v3775_v2 = vld [vmem:[#allocation2 + $0x109] sm:$0xff]  ;;  %v3927_v47 = vld [vmem:[#allocation2 + $0x7a] sm:$0xff] }
  0x60   : > { %3133 = vmatmul.msk.f32.gmra.mxu1 %vm274_vm0, %v3715_v51  ;;  %v3754_v60 = vld [vmem:[#allocation2 + $0x39] sm:$0xff]  ;;  %4717 = vst [vmem:[#allocation3_spill] sm:$0xff] %v3875_v33  ;;  %v3929_v49 = vld [vmem:[#allocation2 + $0x90] sm:$0xff] }
  0x61   : > { %v3777_v4 = vld [vmem:[#allocation2 + $0x169] sm:$0xff]  ;;  %v3825_v21 = vld [vmem:[#allocation2 + $0x38] sm:$0xff]  ;;  %4720 = vst [vmem:[#allocation6_spill] sm:$0xff] %v3907_v42 }
  0x62   : > { %v3779_v5 = vld [vmem:[#allocation2 + $0xb1] sm:$0xff]  ;;  %v3847_v24 = vld [vmem:[#allocation2 + $0x3a] sm:$0xff]  ;;  %4721 = vst [vmem:[#allocation7_spill] sm:$0xff] %v3909_v43 }
  0x63   : > { %v3791_v7 = vld [vmem:[#allocation2 + $0x111] sm:$0xff]  ;;  %4723 = vst [vmem:[#allocation9_spill] sm:$0xff] %v3927_v47 }
  0x64   : > { %v3773_v1 = vld [vmem:[#allocation2 + $0x49] sm:$0xff]  ;;  %v3835_v22 = vld [vmem:[#allocation2 + $0x32] sm:$0xff]  ;;  %4724 = vst [vmem:[#allocation10_spill] sm:$0xff] %v3929_v49 }
  0x65   : > { %3125 = vmatmul.msk.f32.gmra.mxu0 %vm274_vm0, %v3729_v53  ;;  %v3793_v8 = vld [vmem:[#allocation2 + $0x171] sm:$0xff]  ;;  %v3837_v23 = vld [vmem:[#allocation2 + $0x48] sm:$0xff]  ;;  %4726 = vst [vmem:[#allocation12_spill] sm:$0xff] %v3947_v59 }
  0x66   : > { %3141 = vmatmul.msk.f32.gmra.mxu2 %vm274_vm0, %v3731_v54  ;;  %v3789_v6 = vld [vmem:[#allocation2 + $0x51] sm:$0xff]  ;;  %4727 = vst [vmem:[#allocation13_spill] sm:$0xff] %v3949_v0 }
  0x67   : > { %3149 = vmatmul.msk.f32.gmra.mxu3 %vm274_vm0, %v3733_v55  ;;  %v3849_v25 = vld [vmem:[#allocation2 + $0x50] sm:$0xff] }
  0x68   : > { %3134 = vmatmul.msk.f32.gmra.mxu1 %vm274_vm0, %v3735_v56  ;;  %v3859_v27 = vld [vmem:[#allocation2 + $0x4a] sm:$0xff]  ;;  %v3873_v32 = vld [vmem:[#allocation2 + $0x52] sm:$0xff] }
  0x6d   : > { %3126 = vmatmul.msk.f32.gmra.mxu0 %vm274_vm0, %v3754_v60 }
  0x6e   : > { %3142 = vmatmul.msk.f32.gmra.mxu2 %vm274_vm0, %v3756_v61 }
  0x6f   : > { %3150 = vmatmul.msk.f32.gmra.mxu3 %vm274_vm0, %v3758_v62 }
  0x70   : > { %3135 = vmatmul.msk.f32.gmra.mxu1 %vm274_vm0, %v3760_v63 }
  0x75   : > { %3127 = vmatmul.msk.f32.gmra.mxu0 %vm274_vm0, %v3773_v1 }
  0x76   : > { %3143 = vmatmul.msk.f32.gmra.mxu2 %vm274_vm0, %v3775_v2 }
  0x77   : > { %3151 = vmatmul.msk.f32.gmra.mxu3 %vm274_vm0, %v3777_v4 }
  0x78   : > { %3136 = vmatmul.msk.f32.gmra.mxu1 %vm274_vm0, %v3779_v5 }
  0x7d   : > { %3128 = vmatmul.msk.f32.gmra.mxu0 %vm274_vm0, %v3789_v6 }
  0x7e   : > { %3144 = vmatmul.msk.f32.gmra.mxu2 %vm274_vm0, %v3791_v7 }
  0x7f   : > { %3152 = vmatmul.msk.f32.gmra.mxu3 %vm274_vm0, %v3793_v8 }
  0x80   : > { %3153 = vmatmul.msk.f32.vlgmr.msrb.gmra.mxu1 %vm274_vm0, %v363_v9 }
  0x85   : > { %3249 = vmatmul.msk.f32.vlgmr.msrb.gmra.mxu0 %vm274_vm0, %v3680_v38  ;;  %v3891_v38 = vld [vmem:[#allocation2 + $0x78] sm:$0xff] }
  0x86   : > { %3185 = vmatmul.msk.f32.vlgmr.msrb.gmra.mxu2 %vm274_vm0, %v847_v10  ;;  %4718 = vst [vmem:[#allocation4_spill] sm:$0xff] %v3891_v38 }
  0x87   : > { %3217 = vmatmul.msk.f32.vlgmr.msrb.gmra.mxu3 %vm274_vm0, %v1121_v11 }
  0x88   : > { %3154 = vmatmul.msk.f32.gmra.mxu1 %vm274_vm0, %v364_v15  ;;  %v3967_v15 = vld [vmem:[#allocation2 + $0x92] sm:$0xff] }
  0x89   : > { %4729 = vst [vmem:[#allocation15_spill] sm:$0xff] %v3967_v15 }
  0x8d   : > { %3250 = vmatmul.msk.f32.gmra.mxu0 %vm274_vm0, %v3704_v46 }
  0x8e   : > { %3186 = vmatmul.msk.f32.gmra.mxu2 %vm274_vm0, %v848_v16  ;;  %v3969_v16 = vld [vmem:[#allocation2 + $0xa8] sm:$0xff] }
  0x8f   : > { %3218 = vmatmul.msk.f32.gmra.mxu3 %vm274_vm0, %v1122_v17  ;;  %4730 = vst [vmem:[#allocation16_spill] sm:$0xff] %v3969_v16 }
  0x90   : > { %3155 = vmatmul.msk.f32.gmra.mxu1 %vm274_vm0, %v1121_v11 }
  0x95   : > { %3251 = vmatmul.msk.f32.gmra.mxu0 %vm274_vm0, %v3729_v53 }
  0x96   : > { %3187 = vmatmul.msk.f32.gmra.mxu2 %vm274_vm0, %v3812_v18 }
  0x97   : > { %3219 = vmatmul.msk.f32.gmra.mxu3 %vm274_vm0, %v3814_v19  ;;  %v3871_v31 = vpop.f32.mrf.mxu1 }
  0x98   : > { %3156 = vmatmul.msk.f32.gmra.mxu1 %vm274_vm0, %v1122_v17 }
  0x9d   : > { %3252 = vmatmul.msk.f32.gmra.mxu0 %vm274_vm0, %v3754_v60 }
  0x9e   : > { %3188 = vmatmul.msk.f32.gmra.mxu2 %vm274_vm0, %v3823_v20 }
  0x9f   : > { %3220 = vmatmul.msk.f32.gmra.mxu3 %vm274_vm0, %v3825_v21 }
  0xa0   : > { %3157 = vmatmul.msk.f32.gmra.mxu1 %vm274_vm0, %v3814_v19 }
  0xa5   : > { %3253 = vmatmul.msk.f32.gmra.mxu0 %vm274_vm0, %v3773_v1 }
  0xa6   : > { %3189 = vmatmul.msk.f32.gmra.mxu2 %vm274_vm0, %v3835_v22 }
  0xa7   : > { %3221 = vmatmul.msk.f32.gmra.mxu3 %vm274_vm0, %v3837_v23 }
  0xa8   : > { %3158 = vmatmul.msk.f32.gmra.mxu1 %vm274_vm0, %v3825_v21 }
  0xad   : > { %3254 = vmatmul.msk.f32.gmra.mxu0 %vm274_vm0, %v3789_v6 }
  0xae   : > { %3190 = vmatmul.msk.f32.gmra.mxu2 %vm274_vm0, %v3847_v24 }
  0xaf   : > { %3222 = vmatmul.msk.f32.gmra.mxu3 %vm274_vm0, %v3849_v25 }
  0xb0   : > { %3159 = vmatmul.msk.f32.gmra.mxu1 %vm274_vm0, %v3837_v23 }
  0xb5   : > { %3255 = vmatmul.msk.f32.gmra.mxu0 %vm274_vm0, %v3513_v3  ;;  %v3881_v3 = vpop.f32.mrf.mxu0 }
  0xb6   : > { %3191 = vmatmul.msk.f32.gmra.mxu2 %vm274_vm0, %v3859_v27 }
  0xb7   : > { %3223 = vmatmul.msk.f32.gmra.mxu3 %vm274_vm0, %v3861_v29 }
  0xb8   : > { %3160 = vmatmul.msk.f32.gmra.mxu1 %vm274_vm0, %v3849_v25 }
  0xb9   : > { %v3889_v36 = vpop.f32.mrf.mxu1 }
  0xbd   : > { %3256 = vmatmul.msk.f32.gmra.mxu0 %vm274_vm0, %v3606_v14  ;;  %v3899_v14 = vpop.f32.mrf.mxu2  ;;  %v3901_v39 = vpop.f32.mrf.mxu3 }
  0xbe   : > { %3192 = vmatmul.msk.f32.gmra.mxu2 %vm274_vm0, %v3873_v32  ;;  %4719 = vst [vmem:[#allocation5_spill] sm:$0xff] %v3901_v39  ;;  %v3905_v41 = vpop.f32.mrf.mxu0  ;;  %v3989_v39 = vld [vmem:[#allocation2 + $0xb0] sm:$0xff] }
  0xbf   : > { %3224 = vmatmul.msk.f32.gmra.mxu3 %vm274_vm0, %v3875_v33  ;;  %4734 = vst [vmem:[#allocation20_spill] sm:$0xff] %v3989_v39 }
  0xc0   : > { %3161 = vmatmul.msk.f32.gmra.mxu1 %vm274_vm0, %v3861_v29 }
  0xc5   : > { %3257 = vmatmul.msk.f32.gmra.mxu0 %vm274_vm0, %v3662_v30 }
  0xc6   : > { %3193 = vmatmul.msk.f32.gmra.mxu2 %vm274_vm0, %v3887_v34 }
  0xc7   : > { %3225 = vmatmul.msk.f32.gmra.mxu3 %vm274_vm0, %v3891_v38 }
  0xc8   : > { %3162 = vmatmul.msk.f32.gmra.mxu1 %vm274_vm0, %v3875_v33  ;;  %v4056_v33 = vld [vmem:[#allocation2 + $0xca] sm:$0xff] }
  0xcd   : > { %v3911_v30 = vpop.f32.mrf.mxu1  ;;  %3258 = vmatmul.msk.f32.gmra.mxu0 %vm274_vm0, %v3684_v40 }
  0xce   : > { %3194 = vmatmul.msk.f32.gmra.mxu2 %vm274_vm0, %v3907_v42 }
  0xcf   : > { %3226 = vmatmul.msk.f32.gmra.mxu3 %vm274_vm0, %v3909_v43 }
  0xd0   : > { %3163 = vmatmul.msk.f32.gmra.mxu1 %vm274_vm0, %v3891_v38  ;;  %v4029_v38 = vld [vmem:[#allocation2 + $0xc8] sm:$0xff] }
  0xd1   : > { %v3921_v44 = vpop.f32.mrf.mxu2 }
  0xd2   : > { %v3923_v45 = vpop.f32.mrf.mxu3  ;;  %v3925_v46 = vpop.f32.mrf.mxu0 }
  0xd3   : > { %4722 = vst [vmem:[#allocation8_spill] sm:$0xff] %v3923_v45  ;;  %v3987_v45 = vld [vmem:[#allocation2 + $0x9a] sm:$0xff] }
  0xd4   : > { %4733 = vst [vmem:[#allocation19_spill] sm:$0xff] %v3987_v45 }
  0xd5   : > { %v3931_v40 = vpop.f32.mrf.mxu1  ;;  %3259 = vmatmul.msk.f32.gmra.mxu0 %vm274_vm0, %v3715_v51 }
  0xd6   : > { %3195 = vmatmul.msk.f32.gmra.mxu2 %vm274_vm0, %v3927_v47  ;;  %v4045_v47 = vld [vmem:[#allocation2 + $0xd8] sm:$0xff] }
  0xd7   : > { %3227 = vmatmul.msk.f32.gmra.mxu3 %vm274_vm0, %v3929_v49 }
  0xd8   : > { %3164 = vmatmul.msk.f32.gmra.mxu1 %vm274_vm0, %v3909_v43  ;;  %v4009_v43 = vld [vmem:[#allocation2 + $0xc0] sm:$0xff] }
  0xd9   : > { %v3941_v52 = vpop.f32.mrf.mxu2  ;;  %4738 = vst [vmem:[#allocation24_spill] sm:$0xff] %v4009_v43 }
  0xda   : > { %v3943_v57 = vpop.f32.mrf.mxu3  ;;  %v3945_v58 = vpop.f32.mrf.mxu0 }
  0xdb   : > { %4725 = vst [vmem:[#allocation11_spill] sm:$0xff] %v3943_v57 }
  0xdd   : > { %v3951_v51 = vpop.f32.mrf.mxu1  ;;  %3260 = vmatmul.msk.f32.gmra.mxu0 %vm274_vm0, %v3735_v56 }
  0xde   : > { %3196 = vmatmul.msk.f32.gmra.mxu2 %vm274_vm0, %v3947_v59  ;;  %v4027_v59 = vld [vmem:[#allocation2 + $0xb2] sm:$0xff] }
  0xdf   : > { %3228 = vmatmul.msk.f32.gmra.mxu3 %vm274_vm0, %v3949_v0  ;;  %4741 = vst [vmem:[#allocation27_spill] sm:$0xff] %v4027_v59 }
  0xe0   : > { %3165 = vmatmul.msk.f32.gmra.mxu1 %vm274_vm0, %v3929_v49 }
  0xe1   : > { %v3961_v9 = vpop.f32.mrf.mxu2 }
  0xe2   : > { %v3963_v10 = vpop.f32.mrf.mxu3  ;;  %v3965_v11 = vpop.f32.mrf.mxu0 }
  0xe3   : > { %4728 = vst [vmem:[#allocation14_spill] sm:$0xff] %v3963_v10 }
  0xe5   : > { %v3971_v56 = vpop.f32.mrf.mxu1  ;;  %3261 = vmatmul.msk.f32.gmra.mxu0 %vm274_vm0, %v3760_v63 }
  0xe6   : > { %3197 = vmatmul.msk.f32.gmra.mxu2 %vm274_vm0, %v3967_v15  ;;  %v4007_v15 = vld [vmem:[#allocation2 + $0xaa] sm:$0xff] }
  0xe7   : > { %3229 = vmatmul.msk.f32.gmra.mxu3 %vm274_vm0, %v3969_v16  ;;  %4737 = vst [vmem:[#allocation23_spill] sm:$0xff] %v4007_v15 }
  0xe8   : > { %3166 = vmatmul.msk.f32.gmra.mxu1 %vm274_vm0, %v3949_v0 }
  0xe9   : > { %v3981_v17 = vpop.f32.mrf.mxu2 }
  0xea   : > { %4731 = vst [vmem:[#allocation17_spill] sm:$0xff] %v3981_v17  ;;  %v3983_v10 = vpop.f32.mrf.mxu3  ;;  %v3985_v57 = vpop.f32.mrf.mxu0  ;;  %v4058_v17 = vld [vmem:[#allocation2 + $0xe0] sm:$0xff] }
  0xeb   : > { %4732 = vst [vmem:[#allocation18_spill] sm:$0xff] %v3983_v10 }
  0xed   : > { %v3991_v63 = vpop.f32.mrf.mxu1  ;;  %3262 = vmatmul.msk.f32.gmra.mxu0 %vm274_vm0, %v3779_v5 }
  0xee   : > { %3198 = vmatmul.msk.f32.gmra.mxu2 %vm274_vm0, %v3987_v45 }
  0xef   : > { %3230 = vmatmul.msk.f32.gmra.mxu3 %vm274_vm0, %v3989_v39 }
  0xf0   : > { %3167 = vmatmul.msk.f32.gmra.mxu1 %vm274_vm0, %v3969_v16 }
  0xf1   : > { %v4001_v10 = vpop.f32.mrf.mxu2 }
  0xf2   : > { %4735 = vst [vmem:[#allocation21_spill] sm:$0xff] %v4001_v10  ;;  %v4003_v0 = vpop.f32.mrf.mxu3  ;;  %v4005_v49 = vpop.f32.mrf.mxu0 }
  0xf3   : > { %4736 = vst [vmem:[#allocation22_spill] sm:$0xff] %v4003_v0 }
  0xf5   : > { %v4011_v5 = vpop.f32.mrf.mxu1  ;;  %3263 = vmatmul.msk.f32.gmra.mxu0 %vm274_vm0, %v3592_v12 }
  0xf6   : > { %3199 = vmatmul.msk.f32.gmra.mxu2 %vm274_vm0, %v4007_v15 }
  0xf7   : > { %3231 = vmatmul.msk.f32.gmra.mxu3 %vm274_vm0, %v4009_v43 }
  0xf8   : > { %3168 = vmatmul.msk.f32.gmra.mxu1 %vm274_vm0, %v3989_v39 }
  0xf9   : > { %v4021_v0 = vpop.f32.mrf.mxu2 }
  0xfa   : > { %4739 = vst [vmem:[#allocation25_spill] sm:$0xff] %v4021_v0  ;;  %v4023_v16 = vpop.f32.mrf.mxu3  ;;  %v4025_v45 = vpop.f32.mrf.mxu0  ;;  %v4043_v0 = vld [vmem:[#allocation2 + $0xc2] sm:$0xff] }
  0xfb   : > { %4740 = vst [vmem:[#allocation26_spill] sm:$0xff] %v4023_v16 }
  0xfc   : > { %4744 = vst [vmem:[#allocation30_spill] sm:$0xff] %v4043_v0 }
  0xfd   : > { %v751_v12 = vpop.f32.mrf.mxu1  ;;  %3264 = vmatmul.msk.f32.gmra.mxu0 %vm274_vm0, %v3650_v26 }
  0xfe   : > { %3200 = vmatmul.msk.f32.gmra.mxu2 %vm274_vm0, %v4027_v59  ;;  %v752_v26 = vadd.f32 %v751_v12, %v3881_v3 }
  0xff   : > { %3232 = vmatmul.msk.f32.gmra.mxu3 %vm274_vm0, %v4029_v38 }
 0x100   : > { %3169 = vmatmul.msk.f32.gmra.mxu1 %vm274_vm0, %v4009_v43 }
 0x101   : > { %v4039_v16 = vpop.f32.mrf.mxu2 }
 0x102   : > { %4742 = vst [vmem:[#allocation28_spill] sm:$0xff] %v4039_v16  ;;  %v4041_v39 = vpop.f32.mrf.mxu3  ;;  %v1541_v15 = vpop.f32.mrf.mxu0 }
 0x103   : > { %4743 = vst [vmem:[#allocation29_spill] sm:$0xff] %v4041_v39 }
 0x105   : > { %v754_v10 = vpop.f32.mrf.mxu1  ;;  %3265 = vmatmul.msk.f32.gmra.mxu0 %vm274_vm0, %v3674_v35 }
 0x106   : > { %3201 = vmatmul.msk.f32.gmra.mxu2 %vm274_vm0, %v4043_v0  ;;  %v755_v3 = vadd.f32 %v754_v10, %v3905_v41 }
 0x107   : > { %3233 = vmatmul.msk.f32.gmra.mxu3 %vm274_vm0, %v4045_v47 }
 0x108   : > { %3170 = vmatmul.msk.f32.gmra.mxu1 %vm274_vm0, %v4029_v38 }
 0x109   : > { %v993_v39 = vpop.f32.mrf.mxu2 }
 0x10a   : > { %v1089_v43 = vadd.f32 %v993_v39, %v752_v26  ;;  %v1267_v59 = vpop.f32.mrf.mxu3  ;;  %v1544_v16 = vpop.f32.mrf.mxu0  ;;  %v4071_v26 = vld [vmem:[#allocation2 + $0xda] sm:$0xff] }
 0x10c   : > { %v1363_v42 = vadd.f32 %v1267_v59, %v1089_v43 }
 0x10d   : > { %v757_v35 = vpop.f32.mrf.mxu1  ;;  %3266 = vmatmul.msk.f32.gmra.mxu0 %vm274_vm0, %v3708_v48 }
 0x10e   : > { %v4062_v0 = vadd.f32 %v1541_v15, %v1363_v42  ;;  %3202 = vmatmul.msk.f32.gmra.mxu2 %vm274_vm0, %v4056_v33  ;;  %v4073_v42 = vld [vmem:[#allocation2 + $0xf0] sm:$0xff]  ;;  %v758_v41 = vadd.f32 %v757_v35, %v3925_v46 }
 0x10f   : > { %3234 = vmatmul.msk.f32.gmra.mxu3 %vm274_vm0, %v4058_v17 }
 0x110   : > { %4745 = vst [vmem:[#allocation31_spill] sm:$0xff] %v4062_v0  ;;  %3171 = vmatmul.msk.f32.gmra.mxu1 %vm274_vm0, %v4045_v47 }
 0x111   : > { %v996_v39 = vpop.f32.mrf.mxu2 }
 0x112   : > { %v1090_v43 = vadd.f32 %v996_v39, %v755_v3  ;;  %v1270_v59 = vpop.f32.mrf.mxu3  ;;  %v1547_v12 = vpop.f32.mrf.mxu0 }
 0x114   : > { %v1364_v48 = vadd.f32 %v1270_v59, %v1090_v43  ;;  %v4086_v59 = vld [vmem:[#allocation2 + $0xe2] sm:$0xff] }
 0x115   : > { %v760_v15 = vpop.f32.mrf.mxu1  ;;  %3267 = vmatmul.msk.f32.gmra.mxu0 %vm274_vm0, %v3731_v54 }
 0x116   : > { %v4077_v0 = vadd.f32 %v1544_v16, %v1364_v48  ;;  %3203 = vmatmul.msk.f32.gmra.mxu2 %vm274_vm0, %v4071_v26  ;;  %v4088_v16 = vld [vmem:[#allocation2 + $0xf8] sm:$0xff]  ;;  %v761_v46 = vadd.f32 %v760_v15, %v3945_v58 }
 0x117   : > { %3235 = vmatmul.msk.f32.gmra.mxu3 %vm274_vm0, %v4073_v42 }
 0x118   : > { %4746 = vst [vmem:[#allocation32_spill] sm:$0xff] %v4077_v0  ;;  %3172 = vmatmul.msk.f32.gmra.mxu1 %vm274_vm0, %v4058_v17 }
 0x119   : > { %v999_v10 = vpop.f32.mrf.mxu2 }
 0x11a   : > { %v1091_v3 = vadd.f32 %v999_v10, %v758_v41  ;;  %v1273_v39 = vpop.f32.mrf.mxu3  ;;  %v1550_v43 = vpop.f32.mrf.mxu0 }
 0x11c   : > { %v1365_v54 = vadd.f32 %v1273_v39, %v1091_v3  ;;  %v4101_v39 = vld [vmem:[#allocation2 + $0xf2] sm:$0xff] }
 0x11d   : > { %v763_v48 = vpop.f32.mrf.mxu1  ;;  %3268 = vmatmul.msk.f32.gmra.mxu0 %vm274_vm0, %v3756_v61 }
 0x11e   : > { %v4092_v0 = vadd.f32 %v1547_v12, %v1365_v54  ;;  %3204 = vmatmul.msk.f32.gmra.mxu2 %vm274_vm0, %v4086_v59  ;;  %v4103_v12 = vld [vmem:[#allocation2 + $0x108] sm:$0xff]  ;;  %v764_v58 = vadd.f32 %v763_v48, %v3965_v11 }
 0x11f   : > { %3236 = vmatmul.msk.f32.gmra.mxu3 %vm274_vm0, %v4088_v16 }
 0x120   : > { %4747 = vst [vmem:[#allocation33_spill] sm:$0xff] %v4092_v0  ;;  %3173 = vmatmul.msk.f32.gmra.mxu1 %vm274_vm0, %v4073_v42 }
 0x121   : > { %v1002_v35 = vpop.f32.mrf.mxu2 }
 0x122   : > { %v1092_v41 = vadd.f32 %v1002_v35, %v761_v46  ;;  %v1276_v10 = vpop.f32.mrf.mxu3  ;;  %v1553_v3 = vpop.f32.mrf.mxu0 }
 0x124   : > { %v1366_v61 = vadd.f32 %v1276_v10, %v1092_v41  ;;  %v4116_v10 = vld [vmem:[#allocation2 + $0xfa] sm:$0xff] }
 0x125   : > { %v766_v54 = vpop.f32.mrf.mxu1  ;;  %3269 = vmatmul.msk.f32.gmra.mxu0 %vm274_vm0, %v3775_v2 }
 0x126   : > { %v4107_v0 = vadd.f32 %v1550_v43, %v1366_v61  ;;  %3205 = vmatmul.msk.f32.gmra.mxu2 %vm274_vm0, %v4101_v39  ;;  %v4118_v43 = vld [vmem:[#allocation2 + $0x110] sm:$0xff]  ;;  %v767_v11 = vadd.f32 %v766_v54, %v3985_v57 }
 0x127   : > { %3237 = vmatmul.msk.f32.gmra.mxu3 %vm274_vm0, %v4103_v12  ;;  %4749 = vst [vmem:[#allocation35_spill] sm:$0xff] %v4118_v43 }
 0x128   : > { %4748 = vst [vmem:[#allocation34_spill] sm:$0xff] %v4107_v0  ;;  %3174 = vmatmul.msk.f32.gmra.mxu1 %vm274_vm0, %v4088_v16 }
 0x129   : > { %v1005_v15 = vpop.f32.mrf.mxu2 }
 0x12a   : > { %v1093_v46 = vadd.f32 %v1005_v15, %v764_v58  ;;  %v1279_v35 = vpop.f32.mrf.mxu3  ;;  %v1556_v41 = vpop.f32.mrf.mxu0 }
 0x12c   : > { %v1367_v2 = vadd.f32 %v1279_v35, %v1093_v46  ;;  %v4131_v35 = vld [vmem:[#allocation2 + $0x10a] sm:$0xff] }
 0x12d   : > { %v769_v61 = vpop.f32.mrf.mxu1  ;;  %3270 = vmatmul.msk.f32.gmra.mxu0 %vm274_vm0, %v3791_v7 }
 0x12e   : > { %v4122_v0 = vadd.f32 %v1553_v3, %v1367_v2  ;;  %3206 = vmatmul.msk.f32.gmra.mxu2 %vm274_vm0, %v4116_v10  ;;  %v4133_v3 = vld [vmem:[#allocation2 + $0x120] sm:$0xff]  ;;  %v770_v57 = vadd.f32 %v769_v61, %v4005_v49 }
 0x12f   : > { %3238 = vmatmul.msk.f32.gmra.mxu3 %vm274_vm0, %v4118_v43  ;;  %4751 = vst [vmem:[#allocation37_spill] sm:$0xff] %v4133_v3 }
 0x130   : > { %4750 = vst [vmem:[#allocation36_spill] sm:$0xff] %v4122_v0  ;;  %3175 = vmatmul.msk.f32.gmra.mxu1 %vm274_vm0, %v4103_v12 }
 0x131   : > { %v1008_v48 = vpop.f32.mrf.mxu2 }
 0x132   : > { %v1094_v58 = vadd.f32 %v1008_v48, %v767_v11  ;;  %v1282_v15 = vpop.f32.mrf.mxu3  ;;  %v1559_v46 = vpop.f32.mrf.mxu0 }
 0x134   : > { %v1368_v7 = vadd.f32 %v1282_v15, %v1094_v58  ;;  %v4146_v15 = vld [vmem:[#allocation2 + $0x112] sm:$0xff] }
 0x135   : > { %v772_v2 = vpop.f32.mrf.mxu1  ;;  %3271 = vmatmul.msk.f32.gmra.mxu0 %vm274_vm0, %v3598_v13 }
 0x136   : > { %v4137_v0 = vadd.f32 %v1556_v41, %v1368_v7  ;;  %3207 = vmatmul.msk.f32.gmra.mxu2 %vm274_vm0, %v4131_v35  ;;  %v1144_v41 = vld [vmem:[#allocation2 + $0x128] sm:$0xff]  ;;  %v773_v49 = vadd.f32 %v772_v2, %v4025_v45 }
 0x137   : > { %3239 = vmatmul.msk.f32.gmra.mxu3 %vm274_vm0, %v4133_v3 }
 0x138   : > { %4752 = vst [vmem:[#allocation38_spill] sm:$0xff] %v4137_v0  ;;  %3176 = vmatmul.msk.f32.gmra.mxu1 %vm274_vm0, %v4118_v43 }
 0x139   : > { %v1011_v54 = vpop.f32.mrf.mxu2 }
 0x13a   : > { %v1095_v11 = vadd.f32 %v1011_v54, %v770_v57  ;;  %v1285_v48 = vpop.f32.mrf.mxu3  ;;  %v1562_v58 = vpop.f32.mrf.mxu0 }
 0x13c   : > { %v1369_v13 = vadd.f32 %v1285_v48, %v1095_v11  ;;  %v4158_v48 = vld [vmem:[#allocation2 + $0x122] sm:$0xff] }
 0x13d   : > { %v775_v7 = vpop.f32.mrf.mxu1  ;;  %3272 = vmatmul.msk.f32.gmra.mxu0 %vm274_vm0, %v3656_v28  ;;  %v1145_v28 = vld [vmem:[#allocation2 + $0x138] sm:$0xff] }
 0x13e   : > { %v4150_v0 = vadd.f32 %v1559_v46, %v1369_v13  ;;  %3208 = vmatmul.msk.f32.gmra.mxu2 %vm274_vm0, %v4146_v15  ;;  %v776_v45 = vadd.f32 %v775_v7, %v3871_v31  ;;  %v272_v31 = vld [vmem:[%s3493_s25 + $0xf0] sm:$0xff] }
 0x13f   : > { %3240 = vmatmul.msk.f32.gmra.mxu3 %vm274_vm0, %v1144_v41  ;;  %361 = vst.msk [vmem:[#allocation2 + $0x181] sm:$0xff] %vm274_vm0, %v272_v31 }
 0x140   : > { %4753 = vst [vmem:[#allocation39_spill] sm:$0xff] %v4150_v0  ;;  %3177 = vmatmul.msk.f32.gmra.mxu1 %vm274_vm0, %v4133_v3  ;;  %v1146_v3 = vld [vmem:[#allocation2 + $0x140] sm:$0xff] }
 0x141   : > { %v1014_v61 = vpop.f32.mrf.mxu2 }
 0x142   : > { %v1096_v57 = vadd.f32 %v1014_v61, %v773_v49  ;;  %v1288_v54 = vpop.f32.mrf.mxu3  ;;  %v1565_v11 = vpop.f32.mrf.mxu0 }
 0x144   : > { %v1370_v43 = vadd.f32 %v1288_v54, %v1096_v57  ;;  %v872_v54 = vld [vmem:[#allocation2 + $0x12a] sm:$0xff] }
 0x145   : > { %v778_v46 = vpop.f32.mrf.mxu1  ;;  %3273 = vmatmul.msk.f32.gmra.mxu0 %vm274_vm0, %v3678_v37 }
 0x146   : > { %v4162_v13 = vadd.f32 %v1562_v58, %v1370_v43  ;;  %3209 = vmatmul.msk.f32.gmra.mxu2 %vm274_vm0, %v4158_v48  ;;  %v779_v58 = vadd.f32 %v778_v46, %v3889_v36  ;;  %v273_v36 = vld [vmem:[%s3493_s25 + $0xf8] sm:$0xff] }
 0x147   : > { %3241 = vmatmul.msk.f32.gmra.mxu3 %vm274_vm0, %v1145_v28  ;;  %362 = vst.msk [vmem:[#allocation2 + $0x189] sm:$0xff] %vm274_vm0, %v273_v36  ;;  %v875_v36 = vld [vmem:[#allocation2 + $0x152] sm:$0xff] }
 0x148   : > { %3178 = vmatmul.msk.f32.gmra.mxu1 %vm274_vm0, %v1144_v41 }
 0x149   : > { %v1017_v2 = vpop.f32.mrf.mxu2 }
 0x14a   : > { %v1097_v49 = vadd.f32 %v1017_v2, %v776_v45  ;;  %v1291_v61 = vpop.f32.mrf.mxu3  ;;  %v1568_v57 = vpop.f32.mrf.mxu0 }
 0x14c   : > { %v1371_v0 = vadd.f32 %v1291_v61, %v1097_v49  ;;  %v873_v49 = vld [vmem:[#allocation2 + $0x13a] sm:$0xff] }
 0x14d   : > { %v781_v37 = vpop.f32.mrf.mxu1  ;;  %3274 = vmatmul.msk.f32.gmra.mxu0 %vm274_vm0, %v3712_v50 }
 0x14e   : > { %v4171_v43 = vadd.f32 %v1565_v11, %v1371_v0  ;;  %3210 = vmatmul.msk.f32.gmra.mxu2 %vm274_vm0, %v872_v54  ;;  %v1147_v0 = vld [vmem:[#allocation2 + $0x150] sm:$0xff] }
 0x14f   : > { %3242 = vmatmul.msk.f32.gmra.mxu3 %vm274_vm0, %v1146_v3 }
 0x150   : > { %3179 = vmatmul.msk.f32.gmra.mxu1 %vm274_vm0, %v1145_v28  ;;  %v782_v28 = vadd.f32 %v781_v37, %v3911_v30 }
 0x151   : > { %v1020_v41 = vpop.f32.mrf.mxu2 }
 0x152   : > { %v1098_v7 = vadd.f32 %v1020_v41, %v779_v58  ;;  %v1294_v45 = vpop.f32.mrf.mxu3  ;;  %v1571_v2 = vpop.f32.mrf.mxu0  ;;  %v874_v41 = vld [vmem:[#allocation2 + $0x142] sm:$0xff] }
 0x154   : > { %v1372_v50 = vadd.f32 %v1294_v45, %v1098_v7 }
 0x155   : > { %v784_v11 = vpop.f32.mrf.mxu1  ;;  %3275 = vmatmul.msk.f32.gmra.mxu0 %vm274_vm0, %v3733_v55  ;;  %v1148_v55 = vld [vmem:[#allocation2 + $0x158] sm:$0xff] }
 0x156   : > { %v4181_v61 = vadd.f32 %v1568_v57, %v1372_v50  ;;  %3211 = vmatmul.msk.f32.gmra.mxu2 %vm274_vm0, %v873_v49  ;;  %v785_v30 = vadd.f32 %v784_v11, %v3931_v40 }
 0x157   : > { %3243 = vmatmul.msk.f32.gmra.mxu3 %vm274_vm0, %v1147_v0 }
 0x158   : > { %3180 = vmatmul.msk.f32.gmra.mxu1 %vm274_vm0, %v1146_v3 }
 0x159   : > { %v1023_v46 = vpop.f32.mrf.mxu2 }
 0x15a   : > { %v1099_v54 = vadd.f32 %v1023_v46, %v782_v28  ;;  %v1297_v31 = vpop.f32.mrf.mxu3  ;;  %v1574_v58 = vpop.f32.mrf.mxu0  ;;  %v1149_v46 = vld [vmem:[#allocation2 + $0x168] sm:$0xff] }
 0x15c   : > { %v1373_v7 = vadd.f32 %v1297_v31, %v1099_v54 }
 0x15d   : > { %v787_v57 = vpop.f32.mrf.mxu1  ;;  %3276 = vmatmul.msk.f32.gmra.mxu0 %vm274_vm0, %v3758_v62 }
 0x15e   : > { %v4191_v45 = vadd.f32 %v1571_v2, %v1373_v7  ;;  %3212 = vmatmul.msk.f32.gmra.mxu2 %vm274_vm0, %v874_v41  ;;  %v788_v40 = vadd.f32 %v787_v57, %v3951_v51  ;;  %v876_v41 = vld [vmem:[#allocation2 + $0x15a] sm:$0xff] }
 0x15f   : > { %3244 = vmatmul.msk.f32.gmra.mxu3 %vm274_vm0, %v1148_v55 }
 0x160   : > { %3181 = vmatmul.msk.f32.gmra.mxu1 %vm274_vm0, %v1147_v0 }
 0x161   : > { %v1026_v3 = vpop.f32.mrf.mxu2 }
 0x162   : > { %v1100_v37 = vadd.f32 %v1026_v3, %v785_v30  ;;  %v1300_v49 = vpop.f32.mrf.mxu3  ;;  %v1577_v50 = vpop.f32.mrf.mxu0  ;;  %v1150_v30 = vld [vmem:[#allocation2 + $0x170] sm:$0xff] }
 0x164   : > { %v1374_v28 = vadd.f32 %v1300_v49, %v1100_v37  ;;  %v1425_v49 = vld [vmem:[#allocation2 + $0x181] sm:$0xff] }
 0x165   : > { %v790_v54 = vpop.f32.mrf.mxu1  ;;  %3277 = vmatmul.msk.f32.gmra.mxu0 %vm274_vm0, %v3777_v4 }
 0x166   : > { %v4199_v62 = vadd.f32 %v1574_v58, %v1374_v28  ;;  %3213 = vmatmul.msk.f32.gmra.mxu2 %vm274_vm0, %v875_v36  ;;  %v791_v51 = vadd.f32 %v790_v54, %v3971_v56  ;;  %v877_v36 = vld [vmem:[#allocation2 + $0x16a] sm:$0xff] }
 0x167   : > { %3245 = vmatmul.msk.f32.gmra.mxu3 %vm274_vm0, %v1149_v46 }
 0x168   : > { %3182 = vmatmul.msk.f32.gmra.mxu1 %vm274_vm0, %v1148_v55 }
 0x169   : > { %v1029_v2 = vpop.f32.mrf.mxu2 }
 0x16a   : > { %v1101_v0 = vadd.f32 %v1029_v2, %v788_v40  ;;  %v1303_v11 = vpop.f32.mrf.mxu3  ;;  %v1580_v31 = vpop.f32.mrf.mxu0  ;;  %v1151_v40 = vld [vmem:[#allocation2 + $0x180] sm:$0xff] }
 0x16c   : > { %v1375_v7 = vadd.f32 %v1303_v11, %v1101_v0  ;;  %v1426_v11 = vld [vmem:[#allocation2 + $0x189] sm:$0xff] }
 0x16d   : > { %v793_v3 = vpop.f32.mrf.mxu1  ;;  %3278 = vmatmul.msk.f32.gmra.mxu0 %vm274_vm0, %v3793_v8 }
 0x16e   : > { %v4207_v4 = vadd.f32 %v1577_v50, %v1375_v7  ;;  %3214 = vmatmul.msk.f32.gmra.mxu2 %vm274_vm0, %v876_v41  ;;  %v794_v56 = vadd.f32 %v793_v3, %v3991_v63  ;;  %v878_v41 = vld [vmem:[#allocation2 + $0x172] sm:$0xff] }
 0x16f   : > { %3246 = vmatmul.msk.f32.gmra.mxu3 %vm274_vm0, %v1150_v30 }
 0x170   : > { %3183 = vmatmul.msk.f32.gmra.mxu1 %vm274_vm0, %v1149_v46 }
 0x171   : > { %v1032_v58 = vpop.f32.mrf.mxu2 }
 0x172   : > { %v1102_v55 = vadd.f32 %v1032_v58, %v791_v51  ;;  %v1306_v57 = vpop.f32.mrf.mxu3  ;;  %v1583_v37 = vpop.f32.mrf.mxu0  ;;  %v1152_v51 = vld [vmem:[#allocation2 + $0x188] sm:$0xff] }
 0x174   : > { %v1376_v28 = vadd.f32 %v1306_v57, %v1102_v55 }
 0x175   : > { %v796_v2 = vpop.f32.mrf.mxu1  ;;  %3279 = vmatmul.msk.f32.gmra.mxu0 %vm274_vm0, %v1425_v49 }
 0x176   : > { %v4214_v8 = vadd.f32 %v1580_v31, %v1376_v28  ;;  %3215 = vmatmul.msk.f32.gmra.mxu2 %vm274_vm0, %v877_v36  ;;  %v797_v63 = vadd.f32 %v796_v2, %v4011_v5 }
 0x177   : > { %3247 = vmatmul.msk.f32.gmra.mxu3 %vm274_vm0, %v1151_v40 }
 0x178   : > { %3184 = vmatmul.msk.f32.gmra.mxu1 %vm274_vm0, %v1150_v30 }
 0x179   : > { %v1035_v50 = vpop.f32.mrf.mxu2 }
 0x17a   : > { %v1103_v46 = vadd.f32 %v1035_v50, %v794_v56  ;;  %v1309_v54 = vpop.f32.mrf.mxu3  ;;  %v1586_v0 = vpop.f32.mrf.mxu0 }
 0x17c   : > { %v1377_v7 = vadd.f32 %v1309_v54, %v1103_v46 }
 0x17d   : > { %v799_v58 = vpop.f32.mrf.mxu1  ;;  %3280 = vmatmul.msk.f32.gmra.mxu0 %vm274_vm0, %v1426_v11 }
 0x17e   : > { %v4221_v31 = vadd.f32 %v1583_v37, %v1377_v7  ;;  %3216 = vmatmul.msk.f32.gmra.mxu2 %vm274_vm0, %v878_v41  ;;  %v800_v5 = vadd.f32 %v799_v58, %v3899_v14 }
 0x17f   : > { %3248 = vmatmul.msk.f32.gmra.mxu3 %vm274_vm0, %v1152_v51 }
 0x180   : > { %3281 = vmatmul.msk.f32.vlgmr.msra.gmra.mxu1 %vm274_vm0, %v3812_v18 }
 0x181   : > { %v1038_v30 = vpop.f32.mrf.mxu2 }
 0x182   : > { %v1104_v3 = vadd.f32 %v1038_v30, %v797_v63  ;;  %v1312_v55 = vpop.f32.mrf.mxu3  ;;  %v1589_v57 = vpop.f32.mrf.mxu0 }
 0x184   : > { %v1378_v49 = vadd.f32 %v1312_v55, %v1104_v3  ;;  %v2222_v55 = vld [vmem:[#allocation2 + $0x61] sm:$0xff] }
 0x185   : > { %v802_v36 = vpop.f32.mrf.mxu1  ;;  %3377 = vmatmul.msk.f32.vlgmr.msra.gmra.mxu0 %vm274_vm0, %v3835_v22 }
 0x186   : > { %v4230_v37 = vadd.f32 %v1586_v0, %v1378_v49  ;;  %3313 = vmatmul.msk.f32.vlgmr.msra.gmra.mxu2 %vm274_vm0, %v3814_v19 }
 0x187   : > { %3345 = vmatmul.msk.f32.vlgmr.msra.gmra.mxu3 %vm274_vm0, %v3729_v53  ;;  %v803_v53 = vadd.f32 %v802_v36, %v3921_v44 }
 0x188   : > { %3282 = vmatmul.msk.f32.gmra.mxu1 %vm274_vm0, %v3823_v20 }
 0x189   : > { %v1041_v18 = vpop.f32.mrf.mxu2 }
 0x18a   : > { %v1105_v28 = vadd.f32 %v1041_v18, %v800_v5  ;;  %v1315_v40 = vpop.f32.mrf.mxu3  ;;  %v1592_v2 = vpop.f32.mrf.mxu0 }
 0x18c   : > { %v1379_v56 = vadd.f32 %v1315_v40, %v1105_v28  ;;  %v2223_v28 = vld [vmem:[#allocation2 + $0x69] sm:$0xff] }
 0x18d   : > { %v805_v50 = vpop.f32.mrf.mxu1  ;;  %3378 = vmatmul.msk.f32.gmra.mxu0 %vm274_vm0, %v3847_v24 }
 0x18e   : > { %v4241_v46 = vadd.f32 %v1589_v57, %v1379_v56  ;;  %3314 = vmatmul.msk.f32.gmra.mxu2 %vm274_vm0, %v3825_v21 }
 0x18f   : > { %3346 = vmatmul.msk.f32.gmra.mxu3 %vm274_vm0, %v3754_v60  ;;  %v806_v60 = vadd.f32 %v805_v50, %v3941_v52  ;;  %v4757_v50 = vld [vmem:[#allocation21_spill] sm:$0xff] }
 0x190   : > { %3283 = vmatmul.msk.f32.gmra.mxu1 %vm274_vm0, %v3835_v22 }
 0x191   : > { %v1044_v19 = vpop.f32.mrf.mxu2 }
 0x192   : > { %v1106_v20 = vadd.f32 %v1044_v19, %v803_v53  ;;  %v1318_v14 = vpop.f32.mrf.mxu3  ;;  %v1595_v54 = vpop.f32.mrf.mxu0 }
 0x194   : > { %v1380_v0 = vadd.f32 %v1318_v14, %v1106_v20 }
 0x195   : > { %v808_v11 = vpop.f32.mrf.mxu1  ;;  %3379 = vmatmul.msk.f32.gmra.mxu0 %vm274_vm0, %v3859_v27 }
 0x196   : > { %v4252_v41 = vadd.f32 %v1592_v2, %v1380_v0  ;;  %3315 = vmatmul.msk.f32.gmra.mxu2 %vm274_vm0, %v3837_v23  ;;  %v4755_v2 = vld [vmem:[#allocation6_spill] sm:$0xff]  ;;  %v2224_v0 = vld [vmem:[#allocation2 + $0x79] sm:$0xff] }
 0x197   : > { %3347 = vmatmul.msk.f32.gmra.mxu3 %vm274_vm0, %v3773_v1  ;;  %v809_v1 = vadd.f32 %v808_v11, %v3961_v9 }
 0x198   : > { %3284 = vmatmul.msk.f32.gmra.mxu1 %vm274_vm0, %v3847_v24 }
 0x199   : > { %v1047_v21 = vpop.f32.mrf.mxu2 }
 0x19a   : > { %v1107_v22 = vadd.f32 %v1047_v21, %v806_v60  ;;  %v1321_v44 = vpop.f32.mrf.mxu3  ;;  %v1598_v7 = vpop.f32.mrf.mxu0  ;;  %v4758_v60 = vld [vmem:[#allocation9_spill] sm:$0xff] }
 0x19c   : > { %v1381_v51 = vadd.f32 %v1321_v44, %v1107_v22  ;;  %v4759_v22 = vld [vmem:[#allocation4_spill] sm:$0xff]  ;;  %v4760_v44 = vld [vmem:[#allocation25_spill] sm:$0xff] }
 0x19d   : > { %v811_v58 = vpop.f32.mrf.mxu1  ;;  %3380 = vmatmul.msk.f32.gmra.mxu0 %vm274_vm0, %v3873_v32 }
 0x19e   : > { %v4263_v63 = vadd.f32 %v1595_v54, %v1381_v51  ;;  %3316 = vmatmul.msk.f32.gmra.mxu2 %vm274_vm0, %v3849_v25 }
 0x19f   : > { %3348 = vmatmul.msk.f32.gmra.mxu3 %vm274_vm0, %v3789_v6  ;;  %v4754_v6 = vld [vmem:[#allocation17_spill] sm:$0xff] }
 0x1a0   : > { %3285 = vmatmul.msk.f32.gmra.mxu1 %vm274_vm0, %v3859_v27  ;;  %v812_v25 = vadd.f32 %v811_v58, %v4754_v6 }
 0x1a1   : > { %v1050_v23 = vpop.f32.mrf.mxu2 }
 0x1a2   : > { %v1108_v24 = vadd.f32 %v1050_v23, %v809_v1  ;;  %v1324_v52 = vpop.f32.mrf.mxu3  ;;  %v1601_v30 = vpop.f32.mrf.mxu0 }
 0x1a4   : > { %v1382_v3 = vadd.f32 %v1324_v52, %v1108_v24  ;;  %v2225_v24 = vld [vmem:[#allocation2 + $0x81] sm:$0xff] }
 0x1a5   : > { %v814_v57 = vpop.f32.mrf.mxu1  ;;  %3381 = vmatmul.msk.f32.gmra.mxu0 %vm274_vm0, %v3887_v34 }
 0x1a6   : > { %v4274_v49 = vadd.f32 %v1598_v7, %v1382_v3  ;;  %3317 = vmatmul.msk.f32.gmra.mxu2 %vm274_vm0, %v3861_v29  ;;  %v4756_v29 = vld [vmem:[#allocation3_spill] sm:$0xff]  ;;  %v815_v53 = vadd.f32 %v814_v57, %v4757_v50  ;;  %v4763_v57 = vld [vmem:[#allocation28_spill] sm:$0xff]  ;;  %v4766_v50 = vld [vmem:[#allocation5_spill] sm:$0xff] }
 0x1a7   : > { %3349 = vmatmul.msk.f32.gmra.mxu3 %vm274_vm0, %v2222_v55  ;;  %v4762_v55 = vld [vmem:[#allocation7_spill] sm:$0xff] }
 0x1a8   : > { %3286 = vmatmul.msk.f32.gmra.mxu1 %vm274_vm0, %v3873_v32 }
 0x1a9   : > { %v1053_v27 = vpop.f32.mrf.mxu2 }
 0x1aa   : > { %v1109_v9 = vadd.f32 %v1053_v27, %v812_v25  ;;  %v1327_v36 = vpop.f32.mrf.mxu3  ;;  %v1604_v5 = vpop.f32.mrf.mxu0 }
 0x1ac   : > { %v1383_v18 = vadd.f32 %v1327_v36, %v1109_v9 }
 0x1ad   : > { %v817_v40 = vpop.f32.mrf.mxu1  ;;  %3382 = vmatmul.msk.f32.gmra.mxu0 %vm274_vm0, %v4755_v2 }
 0x1ae   : > { %v4284_v56 = vadd.f32 %v1601_v30, %v1383_v18  ;;  %3318 = vmatmul.msk.f32.gmra.mxu2 %vm274_vm0, %v4756_v29  ;;  %v818_v7 = vadd.f32 %v817_v40, %v4760_v44  ;;  %v4761_v30 = vld [vmem:[#allocation12_spill] sm:$0xff]  ;;  %v4764_v40 = vld [vmem:[#allocation15_spill] sm:$0xff]  ;;  %v4765_v29 = vld [vmem:[#allocation10_spill] sm:$0xff] }
 0x1af   : > { %3350 = vmatmul.msk.f32.gmra.mxu3 %vm274_vm0, %v2223_v28  ;;  %v2226_v18 = vld [vmem:[#allocation2 + $0x91] sm:$0xff]  ;;  %v4768_v44 = vld [vmem:[#allocation13_spill] sm:$0xff] }
 0x1b0   : > { %3287 = vmatmul.msk.f32.gmra.mxu1 %vm274_vm0, %v3887_v34 }
 0x1b1   : > { %v1056_v32 = vpop.f32.mrf.mxu2 }
 0x1b2   : > { %v1110_v19 = vadd.f32 %v1056_v32, %v815_v53  ;;  %v1330_v20 = vpop.f32.mrf.mxu3  ;;  %v1607_v14 = vpop.f32.mrf.mxu0 }
 0x1b4   : > { %v1384_v54 = vadd.f32 %v1330_v20, %v1110_v19 }
 0x1b5   : > { %v820_v11 = vpop.f32.mrf.mxu1  ;;  %3383 = vmatmul.msk.f32.gmra.mxu0 %vm274_vm0, %v4758_v60 }
 0x1b6   : > { %v4294_v21 = vadd.f32 %v1604_v5, %v1384_v54  ;;  %3319 = vmatmul.msk.f32.gmra.mxu2 %vm274_vm0, %v4759_v22  ;;  %v821_v6 = vadd.f32 %v820_v11, %v4763_v57 }
 0x1b7   : > { %3351 = vmatmul.msk.f32.gmra.mxu3 %vm274_vm0, %v2224_v0  ;;  %v2227_v0 = vld [vmem:[#allocation2 + $0x99] sm:$0xff] }
 0x1b8   : > { %3288 = vmatmul.msk.f32.gmra.mxu1 %vm274_vm0, %v4755_v2 }
 0x1b9   : > { %v1059_v34 = vpop.f32.mrf.mxu2 }
 0x1ba   : > { %v1111_v51 = vadd.f32 %v1059_v34, %v818_v7  ;;  %v1333_v58 = vpop.f32.mrf.mxu3  ;;  %v1610_v1 = vpop.f32.mrf.mxu0  ;;  %v4769_v7 = vld [vmem:[#allocation8_spill] sm:$0xff] }
 0x1bc   : > { %v1385_v23 = vadd.f32 %v1333_v58, %v1111_v51 }
 0x1bd   : > { %v823_v52 = vpop.f32.mrf.mxu1  ;;  %3384 = vmatmul.msk.f32.gmra.mxu0 %vm274_vm0, %v4761_v30 }
 0x1be   : > { %v4304_v3 = vadd.f32 %v1607_v14, %v1385_v23  ;;  %3320 = vmatmul.msk.f32.gmra.mxu2 %vm274_vm0, %v4762_v55  ;;  %v824_v53 = vadd.f32 %v823_v52, %v4766_v50  ;;  %v2228_v52 = vld [vmem:[#allocation2 + $0xa9] sm:$0xff] }
 0x1bf   : > { %3352 = vmatmul.msk.f32.gmra.mxu3 %vm274_vm0, %v2225_v24  ;;  %v4770_v55 = vld [vmem:[#allocation23_spill] sm:$0xff] }
 0x1c0   : > { %3289 = vmatmul.msk.f32.gmra.mxu1 %vm274_vm0, %v4758_v60  ;;  %v4767_v60 = vld [vmem:[#allocation19_spill] sm:$0xff] }
 0x1c1   : > { %v1062_v25 = vpop.f32.mrf.mxu2  ;;  %v4773_v50 = vld [vmem:[#allocation27_spill] sm:$0xff] }
 0x1c2   : > { %v1112_v27 = vadd.f32 %v1062_v25, %v821_v6  ;;  %v1336_v9 = vpop.f32.mrf.mxu3  ;;  %v1613_v36 = vpop.f32.mrf.mxu0  ;;  %v4771_v6 = vld [vmem:[#allocation16_spill] sm:$0xff]  ;;  %v4772_v25 = vld [vmem:[#allocation11_spill] sm:$0xff] }
 0x1c4   : > { %v1386_v5 = vadd.f32 %v1336_v9, %v1112_v27 }
 0x1c5   : > { %v826_v28 = vpop.f32.mrf.mxu1  ;;  %3385 = vmatmul.msk.f32.gmra.mxu0 %vm274_vm0, %v4764_v40 }
 0x1c6   : > { %v4314_v2 = vadd.f32 %v1610_v1, %v1386_v5  ;;  %3321 = vmatmul.msk.f32.gmra.mxu2 %vm274_vm0, %v4765_v29  ;;  %v827_v34 = vadd.f32 %v826_v28, %v4769_v7 }
 0x1c7   : > { %3353 = vmatmul.msk.f32.gmra.mxu3 %vm274_vm0, %v2226_v18 }
 0x1c8   : > { %3290 = vmatmul.msk.f32.gmra.mxu1 %vm274_vm0, %v4761_v30 }
 0x1c9   : > { %v1065_v32 = vpop.f32.mrf.mxu2 }
 0x1ca   : > { %v1113_v19 = vadd.f32 %v1065_v32, %v824_v53  ;;  %v1339_v20 = vpop.f32.mrf.mxu3  ;;  %v1616_v14 = vpop.f32.mrf.mxu0  ;;  %v4774_v32 = vld [vmem:[#allocation20_spill] sm:$0xff] }
 0x1cc   : > { %v1387_v54 = vadd.f32 %v1339_v20, %v1113_v19  ;;  %v4775_v19 = vld [vmem:[#allocation14_spill] sm:$0xff] }
 0x1cd   : > { %v829_v11 = vpop.f32.mrf.mxu1  ;;  %3386 = vmatmul.msk.f32.gmra.mxu0 %vm274_vm0, %v4767_v60 }
 0x1ce   : > { %v4324_v22 = vadd.f32 %v1613_v36, %v1387_v54  ;;  %3322 = vmatmul.msk.f32.gmra.mxu2 %vm274_vm0, %v4768_v44  ;;  %v830_v27 = vadd.f32 %v829_v11, %v4772_v25  ;;  %v2230_v44 = vld [vmem:[#allocation2 + $0xc1] sm:$0xff]  ;;  %v2231_v25 = vld [vmem:[#allocation2 + $0xc9] sm:$0xff] }
 0x1cf   : > { %3354 = vmatmul.msk.f32.gmra.mxu3 %vm274_vm0, %v2227_v0 }
 0x1d0   : > { %3291 = vmatmul.msk.f32.gmra.mxu1 %vm274_vm0, %v4764_v40  ;;  %v2229_v40 = vld [vmem:[#allocation2 + $0xb1] sm:$0xff] }
 0x1d1   : > { %v1068_v51 = vpop.f32.mrf.mxu2 }
 0x1d2   : > { %v1114_v58 = vadd.f32 %v1068_v51, %v827_v34  ;;  %v1342_v1 = vpop.f32.mrf.mxu3  ;;  %v1619_v23 = vpop.f32.mrf.mxu0  ;;  %v4776_v34 = vld [vmem:[#allocation30_spill] sm:$0xff] }
 0x1d4   : > { %v1388_v24 = vadd.f32 %v1342_v1, %v1114_v58  ;;  %v4777_v58 = vld [vmem:[#allocation24_spill] sm:$0xff]  ;;  %v4778_v1 = vld [vmem:[#allocation18_spill] sm:$0xff] }
 0x1d5   : > { %v832_v30 = vpop.f32.mrf.mxu1  ;;  %3387 = vmatmul.msk.f32.gmra.mxu0 %vm274_vm0, %v4770_v55 }
 0x1d6   : > { %v4334_v57 = vadd.f32 %v1616_v14, %v1388_v24  ;;  %3323 = vmatmul.msk.f32.gmra.mxu2 %vm274_vm0, %v4771_v6  ;;  %v833_v20 = vadd.f32 %v832_v30, %v4775_v19 }
 0x1d7   : > { %3355 = vmatmul.msk.f32.gmra.mxu3 %vm274_vm0, %v2228_v52 }
 0x1d8   : > { %3292 = vmatmul.msk.f32.gmra.mxu1 %vm274_vm0, %v4767_v60 }
 0x1d9   : > { %v1071_v9 = vpop.f32.mrf.mxu2 }
 0x1da   : > { %v1115_v36 = vadd.f32 %v1071_v9, %v830_v27  ;;  %v1345_v5 = vpop.f32.mrf.mxu3  ;;  %v1622_v18 = vpop.f32.mrf.mxu0 }
 0x1dc   : > { %v1389_v28 = vadd.f32 %v1345_v5, %v1115_v36  ;;  %v4779_v36 = vld [vmem:[#allocation22_spill] sm:$0xff] }
 0x1dd   : > { %v835_v29 = vpop.f32.mrf.mxu1  ;;  %3388 = vmatmul.msk.f32.gmra.mxu0 %vm274_vm0, %v4773_v50 }
 0x1de   : > { %v4344_v53 = vadd.f32 %v1619_v23, %v1389_v28  ;;  %3324 = vmatmul.msk.f32.gmra.mxu2 %vm274_vm0, %v4774_v32  ;;  %v836_v23 = vadd.f32 %v835_v29, %v4778_v1  ;;  %v2232_v32 = vld [vmem:[#allocation2 + $0xd9] sm:$0xff] }
 0x1df   : > { %3356 = vmatmul.msk.f32.gmra.mxu3 %vm274_vm0, %v2229_v40 }
 0x1e0   : > { %3293 = vmatmul.msk.f32.gmra.mxu1 %vm274_vm0, %v4770_v55 }
 0x1e1   : > { %v1074_v14 = vpop.f32.mrf.mxu2 }
 0x1e2   : > { %v1116_v54 = vadd.f32 %v1074_v14, %v833_v20  ;;  %v1348_v0 = vpop.f32.mrf.mxu3  ;;  %v1625_v11 = vpop.f32.mrf.mxu0 }
 0x1e4   : > { %v1390_v60 = vadd.f32 %v1348_v0, %v1116_v54 }
 0x1e5   : > { %v838_v7 = vpop.f32.mrf.mxu1  ;;  %3389 = vmatmul.msk.f32.gmra.mxu0 %vm274_vm0, %v4776_v34 }
 0x1e6   : > { %v4354_v51 = vadd.f32 %v1622_v18, %v1390_v60  ;;  %3325 = vmatmul.msk.f32.gmra.mxu2 %vm274_vm0, %v4777_v58  ;;  %v839_v5 = vadd.f32 %v838_v7, %v4779_v36  ;;  %v2233_v7 = vld [vmem:[#allocation2 + $0xe1] sm:$0xff] }
 0x1e7   : > { %3357 = vmatmul.msk.f32.gmra.mxu3 %vm274_vm0, %v2230_v44 }
 0x1e8   : > { %3294 = vmatmul.msk.f32.gmra.mxu1 %vm274_vm0, %v4773_v50 }
 0x1e9   : > { %v1077_v24 = vpop.f32.mrf.mxu2 }
 0x1ea   : > { %v1117_v52 = vadd.f32 %v1077_v24, %v836_v23  ;;  %v1351_v30 = vpop.f32.mrf.mxu3  ;;  %v1628_v55 = vpop.f32.mrf.mxu0 }
 0x1ec   : > { %v1391_v6 = vadd.f32 %v1351_v30, %v1117_v52 }
 0x1ed   : > { %v841_v27 = vpop.f32.mrf.mxu1  ;;  %3390 = vmatmul.msk.f32.gmra.mxu0 %vm274_vm0, %v4056_v33 }
 0x1ee   : > { %v4364_v9 = vadd.f32 %v1625_v11, %v1391_v6  ;;  %3326 = vmatmul.msk.f32.gmra.mxu2 %vm274_vm0, %v4029_v38  ;;  %v4780_v38 = vld [vmem:[#allocation26_spill] sm:$0xff] }
 0x1ef   : > { %3358 = vmatmul.msk.f32.gmra.mxu3 %vm274_vm0, %v2231_v25  ;;  %v842_v14 = vadd.f32 %v841_v27, %v4780_v38 }
 0x1f0   : > { %3295 = vmatmul.msk.f32.gmra.mxu1 %vm274_vm0, %v4776_v34 }
 0x1f1   : > { %v1080_v18 = vpop.f32.mrf.mxu2 }
 0x1f2   : > { %v1118_v28 = vadd.f32 %v1080_v18, %v839_v5  ;;  %v1354_v40 = vpop.f32.mrf.mxu3  ;;  %v1631_v29 = vpop.f32.mrf.mxu0 }
 0x1f4   : > { %v1392_v50 = vadd.f32 %v1354_v40, %v1118_v28  ;;  %v4405_v40 = vld [vmem:[%s4687_s2] ss:$0 sm:$0xff] }
 0x1f5   : > { %v844_v19 = vpop.f32.mrf.mxu1  ;;  %3391 = vmatmul.msk.f32.gmra.mxu0 %vm274_vm0, %v4071_v26 }
 0x1f6   : > { %v4374_v20 = vadd.f32 %v1628_v55, %v1392_v50  ;;  %3327 = vmatmul.msk.f32.gmra.mxu2 %vm274_vm0, %v4045_v47  ;;  %v4781_v47 = vld [vmem:[#allocation29_spill] sm:$0xff]  ;;  %v2234_v55 = vld [vmem:[#allocation2 + $0xf1] sm:$0xff] }
 0x1f7   : > { %3359 = vmatmul.msk.f32.gmra.mxu3 %vm274_vm0, %v2232_v32  ;;  %v845_v1 = vadd.f32 %v844_v19, %v4781_v47 }
 0x1f8   : > { %3296 = vmatmul.msk.f32.gmra.mxu1 %vm274_vm0, %v4056_v33 }
 0x1f9   : > { %v1083_v54 = vpop.f32.mrf.mxu2 }
 0x1fa   : > { %v1119_v0 = vadd.f32 %v1083_v54, %v842_v14  ;;  %v1357_v11 = vpop.f32.mrf.mxu3  ;;  %v1634_v60 = vpop.f32.mrf.mxu0 }
 0x1fc   : > { %v1393_v44 = vadd.f32 %v1357_v11, %v1119_v0  ;;  %v2236_v11 = vld [vmem:[#allocation2 + $0x109] sm:$0xff] }
 0x1fd   : > { %v1815_v34 = vpop.f32.mrf.mxu1  ;;  %3392 = vmatmul.msk.f32.gmra.mxu0 %vm274_vm0, %v4086_v59 }
 0x1fe   : > { %v4384_v58 = vadd.f32 %v1631_v29, %v1393_v44  ;;  %3328 = vmatmul.msk.f32.gmra.mxu2 %vm274_vm0, %v4058_v17  ;;  %v4782_v17 = vld [vmem:[#allocation31_spill] sm:$0xff]  ;;  %v2235_v29 = vld [vmem:[#allocation2 + $0xf9] sm:$0xff] }
 0x1ff   : > { %3360 = vmatmul.msk.f32.gmra.mxu3 %vm274_vm0, %v2233_v7  ;;  %v4784_v7 = vld [vmem:[#allocation33_spill] sm:$0xff] }
 0x200   : > { %3297 = vmatmul.msk.f32.gmra.mxu1 %vm274_vm0, %v4071_v26  ;;  %v1911_v26 = vadd.f32 %v1815_v34, %v4782_v17 }
 0x201   : > { %v1086_v33 = vpop.f32.mrf.mxu2 }
 0x202   : > { %v1120_v23 = vadd.f32 %v1086_v33, %v845_v1  ;;  %v1360_v24 = vpop.f32.mrf.mxu3  ;;  %v2638_v52 = vpop.f32.mrf.mxu0 }
 0x204   : > { %v1394_v30 = vadd.f32 %v1360_v24, %v1120_v23 }
 0x205   : > { %v1818_v6 = vpop.f32.mrf.mxu1  ;;  %3393 = vmatmul.msk.f32.gmra.mxu0 %vm274_vm0, %v4101_v39 }
 0x206   : > { %v4394_v25 = vadd.f32 %v1634_v60, %v1394_v30  ;;  %3329 = vmatmul.msk.f32.gmra.mxu2 %vm274_vm0, %v4073_v42 }
 0x207   : > { %3361 = vmatmul.msk.f32.gmra.mxu3 %vm274_vm0, %v2234_v55 }
 0x208   : > { %3298 = vmatmul.msk.f32.gmra.mxu1 %vm274_vm0, %v4086_v59  ;;  %v4783_v59 = vld [vmem:[#allocation32_spill] sm:$0xff] }
 0x209   : > { %v2090_v27 = vpop.f32.mrf.mxu2  ;;  %v1912_v32 = vadd.f32 %v1818_v6, %v4783_v59 }
 0x20a   : > { %v2186_v36 = vadd.f32 %v2090_v27, %v1911_v26  ;;  %v2364_v5 = vpop.f32.mrf.mxu3  ;;  %v2641_v18 = vpop.f32.mrf.mxu0  ;;  %v2237_v27 = vld [vmem:[#allocation2 + $0x111] sm:$0xff] }
 0x20c   : > { %v2460_v28 = vadd.f32 %v2364_v5, %v2186_v36 }
 0x20d   : > { %v1821_v50 = vpop.f32.mrf.mxu1  ;;  %3394 = vmatmul.msk.f32.gmra.mxu0 %vm274_vm0, %v4116_v10 }
 0x20e   : > { %v2734_v42 = vadd.f32 %v2638_v52, %v2460_v28  ;;  %3330 = vmatmul.msk.f32.gmra.mxu2 %vm274_vm0, %v4088_v16  ;;  %v1913_v34 = vadd.f32 %v1821_v50, %v4784_v7  ;;  %v4786_v28 = vld [vmem:[#allocation34_spill] sm:$0xff]  ;;  %v4788_v7 = vld [vmem:[#allocation36_spill] sm:$0xff] }
 0x20f   : > { %3362 = vmatmul.msk.f32.gmra.mxu3 %vm274_vm0, %v2235_v29 }
 0x210   : > { %v2770_v19 = vadd.f32 %v4405_v40, %v2734_v42  ;;  %3299 = vmatmul.msk.f32.gmra.mxu1 %vm274_vm0, %v4101_v39 }
 0x211   : > { %v2093_v38 = vpop.f32.mrf.mxu2 }
 0x212   : > { %2802 = vst.msk [vmem:[%s4416_s24] sm:$0xff] %vm274_vm0, %v2770_v19  ;;  %v2187_v16 = vadd.f32 %v2093_v38, %v1912_v32  ;;  %v2367_v14 = vpop.f32.mrf.mxu3  ;;  %v2644_v54 = vpop.f32.mrf.mxu0  ;;  %v2905_v39 = vmul.f32 %v2770_v19, %v2770_v19  ;;  %v2834_v33 = vsel %vm274_vm0, %v2770_v19, 0.0 }
 0x214   : > { %v2461_v0 = vadd.f32 %v2367_v14, %v2187_v16  ;;  %v2937_v6 = vsel %vm274_vm0, %v2905_v39, 0.0  ;;  %v4787_v39 = vld [vmem:[#allocation37_spill] sm:$0xff] }
 0x215   : > { %v1824_v60 = vpop.f32.mrf.mxu1  ;;  %3395 = vmatmul.msk.f32.gmra.mxu0 %vm274_vm0, %v4131_v35 }
 0x216   : > { %v2735_v44 = vadd.f32 %v2641_v18, %v2461_v0  ;;  %3331 = vmatmul.msk.f32.gmra.mxu2 %vm274_vm0, %v4103_v12  ;;  %v4785_v18 = vld [vmem:[#allocation35_spill] sm:$0xff]  ;;  %v1914_v29 = vadd.f32 %v1824_v60, %v4786_v28  ;;  %v2238_v0 = vld [vmem:[#allocation2 + $0x121] sm:$0xff] }
 0x217   : > { %3363 = vmatmul.msk.f32.gmra.mxu3 %vm274_vm0, %v2236_v11 }
 0x218   : > { %v2771_v47 = vadd.f32 %v4405_v40, %v2735_v44  ;;  %3300 = vmatmul.msk.f32.gmra.mxu1 %vm274_vm0, %v4116_v10  ;;  %v1690_v44 = vld [vmem:[#allocation2 + $0x112] sm:$0xff] }
 0x219   : > { %v2096_v1 = vpop.f32.mrf.mxu2 }
 0x21a   : > { %2803 = vst.msk [vmem:[%s4416_s24 + $0x8] sm:$0xff] %vm274_vm0, %v2771_v47  ;;  %v2835_v23 = vsel %vm274_vm0, %v2771_v47, 0.0  ;;  %v2906_v24 = vmul.f32 %v2771_v47, %v2771_v47  ;;  %v2188_v52 = vadd.f32 %v2096_v1, %v1913_v34  ;;  %v2370_v12 = vpop.f32.mrf.mxu3  ;;  %v2647_v30 = vpop.f32.mrf.mxu0 }
 0x21b   : > { %v2836_v55 = vadd.f32 %v2835_v23, %v2834_v33 }
 0x21c   : > { %v2938_v17 = vsel %vm274_vm0, %v2906_v24, 0.0  ;;  %v2462_v26 = vadd.f32 %v2370_v12, %v2188_v52  ;;  %v2513_v12 = vld [vmem:[#allocation2 + $0x12a] sm:$0xff] }
 0x21d   : > { %v2939_v10 = vadd.f32 %v2938_v17, %v2937_v6  ;;  %v1827_v36 = vpop.f32.mrf.mxu1  ;;  %3396 = vmatmul.msk.f32.gmra.mxu0 %vm274_vm0, %v4146_v15 }
 0x21e   : > { %v2736_v5 = vadd.f32 %v2644_v54, %v2462_v26  ;;  %3332 = vmatmul.msk.f32.gmra.mxu2 %vm274_vm0, %v4785_v18  ;;  %v1915_v34 = vadd.f32 %v1827_v36, %v4788_v7  ;;  %v2239_v26 = vld [vmem:[#allocation2 + $0x129] sm:$0xff] }
 0x21f   : > { %3364 = vmatmul.msk.f32.gmra.mxu3 %vm274_vm0, %v2237_v27  ;;  %v1691_v36 = vld [vmem:[#allocation2 + $0x122] sm:$0xff] }
 0x220   : > { %v2772_v50 = vadd.f32 %v4405_v40, %v2736_v5  ;;  %3301 = vmatmul.msk.f32.gmra.mxu1 %vm274_vm0, %v4131_v35  ;;  %v4789_v18 = vld [vmem:[#allocation38_spill] sm:$0xff] }
 0x221   : > { %v2099_v42 = vpop.f32.mrf.mxu2 }
 0x222   : > { %2804 = vst.msk [vmem:[%s4416_s24 + $0x10] sm:$0xff] %vm274_vm0, %v2772_v50  ;;  %v2837_v59 = vsel %vm274_vm0, %v2772_v50, 0.0  ;;  %v2907_v32 = vmul.f32 %v2772_v50, %v2772_v50  ;;  %v2189_v15 = vadd.f32 %v2099_v42, %v1914_v29  ;;  %v2373_v19 = vpop.f32.mrf.mxu3  ;;  %v2650_v38 = vpop.f32.mrf.mxu0 }
 0x223   : > { %v2838_v16 = vadd.f32 %v2837_v59, %v2836_v55  ;;  %v1965_v55 = vld [vmem:[#allocation2 + $0x128] sm:$0xff] }
 0x224   : > { %v2940_v14 = vsel %vm274_vm0, %v2907_v32, 0.0  ;;  %v2463_v54 = vadd.f32 %v2373_v19, %v2189_v15 }
 0x225   : > { %v2941_v11 = vadd.f32 %v2940_v14, %v2939_v10  ;;  %v1830_v60 = vpop.f32.mrf.mxu1  ;;  %3397 = vmatmul.msk.f32.gmra.mxu0 %vm274_vm0, %v4158_v48  ;;  %v1966_v14 = vld [vmem:[#allocation2 + $0x138] sm:$0xff] }
 0x226   : > { %v2737_v35 = vadd.f32 %v2647_v30, %v2463_v54  ;;  %3333 = vmatmul.msk.f32.gmra.mxu2 %vm274_vm0, %v4787_v39  ;;  %v1916_v28 = vadd.f32 %v1830_v60, %v4789_v18  ;;  %v4790_v39 = vld [vmem:[#allocation39_spill] sm:$0xff] }
 0x227   : > { %3365 = vmatmul.msk.f32.gmra.mxu3 %vm274_vm0, %v2238_v0 }
 0x228   : > { %v2773_v47 = vadd.f32 %v4405_v40, %v2737_v35  ;;  %3302 = vmatmul.msk.f32.gmra.mxu1 %vm274_vm0, %v1690_v44 }
 0x229   : > { %v2102_v1 = vpop.f32.mrf.mxu2 }
 0x22a   : > { %2805 = vst.msk [vmem:[%s4416_s24 + $0x18] sm:$0xff] %vm274_vm0, %v2773_v47  ;;  %v2839_v33 = vsel %vm274_vm0, %v2773_v47, 0.0  ;;  %v2908_v23 = vmul.f32 %v2773_v47, %v2773_v47  ;;  %v2190_v24 = vadd.f32 %v2102_v1, %v1915_v34  ;;  %v2376_v48 = vpop.f32.mrf.mxu3  ;;  %v2653_v52 = vpop.f32.mrf.mxu0 }
 0x22b   : > { %v2840_v30 = vadd.f32 %v2839_v33, %v2838_v16 }
 0x22c   : > { %v2942_v6 = vsel %vm274_vm0, %v2908_v23, 0.0  ;;  %v2464_v17 = vadd.f32 %v2376_v48, %v2190_v24 }
 0x22d   : > { %v2943_v27 = vadd.f32 %v2942_v6, %v2941_v11  ;;  %v1833_v10 = vpop.f32.mrf.mxu1  ;;  %3398 = vmatmul.msk.f32.gmra.mxu0 %vm274_vm0, %v2513_v12  ;;  %v2240_v11 = vld [vmem:[#allocation2 + $0x139] sm:$0xff] }
 0x22e   : > { %v2738_v5 = vadd.f32 %v2650_v38, %v2464_v17  ;;  %3334 = vmatmul.msk.f32.gmra.mxu2 %vm274_vm0, %v1965_v55  ;;  %v2514_v38 = vld [vmem:[#allocation2 + $0x13a] sm:$0xff]  ;;  %v1917_v7 = vadd.f32 %v1833_v10, %v4790_v39 }
 0x22f   : > { %3366 = vmatmul.msk.f32.gmra.mxu3 %vm274_vm0, %v2239_v26  ;;  %v1967_v55 = vld [vmem:[#allocation2 + $0x140] sm:$0xff] }
 0x230   : > { %v2774_v29 = vadd.f32 %v4405_v40, %v2738_v5  ;;  %3303 = vmatmul.msk.f32.gmra.mxu1 %vm274_vm0, %v1691_v36  ;;  %v2241_v26 = vld [vmem:[#allocation2 + $0x141] sm:$0xff] }
 0x231   : > { %v2105_v50 = vpop.f32.mrf.mxu2 }
 0x232   : > { %2806 = vst.msk [vmem:[%s4416_s24 + $0x20] sm:$0xff] %vm274_vm0, %v2774_v29  ;;  %v2841_v42 = vsel %vm274_vm0, %v2774_v29, 0.0  ;;  %v2909_v59 = vmul.f32 %v2774_v29, %v2774_v29  ;;  %v2191_v32 = vadd.f32 %v2105_v50, %v1916_v28  ;;  %v2379_v15 = vpop.f32.mrf.mxu3  ;;  %v2656_v19 = vpop.f32.mrf.mxu0 }
 0x233   : > { %v2842_v16 = vadd.f32 %v2841_v42, %v2840_v30 }
 0x234   : > { %v2944_v54 = vsel %vm274_vm0, %v2909_v59, 0.0  ;;  %v2465_v0 = vadd.f32 %v2379_v15, %v2191_v32  ;;  %v2516_v32 = vld [vmem:[#allocation2 + $0x152] sm:$0xff] }
 0x235   : > { %v2945_v60 = vadd.f32 %v2944_v54, %v2943_v27  ;;  %v1836_v44 = vpop.f32.mrf.mxu1  ;;  %3399 = vmatmul.msk.f32.gmra.mxu0 %vm274_vm0, %v2514_v38 }
 0x236   : > { %v2739_v35 = vadd.f32 %v2653_v52, %v2465_v0  ;;  %3335 = vmatmul.msk.f32.gmra.mxu2 %vm274_vm0, %v1966_v14  ;;  %v2515_v52 = vld [vmem:[#allocation2 + $0x142] sm:$0xff]  ;;  %v1918_v36 = vadd.f32 %v1836_v44, %v4162_v13  ;;  %v2242_v14 = vld [vmem:[#allocation2 + $0x151] sm:$0xff] }
 0x237   : > { %3367 = vmatmul.msk.f32.gmra.mxu3 %vm274_vm0, %v2240_v11 }
 0x238   : > { %v2775_v34 = vadd.f32 %v4405_v40, %v2739_v35  ;;  %3304 = vmatmul.msk.f32.gmra.mxu1 %vm274_vm0, %v2513_v12 }
 0x239   : > { %v2108_v47 = vpop.f32.mrf.mxu2 }
 0x23a   : > { %2807 = vst.msk [vmem:[%s4416_s24 + $0x28] sm:$0xff] %vm274_vm0, %v2775_v34  ;;  %v2843_v1 = vsel %vm274_vm0, %v2775_v34, 0.0  ;;  %v2910_v33 = vmul.f32 %v2775_v34, %v2775_v34  ;;  %v2192_v23 = vadd.f32 %v2108_v47, %v1917_v7  ;;  %v2382_v24 = vpop.f32.mrf.mxu3  ;;  %v2659_v48 = vpop.f32.mrf.mxu0 }
 0x23b   : > { %v2844_v30 = vadd.f32 %v2843_v1, %v2842_v16  ;;  %v2517_v1 = vld [vmem:[#allocation2 + $0x15a] sm:$0xff] }
 0x23c   : > { %v2946_v6 = vsel %vm274_vm0, %v2910_v33, 0.0  ;;  %v2466_v17 = vadd.f32 %v2382_v24, %v2192_v23  ;;  %v1969_v23 = vld [vmem:[#allocation2 + $0x158] sm:$0xff] }
 0x23d   : > { %v2947_v27 = vadd.f32 %v2946_v6, %v2945_v60  ;;  %v1839_v10 = vpop.f32.mrf.mxu1  ;;  %3400 = vmatmul.msk.f32.gmra.mxu0 %vm274_vm0, %v2515_v52 }
 0x23e   : > { %v2740_v12 = vadd.f32 %v2656_v19, %v2466_v17  ;;  %3336 = vmatmul.msk.f32.gmra.mxu2 %vm274_vm0, %v1967_v55  ;;  %v1968_v19 = vld [vmem:[#allocation2 + $0x150] sm:$0xff]  ;;  %v1919_v11 = vadd.f32 %v1839_v10, %v4171_v43 }
 0x23f   : > { %3368 = vmatmul.msk.f32.gmra.mxu3 %vm274_vm0, %v2241_v26 }
 0x240   : > { %v2776_v5 = vadd.f32 %v4405_v40, %v2740_v12  ;;  %3305 = vmatmul.msk.f32.gmra.mxu1 %vm274_vm0, %v2514_v38 }
 0x241   : > { %v2111_v18 = vpop.f32.mrf.mxu2 }
 0x242   : > { %2808 = vst.msk [vmem:[%s4416_s24 + $0x30] sm:$0xff] %vm274_vm0, %v2776_v5  ;;  %v2845_v28 = vsel %vm274_vm0, %v2776_v5, 0.0  ;;  %v2911_v29 = vmul.f32 %v2776_v5, %v2776_v5  ;;  %v2193_v50 = vadd.f32 %v2111_v18, %v1918_v36  ;;  %v2385_v42 = vpop.f32.mrf.mxu3  ;;  %v2662_v59 = vpop.f32.mrf.mxu0  ;;  %v2518_v18 = vld [vmem:[#allocation2 + $0x16a] sm:$0xff] }
 0x243   : > { %v2846_v15 = vadd.f32 %v2845_v28, %v2844_v30 }
 0x244   : > { %v2948_v16 = vsel %vm274_vm0, %v2911_v29, 0.0  ;;  %v2467_v13 = vadd.f32 %v2385_v42, %v2193_v50  ;;  %v1970_v29 = vld [vmem:[#allocation2 + $0x168] sm:$0xff] }
 0x245   : > { %v2949_v54 = vadd.f32 %v2948_v16, %v2947_v27  ;;  %v1842_v0 = vpop.f32.mrf.mxu1  ;;  %3401 = vmatmul.msk.f32.gmra.mxu0 %vm274_vm0, %v2516_v32  ;;  %v2244_v42 = vld [vmem:[#allocation2 + $0x169] sm:$0xff] }
 0x246   : > { %v2741_v38 = vadd.f32 %v2659_v48, %v2467_v13  ;;  %3337 = vmatmul.msk.f32.gmra.mxu2 %vm274_vm0, %v1968_v19  ;;  %v2243_v48 = vld [vmem:[#allocation2 + $0x159] sm:$0xff]  ;;  %v1920_v6 = vadd.f32 %v1842_v0, %v4181_v61 }
 0x247   : > { %3369 = vmatmul.msk.f32.gmra.mxu3 %vm274_vm0, %v2242_v14 }
 0x248   : > { %v2777_v60 = vadd.f32 %v4405_v40, %v2741_v38  ;;  %3306 = vmatmul.msk.f32.gmra.mxu1 %vm274_vm0, %v2515_v52 }
 0x249   : > { %v2114_v44 = vpop.f32.mrf.mxu2 }
 0x24a   : > { %2809 = vst.msk [vmem:[%s4416_s24 + $0x38] sm:$0xff] %vm274_vm0, %v2777_v60  ;;  %v2847_v35 = vsel %vm274_vm0, %v2777_v60, 0.0  ;;  %v2912_v39 = vmul.f32 %v2777_v60, %v2777_v60  ;;  %v2194_v7 = vadd.f32 %v2114_v44, %v1919_v11  ;;  %v2388_v34 = vpop.f32.mrf.mxu3  ;;  %v2665_v47 = vpop.f32.mrf.mxu0  ;;  %v2519_v60 = vld [vmem:[#allocation2 + $0x172] sm:$0xff] }
 0x24b   : > { %v2848_v33 = vadd.f32 %v2847_v35, %v2846_v15  ;;  %v1971_v35 = vld [vmem:[#allocation2 + $0x170] sm:$0xff] }
 0x24c   : > { %v2950_v24 = vsel %vm274_vm0, %v2912_v39, 0.0  ;;  %v2468_v43 = vadd.f32 %v2388_v34, %v2194_v7  ;;  %v2245_v7 = vld [vmem:[#allocation2 + $0x171] sm:$0xff] }
 0x24d   : > { %v2951_v30 = vadd.f32 %v2950_v24, %v2949_v54  ;;  %v1845_v55 = vpop.f32.mrf.mxu1  ;;  %3402 = vmatmul.msk.f32.gmra.mxu0 %vm274_vm0, %v2517_v1 }
 0x24e   : > { %v2742_v52 = vadd.f32 %v2662_v59, %v2468_v43  ;;  %3338 = vmatmul.msk.f32.gmra.mxu2 %vm274_vm0, %v1969_v23  ;;  %v1921_v19 = vadd.f32 %v1845_v55, %v4191_v45 }
 0x24f   : > { %3370 = vmatmul.msk.f32.gmra.mxu3 %vm274_vm0, %v2243_v48 }
 0x250   : > { %v2778_v17 = vadd.f32 %v4405_v40, %v2742_v52  ;;  %3307 = vmatmul.msk.f32.gmra.mxu1 %vm274_vm0, %v2516_v32 }
 0x251   : > { %v2117_v26 = vpop.f32.mrf.mxu2 }
 0x252   : > { %2810 = vst.msk [vmem:[%s4416_s24 + $0x40] sm:$0xff] %vm274_vm0, %v2778_v17  ;;  %v2849_v27 = vsel %vm274_vm0, %v2778_v17, 0.0  ;;  %v2913_v10 = vmul.f32 %v2778_v17, %v2778_v17  ;;  %v2195_v12 = vadd.f32 %v2117_v26, %v1920_v6  ;;  %v2391_v36 = vpop.f32.mrf.mxu3  ;;  %v2668_v5 = vpop.f32.mrf.mxu0  ;;  %v2520_v6 = vld [vmem:[#allocation2 + $0x182] sm:$0xff] }
 0x253   : > { %v2850_v28 = vadd.f32 %v2849_v27, %v2848_v33  ;;  %v1972_v26 = vld [vmem:[#allocation2 + $0x180] sm:$0xff] }
 0x254   : > { %v2952_v50 = vsel %vm274_vm0, %v2913_v10, 0.0  ;;  %v2469_v61 = vadd.f32 %v2391_v36, %v2195_v12  ;;  %v2246_v10 = vld [vmem:[#allocation2 + $0x181] sm:$0xff] }
 0x255   : > { %v2953_v59 = vadd.f32 %v2952_v50, %v2951_v30  ;;  %v1848_v15 = vpop.f32.mrf.mxu1  ;;  %3403 = vmatmul.msk.f32.gmra.mxu0 %vm274_vm0, %v2518_v18 }
 0x256   : > { %v2743_v32 = vadd.f32 %v2665_v47, %v2469_v61  ;;  %3339 = vmatmul.msk.f32.gmra.mxu2 %vm274_vm0, %v1970_v29  ;;  %v1922_v33 = vadd.f32 %v1848_v15, %v4199_v62 }
 0x257   : > { %3371 = vmatmul.msk.f32.gmra.mxu3 %vm274_vm0, %v2244_v42 }
 0x258   : > { %v2779_v16 = vadd.f32 %v4405_v40, %v2743_v32  ;;  %3308 = vmatmul.msk.f32.gmra.mxu1 %vm274_vm0, %v2517_v1  ;;  %v2521_v32 = vld [vmem:[#allocation2 + $0x18a] sm:$0xff] }
 0x259   : > { %v2120_v13 = vpop.f32.mrf.mxu2 }
 0x25a   : > { %2811 = vst.msk [vmem:[%s4416_s24 + $0x48] sm:$0xff] %vm274_vm0, %v2779_v16  ;;  %v2851_v14 = vsel %vm274_vm0, %v2779_v16, 0.0  ;;  %v2914_v54 = vmul.f32 %v2779_v16, %v2779_v16  ;;  %v2196_v0 = vadd.f32 %v2120_v13, %v1921_v19  ;;  %v2394_v38 = vpop.f32.mrf.mxu3  ;;  %v2671_v11 = vpop.f32.mrf.mxu0  ;;  %v1973_v16 = vld [vmem:[#allocation2 + $0x188] sm:$0xff] }
 0x25b   : > { %v2852_v44 = vadd.f32 %v2851_v14, %v2850_v28  ;;  %v2247_v14 = vld [vmem:[#allocation2 + $0x189] sm:$0xff] }
 0x25c   : > { %v2954_v39 = vsel %vm274_vm0, %v2914_v54, 0.0  ;;  %v2470_v45 = vadd.f32 %v2394_v38, %v2196_v0 }
 0x25d   : > { %v2955_v34 = vadd.f32 %v2954_v39, %v2953_v59  ;;  %v1851_v47 = vpop.f32.mrf.mxu1  ;;  %3404 = vmatmul.msk.f32.gmra.mxu0 %vm274_vm0, %v2519_v60 }
 0x25e   : > { %v2744_v1 = vadd.f32 %v2668_v5, %v2470_v45  ;;  %3340 = vmatmul.msk.f32.gmra.mxu2 %vm274_vm0, %v1971_v35 }
 0x25f   : > { %3372 = vmatmul.msk.f32.gmra.mxu3 %vm274_vm0, %v2245_v7 }
 0x260   : > { %v2780_v23 = vadd.f32 %v4405_v40, %v2744_v1  ;;  %3309 = vmatmul.msk.f32.gmra.mxu1 %vm274_vm0, %v2518_v18  ;;  %v1923_v18 = vadd.f32 %v1851_v47, %v4207_v4  ;;  %v2522_v47 = vld [vmem:[#allocation2 + $0x19a] sm:$0xff] }
 0x261   : > { %v2123_v24 = vpop.f32.mrf.mxu2 }
 0x262   : > { %2812 = vst.msk [vmem:[%s4416_s24 + $0x50] sm:$0xff] %vm274_vm0, %v2780_v23  ;;  %v2853_v43 = vsel %vm274_vm0, %v2780_v23, 0.0  ;;  %v2915_v48 = vmul.f32 %v2780_v23, %v2780_v23  ;;  %v2197_v30 = vadd.f32 %v2123_v24, %v1922_v33  ;;  %v2397_v55 = vpop.f32.mrf.mxu3  ;;  %v2674_v52 = vpop.f32.mrf.mxu0  ;;  %v1974_v33 = vld [vmem:[#allocation2 + $0x198] sm:$0xff] }
 0x263   : > { %v2854_v17 = vadd.f32 %v2853_v43, %v2852_v44  ;;  %v2248_v24 = vld [vmem:[#allocation2 + $0x199] sm:$0xff] }
 0x264   : > { %v2956_v27 = vsel %vm274_vm0, %v2915_v48, 0.0  ;;  %v2471_v62 = vadd.f32 %v2397_v55, %v2197_v30 }
 0x265   : > { %v2957_v12 = vadd.f32 %v2956_v27, %v2955_v34  ;;  %v1854_v36 = vpop.f32.mrf.mxu1  ;;  %3405 = vmatmul.msk.f32.gmra.mxu0 %vm274_vm0, %v2520_v6 }
 0x266   : > { %v2745_v5 = vadd.f32 %v2671_v11, %v2471_v62  ;;  %3341 = vmatmul.msk.f32.gmra.mxu2 %vm274_vm0, %v1972_v26  ;;  %v1924_v11 = vadd.f32 %v1854_v36, %v4214_v8 }
 0x267   : > { %3373 = vmatmul.msk.f32.gmra.mxu3 %vm274_vm0, %v2246_v10 }
 0x268   : > { %v2781_v28 = vadd.f32 %v4405_v40, %v2745_v5  ;;  %3310 = vmatmul.msk.f32.gmra.mxu1 %vm274_vm0, %v2519_v60  ;;  %v1975_v5 = vld [vmem:[#allocation2 + $0x1a0] sm:$0xff] }
 0x269   : > { %v2126_v29 = vpop.f32.mrf.mxu2 }
 0x26a   : > { %2813 = vst.msk [vmem:[%s4416_s24 + $0x58] sm:$0xff] %vm274_vm0, %v2781_v28  ;;  %v2855_v50 = vsel %vm274_vm0, %v2781_v28, 0.0  ;;  %v2916_v61 = vmul.f32 %v2781_v28, %v2781_v28  ;;  %v2198_v42 = vadd.f32 %v2126_v29, %v1923_v18  ;;  %v2400_v59 = vpop.f32.mrf.mxu3  ;;  %v2677_v15 = vpop.f32.mrf.mxu0  ;;  %v2249_v28 = vld [vmem:[#allocation2 + $0x1a1] sm:$0xff] }
 0x26b   : > { %v2856_v19 = vadd.f32 %v2855_v50, %v2854_v17 }
 0x26c   : > { %v2958_v13 = vsel %vm274_vm0, %v2916_v61, 0.0  ;;  %v2472_v4 = vadd.f32 %v2400_v59, %v2198_v42 }
 0x26d   : > { %v2959_v54 = vadd.f32 %v2958_v13, %v2957_v12  ;;  %v1857_v0 = vpop.f32.mrf.mxu1  ;;  %3406 = vmatmul.msk.f32.gmra.mxu0 %vm274_vm0, %v2521_v32  ;;  %v2523_v12 = vld [vmem:[#allocation2 + $0x1a2] sm:$0xff] }
 0x26e   : > { %v2746_v38 = vadd.f32 %v2674_v52, %v2472_v4  ;;  %3342 = vmatmul.msk.f32.gmra.mxu2 %vm274_vm0, %v1973_v16  ;;  %v1925_v55 = vadd.f32 %v1857_v0, %v4221_v31 }
 0x26f   : > { %3374 = vmatmul.msk.f32.gmra.mxu3 %vm274_vm0, %v2247_v14 }
 0x270   : > { %v2782_v60 = vadd.f32 %v4405_v40, %v2746_v38  ;;  %3311 = vmatmul.msk.f32.gmra.mxu1 %vm274_vm0, %v2520_v6 }
 0x271   : > { %v2129_v44 = vpop.f32.mrf.mxu2 }
 0x272   : > { %2814 = vst.msk [vmem:[%s4416_s24 + $0x60] sm:$0xff] %vm274_vm0, %v2782_v60  ;;  %v2857_v35 = vsel %vm274_vm0, %v2782_v60, 0.0  ;;  %v2917_v39 = vmul.f32 %v2782_v60, %v2782_v60  ;;  %v2199_v45 = vadd.f32 %v2129_v44, %v1924_v11  ;;  %v2403_v7 = vpop.f32.mrf.mxu3  ;;  %v2680_v34 = vpop.f32.mrf.mxu0 }
 0x273   : > { %v2858_v1 = vadd.f32 %v2857_v35, %v2856_v19 }
 0x274   : > { %v2960_v23 = vsel %vm274_vm0, %v2917_v39, 0.0  ;;  %v2473_v8 = vadd.f32 %v2403_v7, %v2199_v45 }
 0x275   : > { %v2961_v43 = vadd.f32 %v2960_v23, %v2959_v54  ;;  %v1860_v48 = vpop.f32.mrf.mxu1  ;;  %3407 = vmatmul.msk.f32.gmra.mxu0 %vm274_vm0, %v2522_v47 }
 0x276   : > { %v2747_v30 = vadd.f32 %v2677_v15, %v2473_v8  ;;  %3343 = vmatmul.msk.f32.gmra.mxu2 %vm274_vm0, %v1974_v33  ;;  %v1926_v42 = vadd.f32 %v1860_v48, %v4230_v37 }
 0x277   : > { %3375 = vmatmul.msk.f32.gmra.mxu3 %vm274_vm0, %v2248_v24 }
 0x278   : > { %v2783_v52 = vadd.f32 %v4405_v40, %v2747_v30  ;;  %3312 = vmatmul.msk.f32.gmra.mxu1 %vm274_vm0, %v2521_v32 }
 0x279   : > { %v2132_v6 = vpop.f32.mrf.mxu2 }
 0x27a   : > { %2815 = vst.msk [vmem:[%s4416_s24 + $0x68] sm:$0xff] %vm274_vm0, %v2783_v52  ;;  %v2859_v17 = vsel %vm274_vm0, %v2783_v52, 0.0  ;;  %v2918_v26 = vmul.f32 %v2783_v52, %v2783_v52  ;;  %v2200_v27 = vadd.f32 %v2132_v6, %v1925_v55  ;;  %v2406_v62 = vpop.f32.mrf.mxu3  ;;  %v2683_v10 = vpop.f32.mrf.mxu0 }
 0x27b   : > { %v2860_v36 = vadd.f32 %v2859_v17, %v2858_v1 }
 0x27c   : > { %v2962_v18 = vsel %vm274_vm0, %v2918_v26, 0.0  ;;  %v2474_v31 = vadd.f32 %v2406_v62, %v2200_v27 }
 0x27d   : > { %v2963_v29 = vadd.f32 %v2962_v18, %v2961_v43  ;;  %v1863_v50 = vpop.f32.mrf.mxu1  ;;  %3408 = vmatmul.msk.f32.gmra.mxu0 %vm274_vm0, %v2523_v12 }
 0x27e   : > { %v2748_v61 = vadd.f32 %v2680_v34, %v2474_v31  ;;  %3344 = vmatmul.msk.f32.gmra.mxu2 %vm274_vm0, %v1975_v5  ;;  %v1927_v37 = vadd.f32 %v1863_v50, %v4241_v46 }
 0x27f   : > { %3376 = vmatmul.msk.f32.gmra.mxu3 %vm274_vm0, %v2249_v28 }
 0x280   : > { %v2784_v59 = vadd.f32 %v4405_v40, %v2748_v61 }
 0x281   : > { %v2135_v15 = vpop.f32.mrf.mxu2 }
 0x282   : > { %2816 = vst.msk [vmem:[%s4416_s24 + $0x70] sm:$0xff] %vm274_vm0, %v2784_v59  ;;  %v2861_v32 = vsel %vm274_vm0, %v2784_v59, 0.0  ;;  %v2919_v19 = vmul.f32 %v2784_v59, %v2784_v59  ;;  %v2201_v16 = vadd.f32 %v2135_v15, %v1926_v42  ;;  %v2409_v13 = vpop.f32.mrf.mxu3  ;;  %v2686_v4 = vpop.f32.mrf.mxu0 }
 0x283   : > { %v2862_v14 = vadd.f32 %v2861_v32, %v2860_v36 }
 0x284   : > { %v2964_v54 = vsel %vm274_vm0, %v2919_v19, 0.0  ;;  %v2475_v0 = vadd.f32 %v2409_v13, %v2201_v16 }
 0x285   : > { %v2965_v38 = vadd.f32 %v2964_v54, %v2963_v29  ;;  %v1866_v11 = vpop.f32.mrf.mxu1 }
 0x286   : > { %v2749_v60 = vadd.f32 %v2683_v10, %v2475_v0  ;;  %v1928_v46 = vadd.f32 %v1866_v11, %v4252_v41 }
 0x288   : > { %v2785_v44 = vadd.f32 %v4405_v40, %v2749_v60 }
 0x289   : > { %v2138_v35 = vpop.f32.mrf.mxu2 }
 0x28a   : > { %2817 = vst.msk [vmem:[%s4416_s24 + $0x78] sm:$0xff] %vm274_vm0, %v2785_v44  ;;  %v2863_v39 = vsel %vm274_vm0, %v2785_v44, 0.0  ;;  %v2920_v45 = vmul.f32 %v2785_v44, %v2785_v44  ;;  %v2202_v7 = vadd.f32 %v2138_v35, %v1927_v37  ;;  %v2412_v34 = vpop.f32.mrf.mxu3  ;;  %v2689_v47 = vpop.f32.mrf.mxu0 }
 0x28b   : > { %v2864_v1 = vadd.f32 %v2863_v39, %v2862_v14 }
 0x28c   : > { %v2966_v33 = vsel %vm274_vm0, %v2920_v45, 0.0  ;;  %v2476_v23 = vadd.f32 %v2412_v34, %v2202_v7 }
 0x28d   : > { %v2967_v8 = vadd.f32 %v2966_v33, %v2965_v38  ;;  %v1869_v24 = vpop.f32.mrf.mxu1 }
 0x28e   : > { %v2750_v43 = vadd.f32 %v2686_v4, %v2476_v23  ;;  %v1929_v41 = vadd.f32 %v1869_v24, %v4263_v63 }
 0x290   : > { %v2786_v48 = vadd.f32 %v4405_v40, %v2750_v43 }
 0x291   : > { %v2141_v30 = vpop.f32.mrf.mxu2 }
 0x292   : > { %2818 = vst.msk [vmem:[%s4416_s24 + $0x80] sm:$0xff] %vm274_vm0, %v2786_v48  ;;  %v2865_v55 = vsel %vm274_vm0, %v2786_v48, 0.0  ;;  %v2921_v52 = vmul.f32 %v2786_v48, %v2786_v48  ;;  %v2203_v6 = vadd.f32 %v2141_v30, %v1928_v46  ;;  %v2415_v17 = vpop.f32.mrf.mxu3  ;;  %v2692_v26 = vpop.f32.mrf.mxu0 }
 0x293   : > { %v2866_v27 = vadd.f32 %v2865_v55, %v2864_v1 }
 0x294   : > { %v2968_v62 = vsel %vm274_vm0, %v2921_v52, 0.0  ;;  %v2477_v10 = vadd.f32 %v2415_v17, %v2203_v6 }
 0x295   : > { %v2969_v12 = vadd.f32 %v2968_v62, %v2967_v8  ;;  %v1872_v36 = vpop.f32.mrf.mxu1 }
 0x296   : > { %v2751_v5 = vadd.f32 %v2689_v47, %v2477_v10  ;;  %v1930_v63 = vadd.f32 %v1872_v36, %v4274_v49 }
 0x298   : > { %v2787_v18 = vadd.f32 %v4405_v40, %v2751_v5 }
 0x299   : > { %v2144_v31 = vpop.f32.mrf.mxu2 }
 0x29a   : > { %2819 = vst.msk [vmem:[%s4416_s24 + $0x88] sm:$0xff] %vm274_vm0, %v2787_v18  ;;  %v2867_v28 = vsel %vm274_vm0, %v2787_v18, 0.0  ;;  %v2922_v29 = vmul.f32 %v2787_v18, %v2787_v18  ;;  %v2204_v50 = vadd.f32 %v2144_v31, %v1929_v41  ;;  %v2418_v61 = vpop.f32.mrf.mxu3  ;;  %v2695_v42 = vpop.f32.mrf.mxu0 }
 0x29b   : > { %v2868_v59 = vadd.f32 %v2867_v28, %v2866_v27 }
 0x29c   : > { %v2970_v15 = vsel %vm274_vm0, %v2922_v29, 0.0  ;;  %v2478_v32 = vadd.f32 %v2418_v61, %v2204_v50 }
 0x29d   : > { %v2971_v19 = vadd.f32 %v2970_v15, %v2969_v12  ;;  %v1875_v16 = vpop.f32.mrf.mxu1 }
 0x29e   : > { %v2752_v13 = vadd.f32 %v2692_v26, %v2478_v32  ;;  %v1931_v49 = vadd.f32 %v1875_v16, %v4284_v56 }
 0x2a0   : > { %v2788_v4 = vadd.f32 %v4405_v40, %v2752_v13 }
 0x2a1   : > { %v2147_v14 = vpop.f32.mrf.mxu2 }
 0x2a2   : > { %2820 = vst.msk [vmem:[%s4416_s24 + $0x90] sm:$0xff] %vm274_vm0, %v2788_v4  ;;  %v2869_v54 = vsel %vm274_vm0, %v2788_v4, 0.0  ;;  %v2923_v0 = vmul.f32 %v2788_v4, %v2788_v4  ;;  %v2205_v38 = vadd.f32 %v2147_v14, %v1930_v63  ;;  %v2421_v11 = vpop.f32.mrf.mxu3  ;;  %v2698_v60 = vpop.f32.mrf.mxu0 }
 0x2a3   : > { %v2870_v37 = vadd.f32 %v2869_v54, %v2868_v59 }
 0x2a4   : > { %v2972_v44 = vsel %vm274_vm0, %v2923_v0, 0.0  ;;  %v2479_v35 = vadd.f32 %v2421_v11, %v2205_v38 }
 0x2a5   : > { %v2973_v39 = vadd.f32 %v2972_v44, %v2971_v19  ;;  %v1878_v45 = vpop.f32.mrf.mxu1 }
 0x2a6   : > { %v2753_v7 = vadd.f32 %v2695_v42, %v2479_v35  ;;  %v1932_v56 = vadd.f32 %v1878_v45, %v4294_v21 }
 0x2a8   : > { %v2789_v34 = vadd.f32 %v4405_v40, %v2753_v7 }
 0x2a9   : > { %v2150_v47 = vpop.f32.mrf.mxu2 }
 0x2aa   : > { %2821 = vst.msk [vmem:[%s4416_s24 + $0x98] sm:$0xff] %vm274_vm0, %v2789_v34  ;;  %v2871_v1 = vsel %vm274_vm0, %v2789_v34, 0.0  ;;  %v2924_v33 = vmul.f32 %v2789_v34, %v2789_v34  ;;  %v2206_v23 = vadd.f32 %v2150_v47, %v1931_v49  ;;  %v2424_v8 = vpop.f32.mrf.mxu3  ;;  %v2701_v24 = vpop.f32.mrf.mxu0 }
 0x2ab   : > { %v2872_v43 = vadd.f32 %v2871_v1, %v2870_v37 }
 0x2ac   : > { %v2974_v46 = vsel %vm274_vm0, %v2924_v33, 0.0  ;;  %v2480_v48 = vadd.f32 %v2424_v8, %v2206_v23 }
 0x2ad   : > { %v2975_v30 = vadd.f32 %v2974_v46, %v2973_v39  ;;  %v1881_v55 = vpop.f32.mrf.mxu1 }
 0x2ae   : > { %v2754_v52 = vadd.f32 %v2698_v60, %v2480_v48  ;;  %v1933_v21 = vadd.f32 %v1881_v55, %v4304_v3 }
 0x2b0   : > { %v2790_v6 = vadd.f32 %v4405_v40, %v2754_v52 }
 0x2b1   : > { %v2153_v17 = vpop.f32.mrf.mxu2 }
 0x2b2   : > { %2822 = vst.msk [vmem:[%s4416_s24 + $0xa0] sm:$0xff] %vm274_vm0, %v2790_v6  ;;  %v2873_v26 = vsel %vm274_vm0, %v2790_v6, 0.0  ;;  %v2925_v27 = vmul.f32 %v2790_v6, %v2790_v6  ;;  %v2207_v62 = vadd.f32 %v2153_v17, %v1932_v56  ;;  %v2427_v10 = vpop.f32.mrf.mxu3  ;;  %v2704_v12 = vpop.f32.mrf.mxu0 }
 0x2b3   : > { %v2874_v36 = vadd.f32 %v2873_v26, %v2872_v43 }
 0x2b4   : > { %v2976_v5 = vsel %vm274_vm0, %v2925_v27, 0.0  ;;  %v2481_v41 = vadd.f32 %v2427_v10, %v2207_v62 }
 0x2b5   : > { %v2977_v18 = vadd.f32 %v2976_v5, %v2975_v30  ;;  %v1884_v31 = vpop.f32.mrf.mxu1 }
 0x2b6   : > { %v2755_v28 = vadd.f32 %v2701_v24, %v2481_v41  ;;  %v1934_v3 = vadd.f32 %v1884_v31, %v4314_v2 }
 0x2b8   : > { %v2791_v29 = vadd.f32 %v4405_v40, %v2755_v28 }
 0x2b9   : > { %v2156_v50 = vpop.f32.mrf.mxu2 }
 0x2ba   : > { %2823 = vst.msk [vmem:[%s4416_s24 + $0xa8] sm:$0xff] %vm274_vm0, %v2791_v29  ;;  %v2875_v61 = vsel %vm274_vm0, %v2791_v29, 0.0  ;;  %v2926_v42 = vmul.f32 %v2791_v29, %v2791_v29  ;;  %v2208_v59 = vadd.f32 %v2156_v50, %v1933_v21  ;;  %v2430_v15 = vpop.f32.mrf.mxu3  ;;  %v2707_v32 = vpop.f32.mrf.mxu0 }
 0x2bb   : > { %v2876_v19 = vadd.f32 %v2875_v61, %v2874_v36 }
 0x2bc   : > { %v2978_v16 = vsel %vm274_vm0, %v2926_v42, 0.0  ;;  %v2482_v13 = vadd.f32 %v2430_v15, %v2208_v59 }
 0x2bd   : > { %v2979_v63 = vadd.f32 %v2978_v16, %v2977_v18  ;;  %v1887_v4 = vpop.f32.mrf.mxu1 }
 0x2be   : > { %v2756_v14 = vadd.f32 %v2704_v12, %v2482_v13  ;;  %v1935_v2 = vadd.f32 %v1887_v4, %v4324_v22 }
 0x2c0   : > { %v2792_v54 = vadd.f32 %v4405_v40, %v2756_v14 }
 0x2c1   : > { %v2159_v0 = vpop.f32.mrf.mxu2 }
 0x2c2   : > { %2824 = vst.msk [vmem:[%s4416_s24 + $0xb0] sm:$0xff] %vm274_vm0, %v2792_v54  ;;  %v2877_v38 = vsel %vm274_vm0, %v2792_v54, 0.0  ;;  %v2927_v11 = vmul.f32 %v2792_v54, %v2792_v54  ;;  %v2209_v60 = vadd.f32 %v2159_v0, %v1934_v3  ;;  %v2433_v37 = vpop.f32.mrf.mxu3  ;;  %v2710_v44 = vpop.f32.mrf.mxu0 }
 0x2c3   : > { %v2878_v35 = vadd.f32 %v2877_v38, %v2876_v19 }
 0x2c4   : > { %v2980_v39 = vsel %vm274_vm0, %v2927_v11, 0.0  ;;  %v2483_v45 = vadd.f32 %v2433_v37, %v2209_v60 }
 0x2c5   : > { %v2981_v7 = vadd.f32 %v2980_v39, %v2979_v63  ;;  %v1890_v49 = vpop.f32.mrf.mxu1 }
 0x2c6   : > { %v2757_v34 = vadd.f32 %v2707_v32, %v2483_v45  ;;  %v1936_v22 = vadd.f32 %v1890_v49, %v4334_v57 }
 0x2c8   : > { %v2793_v47 = vadd.f32 %v4405_v40, %v2757_v34 }
 0x2c9   : > { %v2162_v1 = vpop.f32.mrf.mxu2 }
 0x2ca   : > { %2825 = vst.msk [vmem:[%s4416_s24 + $0xb8] sm:$0xff] %vm274_vm0, %v2793_v47  ;;  %v2879_v33 = vsel %vm274_vm0, %v2793_v47, 0.0  ;;  %v2928_v23 = vmul.f32 %v2793_v47, %v2793_v47  ;;  %v2210_v8 = vadd.f32 %v2162_v1, %v1935_v2  ;;  %v2436_v24 = vpop.f32.mrf.mxu3  ;;  %v2713_v43 = vpop.f32.mrf.mxu0 }
 0x2cb   : > { %v2880_v46 = vadd.f32 %v2879_v33, %v2878_v35 }
 0x2cc   : > { %v2982_v48 = vsel %vm274_vm0, %v2928_v23, 0.0  ;;  %v2484_v30 = vadd.f32 %v2436_v24, %v2210_v8 }
 0x2cd   : > { %v2983_v55 = vadd.f32 %v2982_v48, %v2981_v7  ;;  %v1893_v52 = vpop.f32.mrf.mxu1 }
 0x2ce   : > { %v2758_v56 = vadd.f32 %v2710_v44, %v2484_v30  ;;  %v1937_v57 = vadd.f32 %v1893_v52, %v4344_v53 }
 0x2d0   : > { %v2794_v6 = vadd.f32 %v4405_v40, %v2758_v56 }
 0x2d1   : > { %v2165_v17 = vpop.f32.mrf.mxu2 }
 0x2d2   : > { %2826 = vst.msk [vmem:[%s4416_s24 + $0xc0] sm:$0xff] %vm274_vm0, %v2794_v6  ;;  %v2881_v26 = vsel %vm274_vm0, %v2794_v6, 0.0  ;;  %v2929_v27 = vmul.f32 %v2794_v6, %v2794_v6  ;;  %v2211_v62 = vadd.f32 %v2165_v17, %v1936_v22  ;;  %v2439_v10 = vpop.f32.mrf.mxu3  ;;  %v2716_v12 = vpop.f32.mrf.mxu0 }
 0x2d3   : > { %v2882_v36 = vadd.f32 %v2881_v26, %v2880_v46 }
 0x2d4   : > { %v2984_v5 = vsel %vm274_vm0, %v2929_v27, 0.0  ;;  %v2485_v41 = vadd.f32 %v2439_v10, %v2211_v62 }
 0x2d5   : > { %v2985_v18 = vadd.f32 %v2984_v5, %v2983_v55  ;;  %v1896_v31 = vpop.f32.mrf.mxu1 }
 0x2d6   : > { %v2759_v28 = vadd.f32 %v2713_v43, %v2485_v41  ;;  %v1938_v53 = vadd.f32 %v1896_v31, %v4354_v51 }
 0x2d8   : > { %v2795_v21 = vadd.f32 %v4405_v40, %v2759_v28 }
 0x2d9   : > { %v2168_v29 = vpop.f32.mrf.mxu2 }
 0x2da   : > { %2827 = vst.msk [vmem:[%s4416_s24 + $0xc8] sm:$0xff] %vm274_vm0, %v2795_v21  ;;  %v2883_v50 = vsel %vm274_vm0, %v2795_v21, 0.0  ;;  %v2930_v61 = vmul.f32 %v2795_v21, %v2795_v21  ;;  %v2212_v42 = vadd.f32 %v2168_v29, %v1937_v57  ;;  %v2442_v59 = vpop.f32.mrf.mxu3  ;;  %v2719_v32 = vpop.f32.mrf.mxu0 }
 0x2db   : > { %v2884_v15 = vadd.f32 %v2883_v50, %v2882_v36 }
 0x2dc   : > { %v2986_v19 = vsel %vm274_vm0, %v2930_v61, 0.0  ;;  %v2486_v16 = vadd.f32 %v2442_v59, %v2212_v42 }
 0x2dd   : > { %v2987_v13 = vadd.f32 %v2986_v19, %v2985_v18  ;;  %v1899_v4 = vpop.f32.mrf.mxu1 }
 0x2de   : > { %v2760_v63 = vadd.f32 %v2716_v12, %v2486_v16  ;;  %v1939_v51 = vadd.f32 %v1899_v4, %v4364_v9 }
 0x2e0   : > { %v2796_v14 = vadd.f32 %v4405_v40, %v2760_v63 }
 0x2e1   : > { %v2171_v3 = vpop.f32.mrf.mxu2 }
 0x2e2   : > { %2828 = vst.msk [vmem:[%s4416_s24 + $0xd0] sm:$0xff] %vm274_vm0, %v2796_v14  ;;  %v2885_v54 = vsel %vm274_vm0, %v2796_v14, 0.0  ;;  %v2931_v0 = vmul.f32 %v2796_v14, %v2796_v14  ;;  %v2213_v38 = vadd.f32 %v2171_v3, %v1938_v53  ;;  %v2445_v11 = vpop.f32.mrf.mxu3  ;;  %v2722_v39 = vpop.f32.mrf.mxu0 }
 0x2e3   : > { %v2886_v60 = vadd.f32 %v2885_v54, %v2884_v15 }
 0x2e4   : > { %v2988_v37 = vsel %vm274_vm0, %v2931_v0, 0.0  ;;  %v2487_v44 = vadd.f32 %v2445_v11, %v2213_v38 }
 0x2e5   : > { %v2989_v35 = vadd.f32 %v2988_v37, %v2987_v13  ;;  %v1902_v34 = vpop.f32.mrf.mxu1 }
 0x2e6   : > { %v2761_v45 = vadd.f32 %v2719_v32, %v2487_v44  ;;  %v1940_v9 = vadd.f32 %v1902_v34, %v4374_v20 }
 0x2e8   : > { %v2797_v7 = vadd.f32 %v4405_v40, %v2761_v45  ;;  %v3426_v40 = vld [vmem:[%s4687_s2] ss:$0 sm:$0xff] }
 0x2e9   : > { %v2174_v49 = vpop.f32.mrf.mxu2 }
 0x2ea   : > { %2829 = vst.msk [vmem:[%s4416_s24 + $0xd8] sm:$0xff] %vm274_vm0, %v2797_v7  ;;  %v2887_v2 = vsel %vm274_vm0, %v2797_v7, 0.0  ;;  %v2932_v47 = vmul.f32 %v2797_v7, %v2797_v7  ;;  %v2214_v1 = vadd.f32 %v2174_v49, %v1939_v51  ;;  %v2448_v33 = vpop.f32.mrf.mxu3  ;;  %v2725_v48 = vpop.f32.mrf.mxu0 }
 0x2eb   : > { %v2888_v23 = vadd.f32 %v2887_v2, %v2886_v60 }
 0x2ec   : > { %v2990_v8 = vsel %vm274_vm0, %v2932_v47, 0.0  ;;  %v2488_v24 = vadd.f32 %v2448_v33, %v2214_v1 }
 0x2ed   : > { %v2991_v43 = vadd.f32 %v2990_v8, %v2989_v35  ;;  %v1905_v26 = vpop.f32.mrf.mxu1 }
 0x2ee   : > { %v2762_v46 = vadd.f32 %v2722_v39, %v2488_v24  ;;  %v1941_v12 = vadd.f32 %v1905_v26, %v4384_v58 }
 0x2f0   : > { %v2798_v30 = vadd.f32 %v3426_v40, %v2762_v46 }
 0x2f1   : > { %v2177_v55 = vpop.f32.mrf.mxu2 }
 0x2f2   : > { %2830 = vst.msk [vmem:[%s4416_s24 + $0xe0] sm:$0xff] %vm274_vm0, %v2798_v30  ;;  %v2889_v52 = vsel %vm274_vm0, %v2798_v30, 0.0  ;;  %v2933_v56 = vmul.f32 %v2798_v30, %v2798_v30  ;;  %v2215_v22 = vadd.f32 %v2177_v55, %v1940_v9  ;;  %v2451_v6 = vpop.f32.mrf.mxu3  ;;  %v2728_v41 = vpop.f32.mrf.mxu0 }
 0x2f3   : > { %v2890_v17 = vadd.f32 %v2889_v52, %v2888_v23 }
 0x2f4   : > { %v2992_v27 = vsel %vm274_vm0, %v2933_v56, 0.0  ;;  %v2489_v62 = vadd.f32 %v2451_v6, %v2215_v22 }
 0x2f5   : > { %v2993_v20 = vadd.f32 %v2992_v27, %v2991_v43  ;;  %v1908_v42 = vpop.f32.mrf.mxu1 }
 0x2f6   : > { %v2763_v10 = vadd.f32 %v2725_v48, %v2489_v62  ;;  %v1942_v58 = vadd.f32 %v1908_v42, %v4394_v25 }
 0x2f8   : > { %v2799_v36 = vadd.f32 %v3426_v40, %v2763_v10 }
 0x2f9   : > { %v2180_v5 = vpop.f32.mrf.mxu2 }
 0x2fa   : > { %2831 = vst.msk [vmem:[%s4416_s24 + $0xe8] sm:$0xff] %vm274_vm0, %v2799_v36  ;;  %v2891_v18 = vsel %vm274_vm0, %v2799_v36, 0.0  ;;  %v2934_v31 = vmul.f32 %v2799_v36, %v2799_v36  ;;  %v2216_v28 = vadd.f32 %v2180_v5, %v1941_v12  ;;  %v2454_v57 = vpop.f32.mrf.mxu3  ;;  %v2731_v53 = vpop.f32.mrf.mxu0 }
 0x2fb   : > { %v2892_v21 = vadd.f32 %v2891_v18, %v2890_v17 }
 0x2fc   : > { %v2994_v29 = vsel %vm274_vm0, %v2934_v31, 0.0  ;;  %v2490_v50 = vadd.f32 %v2454_v57, %v2216_v28 }
 0x2fd   : > { %v2995_v61 = vadd.f32 %v2994_v29, %v2993_v20 }
 0x2fe   : > { %v2764_v59 = vadd.f32 %v2728_v41, %v2490_v50 }
 0x300   : > { %v2800_v15 = vadd.f32 %v3426_v40, %v2764_v59 }
 0x301   : > { %v2183_v32 = vpop.f32.mrf.mxu2 }
 0x302   : > { %2832 = vst.msk [vmem:[%s4416_s24 + $0xf0] sm:$0xff] %vm274_vm0, %v2800_v15  ;;  %v2893_v19 = vsel %vm274_vm0, %v2800_v15, 0.0  ;;  %v2935_v16 = vmul.f32 %v2800_v15, %v2800_v15  ;;  %v2217_v13 = vadd.f32 %v2183_v32, %v1942_v58  ;;  %v2457_v63 = vpop.f32.mrf.mxu3 }
 0x303   : > { %v2894_v4 = vadd.f32 %v2893_v19, %v2892_v21 }
 0x304   : > { %v2996_v14 = vsel %vm274_vm0, %v2935_v16, 0.0  ;;  %v2491_v3 = vadd.f32 %v2457_v63, %v2217_v13 }
 0x305   : > { %v2997_v54 = vadd.f32 %v2996_v14, %v2995_v61 }
 0x306   : > { %v2765_v0 = vadd.f32 %v2731_v53, %v2491_v3 }
 0x308   : > { %v2801_v38 = vadd.f32 %v3426_v40, %v2765_v0 }
 0x30a   : > { %2833 = vst.msk [vmem:[%s4416_s24 + $0xf8] sm:$0xff] %vm274_vm0, %v2801_v38  ;;  %v2895_v25 = vsel %vm274_vm0, %v2801_v38, 0.0  ;;  %v2936_v11 = vmul.f32 %v2801_v38, %v2801_v38 }
 0x30b   : > { %v2896_v60 = vadd.f32 %v2895_v25, %v2894_v4 }
 0x30c   : > { %v2998_v37 = vsel %vm274_vm0, %v2936_v11, 0.0 }
 0x30d   : > { %v2897_v44 = vrot.slane %v2896_v60, 4  ;;  %v2999_v35 = vadd.f32 %v2998_v37, %v2997_v54 }
 0x30f   : > { %v2898_v39 = vadd.f32 %v2897_v44, %v2896_v60  ;;  %v3000_v45 = vrot.slane %v2999_v35, 4 }
 0x311   : > { %v2899_v51 = vrot.slane %v2898_v39, 2  ;;  %v3001_v7 = vadd.f32 %v3000_v45, %v2999_v35 }
 0x313   : > { %v2900_v49 = vadd.f32 %v2899_v51, %v2898_v39  ;;  %v3002_v34 = vrot.slane %v3001_v7, 2 }
 0x315   : > { %v2901_v2 = vrot.slane %v2900_v49, 1  ;;  %v3003_v47 = vadd.f32 %v3002_v34, %v3001_v7 }
 0x317   : > { %v2902_v1 = vadd.f32 %v2901_v2, %v2900_v49  ;;  %v3004_v33 = vrot.slane %v3003_v47, 1 }
 0x319   : > { %2904 = vst.msk [vmem:[%s238_s28] sm:$0x1] %vm2903_vm2, %v2902_v1  ;;  %v3005_v23 = vadd.f32 %v3004_v33, %v3003_v47 }
 0x31b   : > { %3006 = vst.msk [vmem:[%s241_s6] sm:$0x1] %vm2903_vm2, %v3005_v23 }
 0x31c PF: > { %s16_s18 = sadd.s32 1, %s3433_s18  }
 0x31d   : > { %p13_p4 = scmp.ge.s32.totalorder %s16_s18, 4  }
 0x31f   :  { %15 = sbr.rel (!%p13_p4) target bundleno = 1 (0x1), region = 88 }

// kernel: block_forward.4
= control target key start
LH: loop header
LB: loop body
LE: loop exit
PB: predicated region body
PF: predicated region fallthrough
CT: control target
= control target key end

     0   :  { %s3638_s24 = smov 0   ;;  %s4923_s0 = inlined_call_operand.vmem [shape: f32[2,16,16,8], index: 0, kind: input, shape index: {}]   ;;  %s4924_s1 = inlined_call_operand.vmem [shape: f32[1,8], index: 1, kind: input, shape index: {}]   ;;  %s4925_s2 = inlined_call_operand.vmem [shape: f32[1,8], index: 2, kind: input, shape index: {}]   ;;  %s4926_s3 = inlined_call_operand.vmem [shape: f32[72,8], index: 3, kind: input, shape index: {}]   ;;  %s4927_s4 = inlined_call_operand.vmem [shape: f32[1,8], index: 4, kind: input, shape index: {}]   ;;  %s4928_s5 = inlined_call_operand.vmem [shape: f32[2,16,16,8], index: 5, kind: output, shape index: {0}]   ;;  %s4929_s6 = inlined_call_operand.vmem [shape: f32[2,1,8], index: 6, kind: output, shape index: {1}]   ;;  %s4930_s7 = inlined_call_operand.vmem [shape: f32[2,1,8], index: 7, kind: output, shape index: {2}]  }
   0x1 LB: > { %s3270_s25 = sadd.s32 4294967295, %s3595_s24   ;;  %p3274_p0 = scmp.ge.s32.totalorder %s3595_s24, 1  ;;  %s3595_s24 = sphi %s3638_s24, %s18_s24  }
   0x2   : > { %p242_p1 = scmp.lt.s32.totalorder %s3595_s24, 3 }
   0x4   : > { %p243_p2 = pnand %p3274_p0, %p242_p1 }
   0x6   : > { %246 = sbr.rel (%p243_p2) target bundleno = 796 (0x31c), region = 40 }
   0xb   : > { %v586_v0 = vld [vmem:[%s4926_s3 + $0x8] sm:$0xff]  ;;  %p280_p3 = scmp.lt.s32.totalorder %s3270_s25, 1  ;;  %vm432_vm0 = vcmask 64512   ;;  %v3597_v1 = vmov 0.0   ;;  %v3656_v2 = vld [vmem:[%s4924_s1] ss:$0 sm:$0xff] }
   0xc   : > { %3571 = vmatpush.msra.mxu1 %v586_v0  ;;  %3572 = vmatpush.msra.mxu2 %v586_v0  ;;  %446 = vst.msk [vmem:[#allocation2 + $0x60] sm:$0xff] %vm432_vm0, %v3597_v1  ;;  %v3673_v3 = vld [vmem:[%s4925_s2] ss:$0 sm:$0xff]  ;;  %v1037_v8 = vld [vmem:[%s4926_s3 + $0x10] sm:$0xff]  ;;  %v1311_v9 = vld [vmem:[%s4926_s3 + $0x18] sm:$0xff]  ;;  %vm435_vm1 = vcmask 58368  }
   0xd   : > { %s5036_s25 = smov (!%p280_p3, %s3270_s25), 1  ;;  %3573 = vmatpush.msra.mxu3 %v586_v0  ;;  %698 = vmatpush.msra.mxu0 %v586_v0  ;;  %447 = vst.msk [vmem:[#allocation2 + $0x68] sm:$0xff] %vm432_vm0, %v3597_v1  ;;  %v553_v10 = vld [vmem:[%s4926_s3] sm:$0xff]  ;;  %vm3061_vm2 = vcmask 57344  }
   0xe   : > { %s3569_s30 = sshll.u32 %s5036_s25, 8  ;;  %433 = vst.msk [vmem:[#allocation2] sm:$0xff] %vm432_vm0, %v3597_v1  ;;  %1149 = vmatpush.msrb.mxu2 %v1037_v8  ;;  %907 = vmatpush.msrb.mxu1 %v553_v10  ;;  %v1585_v24 = vld [vmem:[%s4926_s3 + $0x20] sm:$0xff]  ;;  %s292_s21 = scalar_lea.vmem %s4929_s6, %s5036_s25 }
   0xf   : > { %s3668_s10 = scalar_lea.vmem %s4923_s0, %s3569_s30  ;;  %434 = vst.msk [vmem:[#allocation2 + $0x8] sm:$0xff] %vm432_vm0, %v3597_v1  ;;  %1423 = vmatpush.msrb.mxu3 %v1311_v9  ;;  %1697 = vmatpush.msrb.mxu0 %v1585_v24  ;;  %s4657_s17 = scalar_lea.vmem %s4928_s5, %s3569_s30 }
  0x10   : > { %v302_v4 = vld [vmem:[%s3668_s10 + $0x30] sm:$0xff]  ;;  %437 = vst.msk [vmem:[#allocation2 + $0x18] sm:$0xff] %vm432_vm0, %v3597_v1  ;;  %v303_v15 = vld [vmem:[%s3668_s10 + $0x38] sm:$0xff]  ;;  %v304_v30 = vld [vmem:[%s3668_s10 + $0x40] sm:$0xff]  ;;  %s295_s26 = scalar_lea.vmem %s4930_s7, %s5036_s25 }
  0x11   : > { %v338_v5 = vmul.f32 %v3656_v2, %v302_v4  ;;  %438 = vst.msk [vmem:[#allocation2 + $0x20] sm:$0xff] %vm432_vm0, %v3597_v1  ;;  %v310_v12 = vld [vmem:[%s3668_s10 + $0x70] sm:$0xff]  ;;  %v339_v17 = vmul.f32 %v3656_v2, %v303_v15  ;;  %v311_v26 = vld [vmem:[%s3668_s10 + $0x78] sm:$0xff]  ;;  %v312_v32 = vld [vmem:[%s3668_s10 + $0x80] sm:$0xff]  ;;  %v340_v36 = vmul.f32 %v3656_v2, %v304_v30 }
  0x12   : > { %440 = vst.msk [vmem:[#allocation2 + $0x30] sm:$0xff] %vm432_vm0, %v3597_v1  ;;  %v318_v13 = vld [vmem:[%s3668_s10 + $0xb0] sm:$0xff]  ;;  %v346_v14 = vmul.f32 %v3656_v2, %v310_v12  ;;  %v319_v28 = vld [vmem:[%s3668_s10 + $0xb8] sm:$0xff]  ;;  %v347_v31 = vmul.f32 %v3656_v2, %v311_v26  ;;  %v320_v35 = vld [vmem:[%s3668_s10 + $0xc0] sm:$0xff]  ;;  %v348_v39 = vmul.f32 %v3656_v2, %v312_v32 }
  0x13   : > { %v374_v6 = vadd.f32 %v3673_v3, %v338_v5  ;;  %441 = vst.msk [vmem:[#allocation2 + $0x38] sm:$0xff] %vm432_vm0, %v3597_v1  ;;  %v354_v16 = vmul.f32 %v3656_v2, %v318_v13  ;;  %v375_v20 = vadd.f32 %v3673_v3, %v339_v17  ;;  %v355_v34 = vmul.f32 %v3656_v2, %v319_v28  ;;  %v305_v38 = vld [vmem:[%s3668_s10 + $0x48] sm:$0xff]  ;;  %v296_v43 = vld [vmem:[%s3668_s10] sm:$0xff]  ;;  %v306_v49 = vld [vmem:[%s3668_s10 + $0x50] sm:$0xff] }
  0x14   : > { %443 = vst.msk [vmem:[#allocation2 + $0x48] sm:$0xff] %vm432_vm0, %v3597_v1  ;;  %v382_v18 = vadd.f32 %v3673_v3, %v346_v14  ;;  %v313_v40 = vld [vmem:[%s3668_s10 + $0x88] sm:$0xff]  ;;  %v383_v41 = vadd.f32 %v3673_v3, %v347_v31  ;;  %v356_v42 = vmul.f32 %v3656_v2, %v320_v35  ;;  %v341_v45 = vmul.f32 %v3656_v2, %v305_v38  ;;  %v314_v52 = vld [vmem:[%s3668_s10 + $0x90] sm:$0xff]  ;;  %v307_v0 = vld [vmem:[%s3668_s10 + $0x58] sm:$0xff] }
  0x15   : > { %v406_v7 = vmax.f32 %v374_v6, 0.0  ;;  %444 = vst.msk [vmem:[#allocation2 + $0x50] sm:$0xff] %vm432_vm0, %v3597_v1  ;;  %v390_v19 = vadd.f32 %v3673_v3, %v354_v16  ;;  %v407_v25 = vmax.f32 %v375_v20, 0.0  ;;  %v391_v44 = vadd.f32 %v3673_v3, %v355_v34  ;;  %v321_v46 = vld [vmem:[%s3668_s10 + $0xc8] sm:$0xff]  ;;  %v322_v60 = vld [vmem:[%s3668_s10 + $0xd0] sm:$0xff]  ;;  %v323_v15 = vld [vmem:[%s3668_s10 + $0xd8] sm:$0xff] }
  0x16   : > { %449 = vst.msk [vmem:[#allocation2 + $0x78] sm:$0xff] %vm432_vm0, %v3597_v1  ;;  %v414_v21 = vmax.f32 %v382_v18, 0.0  ;;  %v554_v23 = vld [vmem:[#allocation2 + $0x1] sm:$0xff]  ;;  %v376_v47 = vadd.f32 %v3673_v3, %v340_v36  ;;  %v349_v48 = vmul.f32 %v3656_v2, %v313_v40  ;;  %v384_v50 = vadd.f32 %v3673_v3, %v348_v39  ;;  %v298_v12 = vld [vmem:[%s3668_s10 + $0x10] sm:$0xff]  ;;  %v299_v28 = vld [vmem:[%s3668_s10 + $0x18] sm:$0xff] }
  0x17   : > { %495 = vst.msk [vmem:[#allocation2 + $0x61] sm:$0xff] %vm432_vm0, %v406_v7  ;;  %v422_v22 = vmax.f32 %v390_v19, 0.0  ;;  %3279 = vmatmul.msk.f32.vlgmr.msra.gmra.mxu0 %vm432_vm0, %v554_v23  ;;  %v332_v51 = vmul.f32 %v3656_v2, %v296_v43  ;;  %v415_v53 = vmax.f32 %v383_v41, 0.0  ;;  %v392_v54 = vadd.f32 %v3673_v3, %v356_v42  ;;  %v297_v56 = vld [vmem:[%s3668_s10 + $0x8] sm:$0xff]  ;;  %v315_v7 = vld [vmem:[%s3668_s10 + $0x98] sm:$0xff]  ;;  %v308_v19 = vld [vmem:[%s3668_s10 + $0x60] sm:$0xff] }
  0x18   : > { %450 = vst.msk [vmem:[#allocation2 + $0x80] sm:$0xff] %vm432_vm0, %v3597_v1  ;;  %v357_v55 = vmul.f32 %v3656_v2, %v321_v46  ;;  %v423_v57 = vmax.f32 %v391_v44, 0.0  ;;  %v377_v58 = vadd.f32 %v3673_v3, %v341_v45  ;;  %v342_v59 = vmul.f32 %v3656_v2, %v306_v49  ;;  %v316_v23 = vld [vmem:[%s3668_s10 + $0xa0] sm:$0xff]  ;;  %v309_v49 = vld [vmem:[%s3668_s10 + $0x68] sm:$0xff] }
  0x19   : > { %452 = vst.msk [vmem:[#allocation2 + $0x90] sm:$0xff] %vm432_vm0, %v3597_v1  ;;  %v408_v61 = vmax.f32 %v376_v47, 0.0  ;;  %v385_v62 = vadd.f32 %v3673_v3, %v349_v48  ;;  %v350_v63 = vmul.f32 %v3656_v2, %v314_v52  ;;  %v416_v4 = vmax.f32 %v384_v50, 0.0  ;;  %v324_v34 = vld [vmem:[%s3668_s10 + $0xe0] sm:$0xff]  ;;  %v317_v50 = vld [vmem:[%s3668_s10 + $0xa8] sm:$0xff] }
  0x1a   : > { %453 = vst.msk [vmem:[#allocation2 + $0x98] sm:$0xff] %vm432_vm0, %v3597_v1  ;;  %v368_v5 = vadd.f32 %v3673_v3, %v332_v51  ;;  %v333_v6 = vmul.f32 %v3656_v2, %v297_v56  ;;  %v424_v8 = vmax.f32 %v392_v54, 0.0  ;;  %v393_v9 = vadd.f32 %v3673_v3, %v357_v55 }
  0x1b   : > { %455 = vst.msk [vmem:[#allocation2 + $0xa8] sm:$0xff] %vm432_vm0, %v3597_v1  ;;  %v358_v10 = vmul.f32 %v3656_v2, %v322_v60  ;;  %v409_v13 = vmax.f32 %v377_v58, 0.0  ;;  %v343_v14 = vmul.f32 %v3656_v2, %v307_v0  ;;  %v417_v16 = vmax.f32 %v385_v62, 0.0  ;;  %v325_v58 = vld [vmem:[%s3668_s10 + $0xe8] sm:$0xff] }
  0x1c   : > { %456 = vst.msk [vmem:[#allocation2 + $0xb0] sm:$0xff] %vm432_vm0, %v3597_v1  ;;  %v386_v17 = vadd.f32 %v3673_v3, %v350_v63  ;;  %v351_v18 = vmul.f32 %v3656_v2, %v315_v7  ;;  %v400_v20 = vmax.f32 %v368_v5, 0.0  ;;  %v425_v24 = vmax.f32 %v393_v9, 0.0 }
  0x1d   : > { %458 = vst.msk [vmem:[#allocation2 + $0xc0] sm:$0xff] %vm432_vm0, %v3597_v1  ;;  %v359_v26 = vmul.f32 %v3656_v2, %v323_v15  ;;  %v379_v31 = vadd.f32 %v3673_v3, %v343_v14  ;;  %v344_v32 = vmul.f32 %v3656_v2, %v308_v19  ;;  %v335_v41 = vmul.f32 %v3656_v2, %v299_v28 }
  0x1e   : > { %v3716_v11 = vld [vmem:[#allocation2 + $0x61] sm:$0xff]  ;;  %459 = vst.msk [vmem:[#allocation2 + $0xc8] sm:$0xff] %vm432_vm0, %v3597_v1  ;;  %v418_v35 = vmax.f32 %v386_v17, 0.0  ;;  %v387_v36 = vadd.f32 %v3673_v3, %v351_v18  ;;  %v360_v45 = vmul.f32 %v3656_v2, %v324_v34  ;;  %v353_v54 = vmul.f32 %v3656_v2, %v317_v50 }
  0x1f   : > { %3287 = vmatmul.msk.f32.vlgmr.msra.gmra.mxu1 %vm432_vm0, %v3716_v11  ;;  %461 = vst.msk [vmem:[#allocation2 + $0xd8] sm:$0xff] %vm432_vm0, %v3597_v1  ;;  %v395_v44 = vadd.f32 %v3673_v3, %v359_v26  ;;  %v411_v47 = vmax.f32 %v379_v31, 0.0  ;;  %v380_v48 = vadd.f32 %v3673_v3, %v344_v32  ;;  %v371_v56 = vadd.f32 %v3673_v3, %v335_v41  ;;  %v301_v17 = vld [vmem:[%s3668_s10 + $0x28] sm:$0xff]  ;;  %v2408_v31 = vld [vmem:[%s4926_s3 + $0x38] sm:$0xff] }
  0x20   : > { %462 = vst.msk [vmem:[#allocation2 + $0xe0] sm:$0xff] %vm432_vm0, %v3597_v1  ;;  %v419_v51 = vmax.f32 %v387_v36, 0.0  ;;  %v396_v60 = vadd.f32 %v3673_v3, %v360_v45  ;;  %v361_v62 = vmul.f32 %v3656_v2, %v325_v58  ;;  %v1859_v32 = vld [vmem:[%s4926_s3 + $0x28] sm:$0xff] }
  0x21   : > { %464 = vst.msk [vmem:[#allocation2 + $0xf0] sm:$0xff] %vm432_vm0, %v3597_v1  ;;  %v412_v0 = vmax.f32 %v380_v48, 0.0  ;;  %1971 = vmatpush.msra.mxu1 %v1859_v32  ;;  %v1005_v50 = vld [vmem:[#allocation2 + $0x2] sm:$0xff] }
  0x22   : > { %465 = vst.msk [vmem:[#allocation2 + $0xf8] sm:$0xff] %vm432_vm0, %v3597_v1 }
  0x23   : > { %467 = vst.msk [vmem:[#allocation2 + $0x108] sm:$0xff] %vm432_vm0, %v3597_v1 }
  0x24   : > { %468 = vst.msk [vmem:[#allocation2 + $0x110] sm:$0xff] %vm432_vm0, %v3597_v1 }
  0x25   : > { %470 = vst.msk [vmem:[#allocation2 + $0x120] sm:$0xff] %vm432_vm0, %v3597_v1 }
  0x26   : > { %471 = vst.msk [vmem:[#allocation2 + $0x128] sm:$0xff] %vm432_vm0, %v3597_v1 }
  0x27   : > { %473 = vst.msk [vmem:[#allocation2 + $0x138] sm:$0xff] %vm432_vm0, %v3597_v1 }
  0x28   : > { %474 = vst.msk [vmem:[#allocation2 + $0x140] sm:$0xff] %vm432_vm0, %v3597_v1 }
  0x29   : > { %476 = vst.msk [vmem:[#allocation2 + $0x150] sm:$0xff] %vm432_vm0, %v3597_v1 }
  0x2a   : > { %477 = vst.msk [vmem:[#allocation2 + $0x158] sm:$0xff] %vm432_vm0, %v3597_v1 }
  0x2b   : > { %479 = vst.msk [vmem:[#allocation2 + $0x168] sm:$0xff] %vm432_vm0, %v3597_v1 }
  0x2c   : > { %480 = vst.msk [vmem:[#allocation2 + $0x170] sm:$0xff] %vm432_vm0, %v3597_v1 }
  0x2d   : > { %482 = vst.msk [vmem:[#allocation2 + $0x180] sm:$0xff] %vm432_vm0, %v3597_v1 }
  0x2e   : > { %483 = vst.msk [vmem:[#allocation2 + $0x188] sm:$0xff] %vm432_vm0, %v3597_v1 }
  0x2f   : > { %485 = vst.msk [vmem:[#allocation2 + $0x198] sm:$0xff] %vm432_vm0, %v3597_v1 }
  0x30   : > { %486 = vst.msk [vmem:[#allocation2 + $0x1a0] sm:$0xff] %vm432_vm0, %v3597_v1 }
  0x31   : > { %503 = vst.msk [vmem:[#allocation2 + $0xc1] sm:$0xff] %vm432_vm0, %v414_v21  ;;  %v369_v21 = vadd.f32 %v3673_v3, %v333_v6 }
  0x32   : > { %511 = vst.msk [vmem:[#allocation2 + $0x121] sm:$0xff] %vm432_vm0, %v422_v22  ;;  %v334_v22 = vmul.f32 %v3656_v2, %v298_v12 }
  0x33   : > { %448 = vst.msk [vmem:[#allocation2 + $0x70] sm:$0x3] %vm435_vm1, %v3597_v1  ;;  %v401_v39 = vmax.f32 %v369_v21, 0.0 }
  0x34   : > { %496 = vst.msk [vmem:[#allocation2 + $0x69] sm:$0xff] %vm432_vm0, %v407_v25  ;;  %v394_v25 = vadd.f32 %v3673_v3, %v358_v10  ;;  %v370_v40 = vadd.f32 %v3673_v3, %v334_v22  ;;  %v403_v10 = vmax.f32 %v371_v56, 0.0 }
  0x35   : > { %436 = vst.msk [vmem:[#allocation2 + $0x10] sm:$0x3] %vm435_vm1, %v3597_v1 }
  0x36   : > { %439 = vst.msk [vmem:[#allocation2 + $0x28] sm:$0x3] %vm435_vm1, %v3597_v1  ;;  %v426_v43 = vmax.f32 %v394_v25, 0.0  ;;  %v402_v55 = vmax.f32 %v370_v40, 0.0 }
  0x37   : > { %442 = vst.msk [vmem:[#allocation2 + $0x40] sm:$0x3] %vm435_vm1, %v3597_v1 }
  0x38   : > { %v3783_v27 = vld [vmem:[#allocation2 + $0xc1] sm:$0xff]  ;;  %445 = vst.msk [vmem:[#allocation2 + $0x58] sm:$0x3] %vm435_vm1, %v3597_v1 }
  0x39   : > { %3295 = vmatmul.msk.f32.vlgmr.msra.gmra.mxu2 %vm432_vm0, %v3783_v27  ;;  %v3790_v29 = vld [vmem:[#allocation2 + $0x121] sm:$0xff]  ;;  %451 = vst.msk [vmem:[#allocation2 + $0x88] sm:$0x3] %vm435_vm1, %v3597_v1 }
  0x3a   : > { %3303 = vmatmul.msk.f32.vlgmr.msra.gmra.mxu3 %vm432_vm0, %v3790_v29  ;;  %454 = vst.msk [vmem:[#allocation2 + $0xa0] sm:$0x3] %vm435_vm1, %v3597_v1 }
  0x3b   : > { %v3801_v33 = vld [vmem:[#allocation2 + $0x69] sm:$0xff]  ;;  %457 = vst.msk [vmem:[#allocation2 + $0xb8] sm:$0x3] %vm435_vm1, %v3597_v1  ;;  %2520 = vmatpush.msra.mxu3 %v2408_v31 }
  0x3c   : > { %3288 = vmatmul.msk.f32.gmra.mxu1 %vm432_vm0, %v3801_v33  ;;  %460 = vst.msk [vmem:[#allocation2 + $0xd0] sm:$0x3] %vm435_vm1, %v3597_v1  ;;  %v555_v37 = vld [vmem:[#allocation2 + $0x9] sm:$0xff] }
  0x3d   : > { %463 = vst.msk [vmem:[#allocation2 + $0xe8] sm:$0x3] %vm435_vm1, %v3597_v1  ;;  %3280 = vmatmul.msk.f32.gmra.mxu0 %vm432_vm0, %v555_v37  ;;  %v352_v37 = vmul.f32 %v3656_v2, %v316_v23 }
  0x3e   : > { %466 = vst.msk [vmem:[#allocation2 + $0x100] sm:$0x3] %vm435_vm1, %v3597_v1 }
  0x3f   : > { %469 = vst.msk [vmem:[#allocation2 + $0x118] sm:$0x3] %vm435_vm1, %v3597_v1  ;;  %v388_v52 = vadd.f32 %v3673_v3, %v352_v37 }
  0x40   : > { %472 = vst.msk [vmem:[#allocation2 + $0x130] sm:$0x3] %vm435_vm1, %v3597_v1 }
  0x41   : > { %475 = vst.msk [vmem:[#allocation2 + $0x148] sm:$0x3] %vm435_vm1, %v3597_v1  ;;  %v420_v7 = vmax.f32 %v388_v52, 0.0  ;;  %v522_v52 = vld [vmem:[#allocation2 + $0x8] sm:$0xff] }
  0x42   : > { %478 = vst.msk [vmem:[#allocation2 + $0x160] sm:$0x3] %vm435_vm1, %v3597_v1 }
  0x43   : > { %481 = vst.msk [vmem:[#allocation2 + $0x178] sm:$0x3] %vm435_vm1, %v3597_v1 }
  0x44   : > { %484 = vst.msk [vmem:[#allocation2 + $0x190] sm:$0x3] %vm435_vm1, %v3597_v1 }
  0x45   : > { %487 = vst.msk [vmem:[#allocation2 + $0x1a8] sm:$0x3] %vm435_vm1, %v3597_v1  ;;  %v378_v1 = vadd.f32 %v3673_v3, %v342_v59  ;;  %v427_v59 = vmax.f32 %v395_v44, 0.0 }
  0x46   : > { %504 = vst.msk [vmem:[#allocation2 + $0xc9] sm:$0xff] %vm432_vm0, %v415_v53  ;;  %v345_v53 = vmul.f32 %v3656_v2, %v309_v49  ;;  %v521_v49 = vld [vmem:[#allocation2] sm:$0xff] }
  0x47   : > { %512 = vst.msk [vmem:[#allocation2 + $0x129] sm:$0xff] %vm432_vm0, %v423_v57  ;;  %v410_v30 = vmax.f32 %v378_v1, 0.0  ;;  %v300_v57 = vld [vmem:[%s3668_s10 + $0x20] sm:$0xff]  ;;  %v397_v1 = vadd.f32 %v3673_v3, %v361_v62 }
  0x48   : > { %497 = vst.msk [vmem:[#allocation2 + $0x79] sm:$0xff] %vm432_vm0, %v408_v61  ;;  %v336_v61 = vmul.f32 %v3656_v2, %v300_v57 }
  0x49   : > { %505 = vst.msk [vmem:[#allocation2 + $0xd9] sm:$0xff] %vm432_vm0, %v416_v4  ;;  %v381_v4 = vadd.f32 %v3673_v3, %v345_v53  ;;  %v429_v19 = vmax.f32 %v397_v1, 0.0  ;;  %v1006_v53 = vld [vmem:[#allocation2 + $0xa] sm:$0xff] }
  0x4a   : > { %513 = vst.msk [vmem:[#allocation2 + $0x139] sm:$0xff] %vm432_vm0, %v424_v8  ;;  %v389_v8 = vadd.f32 %v3673_v3, %v353_v54  ;;  %v372_v12 = vadd.f32 %v3673_v3, %v336_v61 }
  0x4b   : > { %498 = vst.msk [vmem:[#allocation2 + $0x81] sm:$0xff] %vm432_vm0, %v409_v13  ;;  %v428_v13 = vmax.f32 %v396_v60, 0.0  ;;  %v413_v14 = vmax.f32 %v381_v4, 0.0  ;;  %v4103_v4 = vld [vmem:[#allocation2 + $0x60] sm:$0xff] }
  0x4c   : > { %506 = vst.msk [vmem:[#allocation2 + $0xe1] sm:$0xff] %vm432_vm0, %v417_v16  ;;  %v421_v15 = vmax.f32 %v389_v8, 0.0  ;;  %v404_v16 = vmax.f32 %v372_v12, 0.0  ;;  %v4117_v8 = vld [vmem:[#allocation2 + $0x68] sm:$0xff] }
  0x4d   : > { %v3885_v38 = vld [vmem:[#allocation2 + $0xc9] sm:$0xff]  ;;  %489 = vst.msk [vmem:[#allocation2 + $0x19] sm:$0xff] %vm432_vm0, %v400_v20  ;;  %v337_v20 = vmul.f32 %v3656_v2, %v301_v17 }
  0x4e   : > { %3296 = vmatmul.msk.f32.gmra.mxu2 %vm432_vm0, %v3885_v38  ;;  %v3892_v42 = vld [vmem:[#allocation2 + $0x129] sm:$0xff]  ;;  %514 = vst.msk [vmem:[#allocation2 + $0x141] sm:$0xff] %vm432_vm0, %v425_v24 }
  0x4f   : > { %3304 = vmatmul.msk.f32.gmra.mxu3 %vm432_vm0, %v3892_v42  ;;  %v3899_v46 = vld [vmem:[#allocation2 + $0x79] sm:$0xff]  ;;  %499 = vst.msk [vmem:[#allocation2 + $0x91] sm:$0xff] %vm432_vm0, %v410_v30  ;;  %v373_v23 = vadd.f32 %v3673_v3, %v337_v20  ;;  %v2134_v30 = vld [vmem:[%s4926_s3 + $0x30] sm:$0xff] }
  0x50   : > { %3289 = vmatmul.msk.f32.gmra.mxu1 %vm432_vm0, %v3899_v46  ;;  %507 = vst.msk [vmem:[#allocation2 + $0xf1] sm:$0xff] %vm432_vm0, %v418_v35  ;;  %v3919_v63 = vld [vmem:[#allocation2 + $0xd9] sm:$0xff]  ;;  %2246 = vmatpush.msra.mxu2 %v2134_v30 }
  0x51   : > { %490 = vst.msk [vmem:[#allocation2 + $0x21] sm:$0xff] %vm432_vm0, %v401_v39  ;;  %v3923_v5 = vld [vmem:[#allocation2 + $0x139] sm:$0xff]  ;;  %v405_v2 = vmax.f32 %v373_v23, 0.0 }
  0x52   : > { %515 = vst.msk [vmem:[#allocation2 + $0x151] sm:$0xff] %vm432_vm0, %v426_v43  ;;  %v3929_v9 = vld [vmem:[#allocation2 + $0x81] sm:$0xff] }
  0x53   : > { %500 = vst.msk [vmem:[#allocation2 + $0x99] sm:$0xff] %vm432_vm0, %v411_v47  ;;  %v3951_v21 = vld [vmem:[#allocation2 + $0xe1] sm:$0xff] }
  0x54   : > { %v3925_v6 = vld [vmem:[#allocation2 + $0x19] sm:$0xff]  ;;  %508 = vst.msk [vmem:[#allocation2 + $0xf9] sm:$0xff] %vm432_vm0, %v419_v51  ;;  %v4189_v32 = vld [vmem:[#allocation2 + $0x82] sm:$0xff] }
  0x55   : > { %3281 = vmatmul.msk.f32.gmra.mxu0 %vm432_vm0, %v3925_v6  ;;  %491 = vst.msk [vmem:[#allocation2 + $0x31] sm:$0xff] %vm432_vm0, %v402_v55  ;;  %v3954_v22 = vld [vmem:[#allocation2 + $0x141] sm:$0xff]  ;;  %v1279_v51 = vld [vmem:[#allocation2 + $0x18] sm:$0xff] }
  0x56   : > { %3297 = vmatmul.msk.f32.gmra.mxu2 %vm432_vm0, %v3919_v63  ;;  %516 = vst.msk [vmem:[#allocation2 + $0x159] sm:$0xff] %vm432_vm0, %v427_v59  ;;  %v3958_v24 = vld [vmem:[#allocation2 + $0x91] sm:$0xff]  ;;  %v2682_v39 = vld [vmem:[%s4926_s3 + $0x40] sm:$0xff] }
  0x57   : > { %3305 = vmatmul.msk.f32.gmra.mxu3 %vm432_vm0, %v3923_v5  ;;  %501 = vst.msk [vmem:[#allocation2 + $0xa9] sm:$0xff] %vm432_vm0, %v412_v0  ;;  %v3973_v25 = vld [vmem:[#allocation2 + $0xf1] sm:$0xff]  ;;  %2794 = vmatpush.msra.mxu0 %v2682_v39  ;;  %v4169_v20 = vld [vmem:[#allocation2 + $0x7a] sm:$0xff] }
  0x58   : > { %3290 = vmatmul.msk.f32.gmra.mxu1 %vm432_vm0, %v3929_v9  ;;  %509 = vst.msk [vmem:[#allocation2 + $0x109] sm:$0xff] %vm432_vm0, %v420_v7  ;;  %v3947_v18 = vld [vmem:[#allocation2 + $0x21] sm:$0xff]  ;;  %v4171_v23 = vld [vmem:[#allocation2 + $0x90] sm:$0xff] }
  0x59   : > { %492 = vst.msk [vmem:[#allocation2 + $0x39] sm:$0xff] %vm432_vm0, %v403_v10  ;;  %v3975_v26 = vld [vmem:[#allocation2 + $0x151] sm:$0xff]  ;;  %v1280_v54 = vld [vmem:[#allocation2 + $0x20] sm:$0xff] }
  0x5a   : > { %517 = vst.msk [vmem:[#allocation2 + $0x169] sm:$0xff] %vm432_vm0, %v428_v13  ;;  %v3977_v28 = vld [vmem:[#allocation2 + $0x99] sm:$0xff]  ;;  %v4065_v57 = vld [vmem:[#allocation2 + $0x22] sm:$0xff] }
  0x5b   : > { %502 = vst.msk [vmem:[#allocation2 + $0xb1] sm:$0xff] %vm432_vm0, %v413_v14  ;;  %v3998_v35 = vld [vmem:[#allocation2 + $0xf9] sm:$0xff]  ;;  %v4129_v10 = vld [vmem:[#allocation2 + $0x62] sm:$0xff] }
  0x5c   : > { %510 = vst.msk [vmem:[#allocation2 + $0x111] sm:$0xff] %vm432_vm0, %v421_v15  ;;  %v3971_v3 = vld [vmem:[#allocation2 + $0x31] sm:$0xff]  ;;  %v4054_v55 = vld [vmem:[#allocation2 + $0x1a] sm:$0xff] }
  0x5d   : > { %3282 = vmatmul.msk.f32.gmra.mxu0 %vm432_vm0, %v3947_v18  ;;  %493 = vst.msk [vmem:[#allocation2 + $0x49] sm:$0xff] %vm432_vm0, %v404_v16  ;;  %v4000_v36 = vld [vmem:[#allocation2 + $0x159] sm:$0xff]  ;;  %v4056_v56 = vld [vmem:[#allocation2 + $0x30] sm:$0xff] }
  0x5e   : > { %3298 = vmatmul.msk.f32.gmra.mxu2 %vm432_vm0, %v3951_v21  ;;  %518 = vst.msk [vmem:[#allocation2 + $0x171] sm:$0xff] %vm432_vm0, %v429_v19  ;;  %v4002_v37 = vld [vmem:[#allocation2 + $0xa9] sm:$0xff]  ;;  %v4133_v13 = vld [vmem:[#allocation2 + $0x78] sm:$0xff]  ;;  %v4151_v16 = vld [vmem:[#allocation2 + $0x80] sm:$0xff] }
  0x5f   : > { %3306 = vmatmul.msk.f32.gmra.mxu3 %vm432_vm0, %v3954_v22  ;;  %494 = vst.msk [vmem:[#allocation2 + $0x51] sm:$0xff] %vm432_vm0, %v405_v2  ;;  %v4017_v41 = vld [vmem:[#allocation2 + $0x109] sm:$0xff]  ;;  %v4191_v39 = vld [vmem:[#allocation2 + $0x98] sm:$0xff] }
  0x60   : > { %3291 = vmatmul.msk.f32.gmra.mxu1 %vm432_vm0, %v3958_v24  ;;  %v3996_v34 = vld [vmem:[#allocation2 + $0x39] sm:$0xff]  ;;  %4957 = vst [vmem:[#allocation3_spill] sm:$0xff] %v4117_v8  ;;  %v4149_v15 = vld [vmem:[#allocation2 + $0x6a] sm:$0xff] }
  0x61   : > { %v4019_v43 = vld [vmem:[#allocation2 + $0x169] sm:$0xff]  ;;  %v4067_v58 = vld [vmem:[#allocation2 + $0x38] sm:$0xff]  ;;  %4958 = vst [vmem:[#allocation4_spill] sm:$0xff] %v4133_v13 }
  0x62   : > { %v4021_v44 = vld [vmem:[#allocation2 + $0xb1] sm:$0xff]  ;;  %v4089_v61 = vld [vmem:[#allocation2 + $0x3a] sm:$0xff]  ;;  %4960 = vst [vmem:[#allocation6_spill] sm:$0xff] %v4149_v15 }
  0x63   : > { %v4033_v47 = vld [vmem:[#allocation2 + $0x111] sm:$0xff]  ;;  %4961 = vst [vmem:[#allocation7_spill] sm:$0xff] %v4151_v16 }
  0x64   : > { %v4015_v40 = vld [vmem:[#allocation2 + $0x49] sm:$0xff]  ;;  %v4077_v59 = vld [vmem:[#allocation2 + $0x32] sm:$0xff]  ;;  %4963 = vst [vmem:[#allocation9_spill] sm:$0xff] %v4169_v20 }
  0x65   : > { %3283 = vmatmul.msk.f32.gmra.mxu0 %vm432_vm0, %v3971_v3  ;;  %v4035_v48 = vld [vmem:[#allocation2 + $0x171] sm:$0xff]  ;;  %v4079_v60 = vld [vmem:[#allocation2 + $0x48] sm:$0xff]  ;;  %4964 = vst [vmem:[#allocation10_spill] sm:$0xff] %v4171_v23 }
  0x66   : > { %3299 = vmatmul.msk.f32.gmra.mxu2 %vm432_vm0, %v3973_v25  ;;  %v4031_v45 = vld [vmem:[#allocation2 + $0x51] sm:$0xff]  ;;  %4966 = vst [vmem:[#allocation12_spill] sm:$0xff] %v4189_v32 }
  0x67   : > { %3307 = vmatmul.msk.f32.gmra.mxu3 %vm432_vm0, %v3975_v26  ;;  %v4091_v62 = vld [vmem:[#allocation2 + $0x50] sm:$0xff]  ;;  %4967 = vst [vmem:[#allocation13_spill] sm:$0xff] %v4191_v39 }
  0x68   : > { %3292 = vmatmul.msk.f32.gmra.mxu1 %vm432_vm0, %v3977_v28  ;;  %v4101_v0 = vld [vmem:[#allocation2 + $0x4a] sm:$0xff]  ;;  %v4115_v7 = vld [vmem:[#allocation2 + $0x52] sm:$0xff] }
  0x6d   : > { %3284 = vmatmul.msk.f32.gmra.mxu0 %vm432_vm0, %v3996_v34 }
  0x6e   : > { %3300 = vmatmul.msk.f32.gmra.mxu2 %vm432_vm0, %v3998_v35 }
  0x6f   : > { %3308 = vmatmul.msk.f32.gmra.mxu3 %vm432_vm0, %v4000_v36 }
  0x70   : > { %3293 = vmatmul.msk.f32.gmra.mxu1 %vm432_vm0, %v4002_v37 }
  0x75   : > { %3285 = vmatmul.msk.f32.gmra.mxu0 %vm432_vm0, %v4015_v40 }
  0x76   : > { %3301 = vmatmul.msk.f32.gmra.mxu2 %vm432_vm0, %v4017_v41 }
  0x77   : > { %3309 = vmatmul.msk.f32.gmra.mxu3 %vm432_vm0, %v4019_v43 }
  0x78   : > { %3294 = vmatmul.msk.f32.gmra.mxu1 %vm432_vm0, %v4021_v44 }
  0x7d   : > { %3286 = vmatmul.msk.f32.gmra.mxu0 %vm432_vm0, %v4031_v45 }
  0x7e   : > { %3302 = vmatmul.msk.f32.gmra.mxu2 %vm432_vm0, %v4033_v47 }
  0x7f   : > { %3310 = vmatmul.msk.f32.gmra.mxu3 %vm432_vm0, %v4035_v48 }
  0x80   : > { %3311 = vmatmul.msk.f32.vlgmr.msrb.gmra.mxu1 %vm432_vm0, %v521_v49 }
  0x85   : > { %3407 = vmatmul.msk.f32.vlgmr.msrb.gmra.mxu0 %vm432_vm0, %v3925_v6 }
  0x86   : > { %3343 = vmatmul.msk.f32.vlgmr.msrb.gmra.mxu2 %vm432_vm0, %v1005_v50 }
  0x87   : > { %3375 = vmatmul.msk.f32.vlgmr.msrb.gmra.mxu3 %vm432_vm0, %v1279_v51 }
  0x88   : > { %3312 = vmatmul.msk.f32.gmra.mxu1 %vm432_vm0, %v522_v52  ;;  %v4209_v52 = vld [vmem:[#allocation2 + $0x92] sm:$0xff] }
  0x89   : > { %4969 = vst [vmem:[#allocation15_spill] sm:$0xff] %v4209_v52 }
  0x8d   : > { %3408 = vmatmul.msk.f32.gmra.mxu0 %vm432_vm0, %v3947_v18 }
  0x8e   : > { %3344 = vmatmul.msk.f32.gmra.mxu2 %vm432_vm0, %v1006_v53  ;;  %v4211_v53 = vld [vmem:[#allocation2 + $0xa8] sm:$0xff] }
  0x8f   : > { %3376 = vmatmul.msk.f32.gmra.mxu3 %vm432_vm0, %v1280_v54  ;;  %4970 = vst [vmem:[#allocation16_spill] sm:$0xff] %v4211_v53 }
  0x90   : > { %3313 = vmatmul.msk.f32.gmra.mxu1 %vm432_vm0, %v1279_v51 }
  0x95   : > { %3409 = vmatmul.msk.f32.gmra.mxu0 %vm432_vm0, %v3971_v3 }
  0x96   : > { %3345 = vmatmul.msk.f32.gmra.mxu2 %vm432_vm0, %v4054_v55 }
  0x97   : > { %3377 = vmatmul.msk.f32.gmra.mxu3 %vm432_vm0, %v4056_v56 }
  0x98   : > { %3314 = vmatmul.msk.f32.gmra.mxu1 %vm432_vm0, %v1280_v54 }
  0x9c   : > { %v4113_v6 = vpop.f32.mrf.mxu1 }
  0x9d   : > { %3410 = vmatmul.msk.f32.gmra.mxu0 %vm432_vm0, %v3996_v34 }
  0x9e   : > { %3346 = vmatmul.msk.f32.gmra.mxu2 %vm432_vm0, %v4065_v57 }
  0x9f   : > { %3378 = vmatmul.msk.f32.gmra.mxu3 %vm432_vm0, %v4067_v58 }
  0xa0   : > { %3315 = vmatmul.msk.f32.gmra.mxu1 %vm432_vm0, %v4056_v56 }
  0xa5   : > { %3411 = vmatmul.msk.f32.gmra.mxu0 %vm432_vm0, %v4015_v40 }
  0xa6   : > { %3347 = vmatmul.msk.f32.gmra.mxu2 %vm432_vm0, %v4077_v59 }
  0xa7   : > { %3379 = vmatmul.msk.f32.gmra.mxu3 %vm432_vm0, %v4079_v60 }
  0xa8   : > { %3316 = vmatmul.msk.f32.gmra.mxu1 %vm432_vm0, %v4067_v58 }
  0xad   : > { %3412 = vmatmul.msk.f32.gmra.mxu0 %vm432_vm0, %v4031_v45 }
  0xae   : > { %3348 = vmatmul.msk.f32.gmra.mxu2 %vm432_vm0, %v4089_v61 }
  0xaf   : > { %3380 = vmatmul.msk.f32.gmra.mxu3 %vm432_vm0, %v4091_v62 }
  0xb0   : > { %3317 = vmatmul.msk.f32.gmra.mxu1 %vm432_vm0, %v4079_v60 }
  0xb5   : > { %3413 = vmatmul.msk.f32.gmra.mxu0 %vm432_vm0, %v3716_v11  ;;  %v4123_v11 = vpop.f32.mrf.mxu0 }
  0xb6   : > { %3349 = vmatmul.msk.f32.gmra.mxu2 %vm432_vm0, %v4101_v0 }
  0xb7   : > { %3381 = vmatmul.msk.f32.gmra.mxu3 %vm432_vm0, %v4103_v4 }
  0xb8   : > { %3318 = vmatmul.msk.f32.gmra.mxu1 %vm432_vm0, %v4091_v62 }
  0xb9   : > { %v4131_v12 = vpop.f32.mrf.mxu1 }
  0xbd   : > { %3414 = vmatmul.msk.f32.gmra.mxu0 %vm432_vm0, %v3801_v33  ;;  %v4141_v33 = vpop.f32.mrf.mxu2  ;;  %v4143_v1 = vpop.f32.mrf.mxu3 }
  0xbe   : > { %3350 = vmatmul.msk.f32.gmra.mxu2 %vm432_vm0, %v4115_v7  ;;  %4959 = vst [vmem:[#allocation5_spill] sm:$0xff] %v4143_v1  ;;  %v4147_v14 = vpop.f32.mrf.mxu0  ;;  %v4231_v1 = vld [vmem:[#allocation2 + $0xb0] sm:$0xff] }
  0xbf   : > { %3382 = vmatmul.msk.f32.gmra.mxu3 %vm432_vm0, %v4117_v8  ;;  %4974 = vst [vmem:[#allocation20_spill] sm:$0xff] %v4231_v1 }
  0xc0   : > { %3319 = vmatmul.msk.f32.gmra.mxu1 %vm432_vm0, %v4103_v4 }
  0xc5   : > { %3415 = vmatmul.msk.f32.gmra.mxu0 %vm432_vm0, %v3899_v46 }
  0xc6   : > { %3351 = vmatmul.msk.f32.gmra.mxu2 %vm432_vm0, %v4129_v10 }
  0xc7   : > { %3383 = vmatmul.msk.f32.gmra.mxu3 %vm432_vm0, %v4133_v13 }
  0xc8   : > { %3320 = vmatmul.msk.f32.gmra.mxu1 %vm432_vm0, %v4117_v8  ;;  %v4298_v8 = vld [vmem:[#allocation2 + $0xca] sm:$0xff] }
  0xcd   : > { %v4153_v46 = vpop.f32.mrf.mxu1  ;;  %3416 = vmatmul.msk.f32.gmra.mxu0 %vm432_vm0, %v3929_v9 }
  0xce   : > { %3352 = vmatmul.msk.f32.gmra.mxu2 %vm432_vm0, %v4149_v15 }
  0xcf   : > { %3384 = vmatmul.msk.f32.gmra.mxu3 %vm432_vm0, %v4151_v16 }
  0xd0   : > { %3321 = vmatmul.msk.f32.gmra.mxu1 %vm432_vm0, %v4133_v13  ;;  %v4271_v13 = vld [vmem:[#allocation2 + $0xc8] sm:$0xff] }
  0xd1   : > { %v4163_v17 = vpop.f32.mrf.mxu2 }
  0xd2   : > { %v4165_v18 = vpop.f32.mrf.mxu3  ;;  %v4167_v19 = vpop.f32.mrf.mxu0 }
  0xd3   : > { %4962 = vst [vmem:[#allocation8_spill] sm:$0xff] %v4165_v18  ;;  %v4229_v18 = vld [vmem:[#allocation2 + $0x9a] sm:$0xff] }
  0xd4   : > { %4973 = vst [vmem:[#allocation19_spill] sm:$0xff] %v4229_v18 }
  0xd5   : > { %v4173_v9 = vpop.f32.mrf.mxu1  ;;  %3417 = vmatmul.msk.f32.gmra.mxu0 %vm432_vm0, %v3958_v24 }
  0xd6   : > { %3353 = vmatmul.msk.f32.gmra.mxu2 %vm432_vm0, %v4169_v20  ;;  %v4287_v20 = vld [vmem:[#allocation2 + $0xd8] sm:$0xff] }
  0xd7   : > { %3385 = vmatmul.msk.f32.gmra.mxu3 %vm432_vm0, %v4171_v23 }
  0xd8   : > { %3322 = vmatmul.msk.f32.gmra.mxu1 %vm432_vm0, %v4151_v16  ;;  %v4251_v16 = vld [vmem:[#allocation2 + $0xc0] sm:$0xff] }
  0xd9   : > { %v4183_v2 = vpop.f32.mrf.mxu2  ;;  %4978 = vst [vmem:[#allocation24_spill] sm:$0xff] %v4251_v16 }
  0xda   : > { %v4185_v30 = vpop.f32.mrf.mxu3  ;;  %v4187_v31 = vpop.f32.mrf.mxu0 }
  0xdb   : > { %4965 = vst [vmem:[#allocation11_spill] sm:$0xff] %v4185_v30 }
  0xdd   : > { %v4193_v24 = vpop.f32.mrf.mxu1  ;;  %3418 = vmatmul.msk.f32.gmra.mxu0 %vm432_vm0, %v3977_v28 }
  0xde   : > { %3354 = vmatmul.msk.f32.gmra.mxu2 %vm432_vm0, %v4189_v32  ;;  %v4269_v32 = vld [vmem:[#allocation2 + $0xb2] sm:$0xff] }
  0xdf   : > { %3386 = vmatmul.msk.f32.gmra.mxu3 %vm432_vm0, %v4191_v39  ;;  %4981 = vst [vmem:[#allocation27_spill] sm:$0xff] %v4269_v32 }
  0xe0   : > { %3323 = vmatmul.msk.f32.gmra.mxu1 %vm432_vm0, %v4171_v23 }
  0xe1   : > { %v4203_v49 = vpop.f32.mrf.mxu2 }
  0xe2   : > { %v4205_v50 = vpop.f32.mrf.mxu3  ;;  %v4207_v51 = vpop.f32.mrf.mxu0 }
  0xe3   : > { %4968 = vst [vmem:[#allocation14_spill] sm:$0xff] %v4205_v50 }
  0xe5   : > { %v4213_v28 = vpop.f32.mrf.mxu1  ;;  %3419 = vmatmul.msk.f32.gmra.mxu0 %vm432_vm0, %v4002_v37 }
  0xe6   : > { %3355 = vmatmul.msk.f32.gmra.mxu2 %vm432_vm0, %v4209_v52  ;;  %v4249_v52 = vld [vmem:[#allocation2 + $0xaa] sm:$0xff] }
  0xe7   : > { %3387 = vmatmul.msk.f32.gmra.mxu3 %vm432_vm0, %v4211_v53  ;;  %4977 = vst [vmem:[#allocation23_spill] sm:$0xff] %v4249_v52 }
  0xe8   : > { %3324 = vmatmul.msk.f32.gmra.mxu1 %vm432_vm0, %v4191_v39 }
  0xe9   : > { %v4223_v54 = vpop.f32.mrf.mxu2 }
  0xea   : > { %4971 = vst [vmem:[#allocation17_spill] sm:$0xff] %v4223_v54  ;;  %v4225_v50 = vpop.f32.mrf.mxu3  ;;  %v4227_v30 = vpop.f32.mrf.mxu0  ;;  %v4300_v54 = vld [vmem:[#allocation2 + $0xe0] sm:$0xff] }
  0xeb   : > { %4972 = vst [vmem:[#allocation18_spill] sm:$0xff] %v4225_v50 }
  0xed   : > { %v4233_v37 = vpop.f32.mrf.mxu1  ;;  %3420 = vmatmul.msk.f32.gmra.mxu0 %vm432_vm0, %v4021_v44 }
  0xee   : > { %3356 = vmatmul.msk.f32.gmra.mxu2 %vm432_vm0, %v4229_v18 }
  0xef   : > { %3388 = vmatmul.msk.f32.gmra.mxu3 %vm432_vm0, %v4231_v1 }
  0xf0   : > { %3325 = vmatmul.msk.f32.gmra.mxu1 %vm432_vm0, %v4211_v53 }
  0xf1   : > { %v4243_v50 = vpop.f32.mrf.mxu2 }
  0xf2   : > { %4975 = vst [vmem:[#allocation21_spill] sm:$0xff] %v4243_v50  ;;  %v4245_v39 = vpop.f32.mrf.mxu3  ;;  %v4247_v23 = vpop.f32.mrf.mxu0 }
  0xf3   : > { %4976 = vst [vmem:[#allocation22_spill] sm:$0xff] %v4245_v39 }
  0xf5   : > { %v4253_v44 = vpop.f32.mrf.mxu1  ;;  %3421 = vmatmul.msk.f32.gmra.mxu0 %vm432_vm0, %v3783_v27 }
  0xf6   : > { %3357 = vmatmul.msk.f32.gmra.mxu2 %vm432_vm0, %v4249_v52 }
  0xf7   : > { %3389 = vmatmul.msk.f32.gmra.mxu3 %vm432_vm0, %v4251_v16 }
  0xf8   : > { %3326 = vmatmul.msk.f32.gmra.mxu1 %vm432_vm0, %v4231_v1 }
  0xf9   : > { %v4263_v39 = vpop.f32.mrf.mxu2 }
  0xfa   : > { %4979 = vst [vmem:[#allocation25_spill] sm:$0xff] %v4263_v39  ;;  %v4265_v53 = vpop.f32.mrf.mxu3  ;;  %v4267_v18 = vpop.f32.mrf.mxu0  ;;  %v4285_v39 = vld [vmem:[#allocation2 + $0xc2] sm:$0xff] }
  0xfb   : > { %4980 = vst [vmem:[#allocation26_spill] sm:$0xff] %v4265_v53 }
  0xfc   : > { %4984 = vst [vmem:[#allocation30_spill] sm:$0xff] %v4285_v39 }
  0xfd   : > { %v909_v27 = vpop.f32.mrf.mxu1  ;;  %3422 = vmatmul.msk.f32.gmra.mxu0 %vm432_vm0, %v3885_v38 }
  0xfe   : > { %3358 = vmatmul.msk.f32.gmra.mxu2 %vm432_vm0, %v4269_v32  ;;  %v910_v38 = vadd.f32 %v909_v27, %v4123_v11 }
  0xff   : > { %3390 = vmatmul.msk.f32.gmra.mxu3 %vm432_vm0, %v4271_v13 }
 0x100   : > { %3327 = vmatmul.msk.f32.gmra.mxu1 %vm432_vm0, %v4251_v16 }
 0x101   : > { %v4281_v53 = vpop.f32.mrf.mxu2 }
 0x102   : > { %4982 = vst [vmem:[#allocation28_spill] sm:$0xff] %v4281_v53  ;;  %v4283_v1 = vpop.f32.mrf.mxu3  ;;  %v1699_v52 = vpop.f32.mrf.mxu0 }
 0x103   : > { %4983 = vst [vmem:[#allocation29_spill] sm:$0xff] %v4283_v1 }
 0x105   : > { %v912_v50 = vpop.f32.mrf.mxu1  ;;  %3423 = vmatmul.msk.f32.gmra.mxu0 %vm432_vm0, %v3919_v63 }
 0x106   : > { %3359 = vmatmul.msk.f32.gmra.mxu2 %vm432_vm0, %v4285_v39  ;;  %v913_v11 = vadd.f32 %v912_v50, %v4147_v14 }
 0x107   : > { %3391 = vmatmul.msk.f32.gmra.mxu3 %vm432_vm0, %v4287_v20 }
 0x108   : > { %3328 = vmatmul.msk.f32.gmra.mxu1 %vm432_vm0, %v4271_v13 }
 0x109   : > { %v1151_v1 = vpop.f32.mrf.mxu2 }
 0x10a   : > { %v1247_v16 = vadd.f32 %v1151_v1, %v910_v38  ;;  %v1425_v32 = vpop.f32.mrf.mxu3  ;;  %v1702_v53 = vpop.f32.mrf.mxu0  ;;  %v4313_v38 = vld [vmem:[#allocation2 + $0xda] sm:$0xff] }
 0x10c   : > { %v1521_v15 = vadd.f32 %v1425_v32, %v1247_v16 }
 0x10d   : > { %v915_v63 = vpop.f32.mrf.mxu1  ;;  %3424 = vmatmul.msk.f32.gmra.mxu0 %vm432_vm0, %v3951_v21 }
 0x10e   : > { %v4304_v39 = vadd.f32 %v1699_v52, %v1521_v15  ;;  %3360 = vmatmul.msk.f32.gmra.mxu2 %vm432_vm0, %v4298_v8  ;;  %v4315_v15 = vld [vmem:[#allocation2 + $0xf0] sm:$0xff]  ;;  %v916_v14 = vadd.f32 %v915_v63, %v4167_v19 }
 0x10f   : > { %3392 = vmatmul.msk.f32.gmra.mxu3 %vm432_vm0, %v4300_v54 }
 0x110   : > { %4985 = vst [vmem:[#allocation31_spill] sm:$0xff] %v4304_v39  ;;  %3329 = vmatmul.msk.f32.gmra.mxu1 %vm432_vm0, %v4287_v20 }
 0x111   : > { %v1154_v1 = vpop.f32.mrf.mxu2 }
 0x112   : > { %v1248_v16 = vadd.f32 %v1154_v1, %v913_v11  ;;  %v1428_v32 = vpop.f32.mrf.mxu3  ;;  %v1705_v27 = vpop.f32.mrf.mxu0 }
 0x114   : > { %v1522_v21 = vadd.f32 %v1428_v32, %v1248_v16  ;;  %v4328_v32 = vld [vmem:[#allocation2 + $0xe2] sm:$0xff] }
 0x115   : > { %v918_v52 = vpop.f32.mrf.mxu1  ;;  %3425 = vmatmul.msk.f32.gmra.mxu0 %vm432_vm0, %v3973_v25 }
 0x116   : > { %v4319_v39 = vadd.f32 %v1702_v53, %v1522_v21  ;;  %3361 = vmatmul.msk.f32.gmra.mxu2 %vm432_vm0, %v4313_v38  ;;  %v4330_v53 = vld [vmem:[#allocation2 + $0xf8] sm:$0xff]  ;;  %v919_v19 = vadd.f32 %v918_v52, %v4187_v31 }
 0x117   : > { %3393 = vmatmul.msk.f32.gmra.mxu3 %vm432_vm0, %v4315_v15 }
 0x118   : > { %4986 = vst [vmem:[#allocation32_spill] sm:$0xff] %v4319_v39  ;;  %3330 = vmatmul.msk.f32.gmra.mxu1 %vm432_vm0, %v4300_v54 }
 0x119   : > { %v1157_v50 = vpop.f32.mrf.mxu2 }
 0x11a   : > { %v1249_v11 = vadd.f32 %v1157_v50, %v916_v14  ;;  %v1431_v1 = vpop.f32.mrf.mxu3  ;;  %v1708_v16 = vpop.f32.mrf.mxu0 }
 0x11c   : > { %v1523_v25 = vadd.f32 %v1431_v1, %v1249_v11  ;;  %v4343_v1 = vld [vmem:[#allocation2 + $0xf2] sm:$0xff] }
 0x11d   : > { %v921_v21 = vpop.f32.mrf.mxu1  ;;  %3426 = vmatmul.msk.f32.gmra.mxu0 %vm432_vm0, %v3998_v35 }
 0x11e   : > { %v4334_v39 = vadd.f32 %v1705_v27, %v1523_v25  ;;  %3362 = vmatmul.msk.f32.gmra.mxu2 %vm432_vm0, %v4328_v32  ;;  %v4345_v27 = vld [vmem:[#allocation2 + $0x108] sm:$0xff]  ;;  %v922_v31 = vadd.f32 %v921_v21, %v4207_v51 }
 0x11f   : > { %3394 = vmatmul.msk.f32.gmra.mxu3 %vm432_vm0, %v4330_v53  ;;  %4988 = vst [vmem:[#allocation34_spill] sm:$0xff] %v4345_v27 }
 0x120   : > { %4987 = vst [vmem:[#allocation33_spill] sm:$0xff] %v4334_v39  ;;  %3331 = vmatmul.msk.f32.gmra.mxu1 %vm432_vm0, %v4315_v15 }
 0x121   : > { %v1160_v63 = vpop.f32.mrf.mxu2 }
 0x122   : > { %v1250_v14 = vadd.f32 %v1160_v63, %v919_v19  ;;  %v1434_v50 = vpop.f32.mrf.mxu3  ;;  %v1711_v11 = vpop.f32.mrf.mxu0 }
 0x124   : > { %v1524_v35 = vadd.f32 %v1434_v50, %v1250_v14  ;;  %v4358_v50 = vld [vmem:[#allocation2 + $0xfa] sm:$0xff] }
 0x125   : > { %v924_v25 = vpop.f32.mrf.mxu1  ;;  %3427 = vmatmul.msk.f32.gmra.mxu0 %vm432_vm0, %v4017_v41 }
 0x126   : > { %v4349_v39 = vadd.f32 %v1708_v16, %v1524_v35  ;;  %3363 = vmatmul.msk.f32.gmra.mxu2 %vm432_vm0, %v4343_v1  ;;  %v4360_v16 = vld [vmem:[#allocation2 + $0x110] sm:$0xff]  ;;  %v925_v51 = vadd.f32 %v924_v25, %v4227_v30 }
 0x127   : > { %3395 = vmatmul.msk.f32.gmra.mxu3 %vm432_vm0, %v4345_v27  ;;  %4990 = vst [vmem:[#allocation36_spill] sm:$0xff] %v4360_v16 }
 0x128   : > { %4989 = vst [vmem:[#allocation35_spill] sm:$0xff] %v4349_v39  ;;  %3332 = vmatmul.msk.f32.gmra.mxu1 %vm432_vm0, %v4330_v53 }
 0x129   : > { %v1163_v52 = vpop.f32.mrf.mxu2 }
 0x12a   : > { %v1251_v19 = vadd.f32 %v1163_v52, %v922_v31  ;;  %v1437_v63 = vpop.f32.mrf.mxu3  ;;  %v1714_v14 = vpop.f32.mrf.mxu0 }
 0x12c   : > { %v1525_v41 = vadd.f32 %v1437_v63, %v1251_v19  ;;  %v4373_v63 = vld [vmem:[#allocation2 + $0x10a] sm:$0xff] }
 0x12d   : > { %v927_v35 = vpop.f32.mrf.mxu1  ;;  %3428 = vmatmul.msk.f32.gmra.mxu0 %vm432_vm0, %v4033_v47 }
 0x12e   : > { %v4364_v39 = vadd.f32 %v1711_v11, %v1525_v41  ;;  %3364 = vmatmul.msk.f32.gmra.mxu2 %vm432_vm0, %v4358_v50  ;;  %v1301_v11 = vld [vmem:[#allocation2 + $0x120] sm:$0xff]  ;;  %v928_v30 = vadd.f32 %v927_v35, %v4247_v23 }
 0x12f   : > { %3396 = vmatmul.msk.f32.gmra.mxu3 %vm432_vm0, %v4360_v16 }
 0x130   : > { %4991 = vst [vmem:[#allocation37_spill] sm:$0xff] %v4364_v39  ;;  %3333 = vmatmul.msk.f32.gmra.mxu1 %vm432_vm0, %v4345_v27 }
 0x131   : > { %v1166_v21 = vpop.f32.mrf.mxu2 }
 0x132   : > { %v1252_v31 = vadd.f32 %v1166_v21, %v925_v51  ;;  %v1440_v52 = vpop.f32.mrf.mxu3  ;;  %v1717_v19 = vpop.f32.mrf.mxu0 }
 0x134   : > { %v1526_v47 = vadd.f32 %v1440_v52, %v1252_v31  ;;  %v4385_v52 = vld [vmem:[#allocation2 + $0x112] sm:$0xff] }
 0x135   : > { %v930_v41 = vpop.f32.mrf.mxu1  ;;  %3429 = vmatmul.msk.f32.gmra.mxu0 %vm432_vm0, %v3790_v29  ;;  %v1302_v29 = vld [vmem:[#allocation2 + $0x128] sm:$0xff] }
 0x136   : > { %v4377_v39 = vadd.f32 %v1714_v14, %v1526_v47  ;;  %3365 = vmatmul.msk.f32.gmra.mxu2 %vm432_vm0, %v4373_v63  ;;  %v931_v23 = vadd.f32 %v930_v41, %v4267_v18 }
 0x137   : > { %3397 = vmatmul.msk.f32.gmra.mxu3 %vm432_vm0, %v1301_v11 }
 0x138   : > { %4992 = vst [vmem:[#allocation38_spill] sm:$0xff] %v4377_v39  ;;  %3334 = vmatmul.msk.f32.gmra.mxu1 %vm432_vm0, %v4360_v16  ;;  %v1303_v16 = vld [vmem:[#allocation2 + $0x138] sm:$0xff] }
 0x139   : > { %v1169_v25 = vpop.f32.mrf.mxu2 }
 0x13a   : > { %v1253_v51 = vadd.f32 %v1169_v25, %v928_v30  ;;  %v1443_v21 = vpop.f32.mrf.mxu3  ;;  %v1720_v31 = vpop.f32.mrf.mxu0 }
 0x13c   : > { %v1527_v27 = vadd.f32 %v1443_v21, %v1253_v51  ;;  %v1029_v21 = vld [vmem:[#allocation2 + $0x122] sm:$0xff] }
 0x13d   : > { %v933_v14 = vpop.f32.mrf.mxu1  ;;  %3430 = vmatmul.msk.f32.gmra.mxu0 %vm432_vm0, %v3892_v42 }
 0x13e   : > { %v4389_v47 = vadd.f32 %v1717_v19, %v1527_v27  ;;  %3366 = vmatmul.msk.f32.gmra.mxu2 %vm432_vm0, %v4385_v52  ;;  %v934_v18 = vadd.f32 %v933_v14, %v4113_v6  ;;  %v3587_v6 = vld [vmem:[%s4925_s2] ss:$0 sm:$0xff] }
 0x13f   : > { %3398 = vmatmul.msk.f32.gmra.mxu3 %vm432_vm0, %v1302_v29 }
 0x140   : > { %4993 = vst [vmem:[#allocation39_spill] sm:$0xff] %v4389_v47  ;;  %3335 = vmatmul.msk.f32.gmra.mxu1 %vm432_vm0, %v1301_v11  ;;  %v326_v11 = vld [vmem:[%s3668_s10 + $0xf0] sm:$0xff] }
 0x141   : > { %v1172_v35 = vpop.f32.mrf.mxu2 }
 0x142   : > { %v1254_v30 = vadd.f32 %v1172_v35, %v931_v23  ;;  %v1446_v25 = vpop.f32.mrf.mxu3  ;;  %v1723_v51 = vpop.f32.mrf.mxu0 }
 0x144   : > { %v1528_v39 = vadd.f32 %v1446_v25, %v1254_v30  ;;  %v3586_v30 = vld [vmem:[%s4924_s1] ss:$0 sm:$0xff] }
 0x145   : > { %v936_v42 = vpop.f32.mrf.mxu1  ;;  %3431 = vmatmul.msk.f32.gmra.mxu0 %vm432_vm0, %v3923_v5  ;;  %v362_v5 = vmul.f32 %v3586_v30, %v326_v11  ;;  %v1304_v25 = vld [vmem:[#allocation2 + $0x140] sm:$0xff] }
 0x146   : > { %v4398_v27 = vadd.f32 %v1720_v31, %v1528_v39  ;;  %3367 = vmatmul.msk.f32.gmra.mxu2 %vm432_vm0, %v1029_v21  ;;  %v1030_v39 = vld [vmem:[#allocation2 + $0x12a] sm:$0xff] }
 0x147   : > { %3399 = vmatmul.msk.f32.gmra.mxu3 %vm432_vm0, %v1303_v16  ;;  %v398_v14 = vadd.f32 %v3587_v6, %v362_v5 }
 0x148   : > { %4994 = vst [vmem:[#allocation40_spill] sm:$0xff] %v4398_v27  ;;  %3336 = vmatmul.msk.f32.gmra.mxu1 %vm432_vm0, %v1302_v29 }
 0x149   : > { %v1175_v19 = vpop.f32.mrf.mxu2 }
 0x14a   : > { %v1255_v41 = vadd.f32 %v1175_v19, %v934_v18  ;;  %v1449_v23 = vpop.f32.mrf.mxu3  ;;  %v1726_v35 = vpop.f32.mrf.mxu0  ;;  %v430_v18 = vmax.f32 %v398_v14, 0.0  ;;  %v937_v19 = vadd.f32 %v936_v42, %v4131_v12 }
 0x14c   : > { %v1529_v31 = vadd.f32 %v1449_v23, %v1255_v41  ;;  %519 = vst.msk [vmem:[#allocation2 + $0x181] sm:$0xff] %vm432_vm0, %v430_v18  ;;  %v327_v41 = vld [vmem:[%s3668_s10 + $0xf8] sm:$0xff]  ;;  %v1032_v18 = vld [vmem:[#allocation2 + $0x142] sm:$0xff] }
 0x14d   : > { %v939_v29 = vpop.f32.mrf.mxu1  ;;  %3432 = vmatmul.msk.f32.gmra.mxu0 %vm432_vm0, %v3954_v22  ;;  %v363_v47 = vmul.f32 %v3586_v30, %v327_v41  ;;  %v1031_v22 = vld [vmem:[#allocation2 + $0x13a] sm:$0xff] }
 0x14e   : > { %v4413_v21 = vadd.f32 %v1723_v51, %v1529_v31  ;;  %3368 = vmatmul.msk.f32.gmra.mxu2 %vm432_vm0, %v1030_v39  ;;  %v1305_v31 = vld [vmem:[#allocation2 + $0x150] sm:$0xff] }
 0x14f   : > { %3400 = vmatmul.msk.f32.gmra.mxu3 %vm432_vm0, %v1304_v25 }
 0x150   : > { %4995 = vst [vmem:[#allocation41_spill] sm:$0xff] %v4413_v21  ;;  %3337 = vmatmul.msk.f32.gmra.mxu1 %vm432_vm0, %v1303_v16  ;;  %v399_v21 = vadd.f32 %v3587_v6, %v363_v47  ;;  %v940_v16 = vadd.f32 %v939_v29, %v4153_v46 }
 0x151   : > { %v1178_v11 = vpop.f32.mrf.mxu2 }
 0x152   : > { %v1256_v23 = vadd.f32 %v1178_v11, %v937_v19  ;;  %v1452_v5 = vpop.f32.mrf.mxu3  ;;  %v1729_v27 = vpop.f32.mrf.mxu0  ;;  %v431_v12 = vmax.f32 %v399_v21, 0.0 }
 0x154   : > { %v1530_v51 = vadd.f32 %v1452_v5, %v1256_v23  ;;  %520 = vst.msk [vmem:[#allocation2 + $0x189] sm:$0xff] %vm432_vm0, %v431_v12  ;;  %v1033_v23 = vld [vmem:[#allocation2 + $0x152] sm:$0xff] }
 0x155   : > { %v942_v39 = vpop.f32.mrf.mxu1  ;;  %3433 = vmatmul.msk.f32.gmra.mxu0 %vm432_vm0, %v3975_v26  ;;  %v1306_v26 = vld [vmem:[#allocation2 + $0x158] sm:$0xff] }
 0x156   : > { %v4423_v14 = vadd.f32 %v1726_v35, %v1530_v51  ;;  %3369 = vmatmul.msk.f32.gmra.mxu2 %vm432_vm0, %v1031_v22  ;;  %v943_v46 = vadd.f32 %v942_v39, %v4173_v9  ;;  %v1307_v22 = vld [vmem:[#allocation2 + $0x168] sm:$0xff] }
 0x157   : > { %3401 = vmatmul.msk.f32.gmra.mxu3 %vm432_vm0, %v1305_v31 }
 0x158   : > { %3338 = vmatmul.msk.f32.gmra.mxu1 %vm432_vm0, %v1304_v25 }
 0x159   : > { %v1181_v42 = vpop.f32.mrf.mxu2 }
 0x15a   : > { %v1257_v30 = vadd.f32 %v1181_v42, %v940_v16  ;;  %v1455_v47 = vpop.f32.mrf.mxu3  ;;  %v1732_v6 = vpop.f32.mrf.mxu0  ;;  %v1034_v16 = vld [vmem:[#allocation2 + $0x15a] sm:$0xff] }
 0x15c   : > { %v1531_v19 = vadd.f32 %v1455_v47, %v1257_v30  ;;  %v1308_v30 = vld [vmem:[#allocation2 + $0x170] sm:$0xff] }
 0x15d   : > { %v945_v35 = vpop.f32.mrf.mxu1  ;;  %3434 = vmatmul.msk.f32.gmra.mxu0 %vm432_vm0, %v4000_v36 }
 0x15e   : > { %v4432_v21 = vadd.f32 %v1729_v27, %v1531_v19  ;;  %3370 = vmatmul.msk.f32.gmra.mxu2 %vm432_vm0, %v1032_v18  ;;  %v946_v9 = vadd.f32 %v945_v35, %v4193_v24  ;;  %v1583_v35 = vld [vmem:[#allocation2 + $0x181] sm:$0xff] }
 0x15f   : > { %3402 = vmatmul.msk.f32.gmra.mxu3 %vm432_vm0, %v1306_v26 }
 0x160   : > { %3339 = vmatmul.msk.f32.gmra.mxu1 %vm432_vm0, %v1305_v31 }
 0x161   : > { %v1184_v25 = vpop.f32.mrf.mxu2 }
 0x162   : > { %v1258_v29 = vadd.f32 %v1184_v25, %v943_v46  ;;  %v1458_v11 = vpop.f32.mrf.mxu3  ;;  %v1735_v41 = vpop.f32.mrf.mxu0  ;;  %v1035_v46 = vld [vmem:[#allocation2 + $0x16a] sm:$0xff] }
 0x164   : > { %v1532_v5 = vadd.f32 %v1458_v11, %v1258_v29  ;;  %v1309_v29 = vld [vmem:[#allocation2 + $0x180] sm:$0xff] }
 0x165   : > { %v948_v51 = vpop.f32.mrf.mxu1  ;;  %3435 = vmatmul.msk.f32.gmra.mxu0 %vm432_vm0, %v4019_v43 }
 0x166   : > { %v4440_v36 = vadd.f32 %v1732_v6, %v1532_v5  ;;  %3371 = vmatmul.msk.f32.gmra.mxu2 %vm432_vm0, %v1033_v23  ;;  %v949_v24 = vadd.f32 %v948_v51, %v4213_v28  ;;  %v1584_v51 = vld [vmem:[#allocation2 + $0x189] sm:$0xff] }
 0x167   : > { %3403 = vmatmul.msk.f32.gmra.mxu3 %vm432_vm0, %v1307_v22 }
 0x168   : > { %3340 = vmatmul.msk.f32.gmra.mxu1 %vm432_vm0, %v1306_v26 }
 0x169   : > { %v1187_v27 = vpop.f32.mrf.mxu2 }
 0x16a   : > { %v1259_v31 = vadd.f32 %v1187_v27, %v946_v9  ;;  %v1461_v39 = vpop.f32.mrf.mxu3  ;;  %v1738_v12 = vpop.f32.mrf.mxu0  ;;  %v1036_v9 = vld [vmem:[#allocation2 + $0x172] sm:$0xff] }
 0x16c   : > { %v1533_v42 = vadd.f32 %v1461_v39, %v1259_v31  ;;  %v1310_v31 = vld [vmem:[#allocation2 + $0x188] sm:$0xff] }
 0x16d   : > { %v951_v47 = vpop.f32.mrf.mxu1  ;;  %3436 = vmatmul.msk.f32.gmra.mxu0 %vm432_vm0, %v4035_v48 }
 0x16e   : > { %v4448_v43 = vadd.f32 %v1735_v41, %v1533_v42  ;;  %3372 = vmatmul.msk.f32.gmra.mxu2 %vm432_vm0, %v1034_v16  ;;  %v952_v28 = vadd.f32 %v951_v47, %v4233_v37 }
 0x16f   : > { %3404 = vmatmul.msk.f32.gmra.mxu3 %vm432_vm0, %v1308_v30 }
 0x170   : > { %3341 = vmatmul.msk.f32.gmra.mxu1 %vm432_vm0, %v1307_v22 }
 0x171   : > { %v1190_v6 = vpop.f32.mrf.mxu2 }
 0x172   : > { %v1260_v18 = vadd.f32 %v1190_v6, %v949_v24  ;;  %v1464_v19 = vpop.f32.mrf.mxu3  ;;  %v1741_v26 = vpop.f32.mrf.mxu0 }
 0x174   : > { %v1534_v25 = vadd.f32 %v1464_v19, %v1260_v18 }
 0x175   : > { %v954_v11 = vpop.f32.mrf.mxu1  ;;  %3437 = vmatmul.msk.f32.gmra.mxu0 %vm432_vm0, %v1583_v35 }
 0x176   : > { %v4455_v48 = vadd.f32 %v1738_v12, %v1534_v25  ;;  %3373 = vmatmul.msk.f32.gmra.mxu2 %vm432_vm0, %v1035_v46  ;;  %v955_v37 = vadd.f32 %v954_v11, %v4253_v44 }
 0x177   : > { %3405 = vmatmul.msk.f32.gmra.mxu3 %vm432_vm0, %v1309_v29 }
 0x178   : > { %3342 = vmatmul.msk.f32.gmra.mxu1 %vm432_vm0, %v1308_v30 }
 0x179   : > { %v1193_v41 = vpop.f32.mrf.mxu2 }
 0x17a   : > { %v1261_v23 = vadd.f32 %v1193_v41, %v952_v28  ;;  %v1467_v5 = vpop.f32.mrf.mxu3  ;;  %v1744_v22 = vpop.f32.mrf.mxu0 }
 0x17c   : > { %v1535_v27 = vadd.f32 %v1467_v5, %v1261_v23 }
 0x17d   : > { %v957_v39 = vpop.f32.mrf.mxu1  ;;  %3438 = vmatmul.msk.f32.gmra.mxu0 %vm432_vm0, %v1584_v51 }
 0x17e   : > { %v4462_v12 = vadd.f32 %v1741_v26, %v1535_v27  ;;  %3374 = vmatmul.msk.f32.gmra.mxu2 %vm432_vm0, %v1036_v9  ;;  %v958_v44 = vadd.f32 %v957_v39, %v4141_v33  ;;  %v2380_v39 = vld [vmem:[#allocation2 + $0x61] sm:$0xff] }
 0x17f   : > { %3406 = vmatmul.msk.f32.gmra.mxu3 %vm432_vm0, %v1310_v31 }
 0x180   : > { %3439 = vmatmul.msk.f32.vlgmr.msra.gmra.mxu1 %vm432_vm0, %v4054_v55 }
 0x181   : > { %v1196_v16 = vpop.f32.mrf.mxu2 }
 0x182   : > { %v1262_v42 = vadd.f32 %v1196_v16, %v955_v37  ;;  %v1470_v30 = vpop.f32.mrf.mxu3  ;;  %v1747_v47 = vpop.f32.mrf.mxu0 }
 0x184   : > { %v1536_v24 = vadd.f32 %v1470_v30, %v1262_v42 }
 0x185   : > { %v960_v6 = vpop.f32.mrf.mxu1  ;;  %3535 = vmatmul.msk.f32.vlgmr.msra.gmra.mxu0 %vm432_vm0, %v4077_v59 }
 0x186   : > { %v4471_v18 = vadd.f32 %v1744_v22, %v1536_v24  ;;  %3471 = vmatmul.msk.f32.vlgmr.msra.gmra.mxu2 %vm432_vm0, %v4056_v56  ;;  %v2381_v24 = vld [vmem:[#allocation2 + $0x69] sm:$0xff] }
 0x187   : > { %3503 = vmatmul.msk.f32.vlgmr.msra.gmra.mxu3 %vm432_vm0, %v3971_v3  ;;  %v961_v3 = vadd.f32 %v960_v6, %v4163_v17 }
 0x188   : > { %3440 = vmatmul.msk.f32.gmra.mxu1 %vm432_vm0, %v4065_v57 }
 0x189   : > { %v1199_v55 = vpop.f32.mrf.mxu2 }
 0x18a   : > { %v1263_v19 = vadd.f32 %v1199_v55, %v958_v44  ;;  %v1473_v26 = vpop.f32.mrf.mxu3  ;;  %v1750_v35 = vpop.f32.mrf.mxu0  ;;  %v4997_v44 = vld [vmem:[#allocation6_spill] sm:$0xff] }
 0x18c   : > { %v1537_v46 = vadd.f32 %v1473_v26, %v1263_v19  ;;  %v4999_v19 = vld [vmem:[#allocation21_spill] sm:$0xff] }
 0x18d   : > { %v963_v25 = vpop.f32.mrf.mxu1  ;;  %3536 = vmatmul.msk.f32.gmra.mxu0 %vm432_vm0, %v4089_v61 }
 0x18e   : > { %v4482_v29 = vadd.f32 %v1747_v47, %v1537_v46  ;;  %3472 = vmatmul.msk.f32.gmra.mxu2 %vm432_vm0, %v4067_v58 }
 0x18f   : > { %3504 = vmatmul.msk.f32.gmra.mxu3 %vm432_vm0, %v3996_v34  ;;  %v964_v34 = vadd.f32 %v963_v25, %v4183_v2 }
 0x190   : > { %3441 = vmatmul.msk.f32.gmra.mxu1 %vm432_vm0, %v4077_v59 }
 0x191   : > { %v1202_v56 = vpop.f32.mrf.mxu2 }
 0x192   : > { %v1264_v57 = vadd.f32 %v1202_v56, %v961_v3  ;;  %v1476_v33 = vpop.f32.mrf.mxu3  ;;  %v1753_v11 = vpop.f32.mrf.mxu0  ;;  %v2382_v56 = vld [vmem:[#allocation2 + $0x79] sm:$0xff] }
 0x194   : > { %v1538_v28 = vadd.f32 %v1476_v33, %v1264_v57  ;;  %v5000_v33 = vld [vmem:[#allocation9_spill] sm:$0xff] }
 0x195   : > { %v966_v41 = vpop.f32.mrf.mxu1  ;;  %3537 = vmatmul.msk.f32.gmra.mxu0 %vm432_vm0, %v4101_v0 }
 0x196   : > { %v4493_v23 = vadd.f32 %v1750_v35, %v1538_v28  ;;  %3473 = vmatmul.msk.f32.gmra.mxu2 %vm432_vm0, %v4079_v60  ;;  %v5001_v28 = vld [vmem:[#allocation4_spill] sm:$0xff] }
 0x197   : > { %3505 = vmatmul.msk.f32.gmra.mxu3 %vm432_vm0, %v4015_v40  ;;  %v967_v40 = vadd.f32 %v966_v41, %v4203_v49  ;;  %v5002_v41 = vld [vmem:[#allocation25_spill] sm:$0xff] }
 0x198   : > { %3442 = vmatmul.msk.f32.gmra.mxu1 %vm432_vm0, %v4089_v61 }
 0x199   : > { %v1205_v58 = vpop.f32.mrf.mxu2 }
 0x19a   : > { %v1265_v59 = vadd.f32 %v1205_v58, %v964_v34  ;;  %v1479_v17 = vpop.f32.mrf.mxu3  ;;  %v1756_v5 = vpop.f32.mrf.mxu0 }
 0x19c   : > { %v1539_v22 = vadd.f32 %v1479_v17, %v1265_v59 }
 0x19d   : > { %v969_v51 = vpop.f32.mrf.mxu1  ;;  %3538 = vmatmul.msk.f32.gmra.mxu0 %vm432_vm0, %v4115_v7 }
 0x19e   : > { %v4504_v9 = vadd.f32 %v1753_v11, %v1539_v22  ;;  %3474 = vmatmul.msk.f32.gmra.mxu2 %vm432_vm0, %v4091_v62  ;;  %v2383_v22 = vld [vmem:[#allocation2 + $0x81] sm:$0xff] }
 0x19f   : > { %3506 = vmatmul.msk.f32.gmra.mxu3 %vm432_vm0, %v4031_v45  ;;  %v4996_v45 = vld [vmem:[#allocation17_spill] sm:$0xff] }
 0x1a0   : > { %3443 = vmatmul.msk.f32.gmra.mxu1 %vm432_vm0, %v4101_v0  ;;  %v970_v62 = vadd.f32 %v969_v51, %v4996_v45 }
 0x1a1   : > { %v1208_v60 = vpop.f32.mrf.mxu2 }
 0x1a2   : > { %v1266_v61 = vadd.f32 %v1208_v60, %v967_v40  ;;  %v1482_v2 = vpop.f32.mrf.mxu3  ;;  %v1759_v27 = vpop.f32.mrf.mxu0  ;;  %v5003_v40 = vld [vmem:[#allocation12_spill] sm:$0xff] }
 0x1a4   : > { %v1540_v31 = vadd.f32 %v1482_v2, %v1266_v61  ;;  %v5004_v61 = vld [vmem:[#allocation7_spill] sm:$0xff]  ;;  %v5005_v2 = vld [vmem:[#allocation28_spill] sm:$0xff] }
 0x1a5   : > { %v972_v37 = vpop.f32.mrf.mxu1  ;;  %3539 = vmatmul.msk.f32.gmra.mxu0 %vm432_vm0, %v4129_v10 }
 0x1a6   : > { %v4515_v16 = vadd.f32 %v1756_v5, %v1540_v31  ;;  %3475 = vmatmul.msk.f32.gmra.mxu2 %vm432_vm0, %v4103_v4  ;;  %v4998_v4 = vld [vmem:[#allocation3_spill] sm:$0xff]  ;;  %v973_v26 = vadd.f32 %v972_v37, %v4999_v19 }
 0x1a7   : > { %3507 = vmatmul.msk.f32.gmra.mxu3 %vm432_vm0, %v2380_v39 }
 0x1a8   : > { %3444 = vmatmul.msk.f32.gmra.mxu1 %vm432_vm0, %v4115_v7 }
 0x1a9   : > { %v1211_v0 = vpop.f32.mrf.mxu2 }
 0x1aa   : > { %v1267_v49 = vadd.f32 %v1211_v0, %v970_v62  ;;  %v1485_v42 = vpop.f32.mrf.mxu3  ;;  %v1762_v30 = vpop.f32.mrf.mxu0  ;;  %v2384_v0 = vld [vmem:[#allocation2 + $0x91] sm:$0xff] }
 0x1ac   : > { %v1541_v47 = vadd.f32 %v1485_v42, %v1267_v49  ;;  %v5006_v42 = vld [vmem:[#allocation15_spill] sm:$0xff] }
 0x1ad   : > { %v975_v6 = vpop.f32.mrf.mxu1  ;;  %3540 = vmatmul.msk.f32.gmra.mxu0 %vm432_vm0, %v4997_v44 }
 0x1ae   : > { %v4525_v55 = vadd.f32 %v1759_v27, %v1541_v47  ;;  %3476 = vmatmul.msk.f32.gmra.mxu2 %vm432_vm0, %v4998_v4  ;;  %v976_v34 = vadd.f32 %v975_v6, %v5002_v41  ;;  %v5007_v47 = vld [vmem:[#allocation10_spill] sm:$0xff] }
 0x1af   : > { %3508 = vmatmul.msk.f32.gmra.mxu3 %vm432_vm0, %v2381_v24  ;;  %v5008_v24 = vld [vmem:[#allocation5_spill] sm:$0xff] }
 0x1b0   : > { %3445 = vmatmul.msk.f32.gmra.mxu1 %vm432_vm0, %v4129_v10 }
 0x1b1   : > { %v1214_v7 = vpop.f32.mrf.mxu2 }
 0x1b2   : > { %v1268_v35 = vadd.f32 %v1214_v7, %v973_v26  ;;  %v1488_v46 = vpop.f32.mrf.mxu3  ;;  %v1765_v25 = vpop.f32.mrf.mxu0 }
 0x1b4   : > { %v1542_v3 = vadd.f32 %v1488_v46, %v1268_v35  ;;  %v2385_v35 = vld [vmem:[#allocation2 + $0x99] sm:$0xff] }
 0x1b5   : > { %v978_v57 = vpop.f32.mrf.mxu1  ;;  %3541 = vmatmul.msk.f32.gmra.mxu0 %vm432_vm0, %v5000_v33 }
 0x1b6   : > { %v4535_v11 = vadd.f32 %v1762_v30, %v1542_v3  ;;  %3477 = vmatmul.msk.f32.gmra.mxu2 %vm432_vm0, %v5001_v28  ;;  %v979_v27 = vadd.f32 %v978_v57, %v5005_v2  ;;  %v5011_v57 = vld [vmem:[#allocation8_spill] sm:$0xff] }
 0x1b7   : > { %3509 = vmatmul.msk.f32.gmra.mxu3 %vm432_vm0, %v2382_v56  ;;  %v5010_v56 = vld [vmem:[#allocation13_spill] sm:$0xff] }
 0x1b8   : > { %3446 = vmatmul.msk.f32.gmra.mxu1 %vm432_vm0, %v4997_v44 }
 0x1b9   : > { %v1217_v10 = vpop.f32.mrf.mxu2 }
 0x1ba   : > { %v1269_v58 = vadd.f32 %v1217_v10, %v976_v34  ;;  %v1491_v59 = vpop.f32.mrf.mxu3  ;;  %v1768_v17 = vpop.f32.mrf.mxu0 }
 0x1bc   : > { %v1543_v5 = vadd.f32 %v1491_v59, %v1269_v58  ;;  %v2386_v59 = vld [vmem:[#allocation2 + $0xa9] sm:$0xff] }
 0x1bd   : > { %v981_v51 = vpop.f32.mrf.mxu1  ;;  %3542 = vmatmul.msk.f32.gmra.mxu0 %vm432_vm0, %v5003_v40 }
 0x1be   : > { %v4545_v60 = vadd.f32 %v1765_v25, %v1543_v5  ;;  %3478 = vmatmul.msk.f32.gmra.mxu2 %vm432_vm0, %v5004_v61  ;;  %v982_v6 = vadd.f32 %v981_v51, %v5008_v24  ;;  %v5009_v25 = vld [vmem:[#allocation19_spill] sm:$0xff]  ;;  %v5013_v51 = vld [vmem:[#allocation16_spill] sm:$0xff] }
 0x1bf   : > { %3510 = vmatmul.msk.f32.gmra.mxu3 %vm432_vm0, %v2383_v22  ;;  %v5012_v5 = vld [vmem:[#allocation23_spill] sm:$0xff] }
 0x1c0   : > { %3447 = vmatmul.msk.f32.gmra.mxu1 %vm432_vm0, %v5000_v33 }
 0x1c1   : > { %v1220_v31 = vpop.f32.mrf.mxu2 }
 0x1c2   : > { %v1270_v39 = vadd.f32 %v1220_v31, %v979_v27  ;;  %v1494_v37 = vpop.f32.mrf.mxu3  ;;  %v1771_v45 = vpop.f32.mrf.mxu0 }
 0x1c4   : > { %v1544_v62 = vadd.f32 %v1494_v37, %v1270_v39 }
 0x1c5   : > { %v984_v49 = vpop.f32.mrf.mxu1  ;;  %3543 = vmatmul.msk.f32.gmra.mxu0 %vm432_vm0, %v5006_v42 }
 0x1c6   : > { %v4555_v30 = vadd.f32 %v1768_v17, %v1544_v62  ;;  %3479 = vmatmul.msk.f32.gmra.mxu2 %vm432_vm0, %v5007_v47  ;;  %v985_v33 = vadd.f32 %v984_v49, %v5011_v57  ;;  %v5017_v47 = vld [vmem:[#allocation14_spill] sm:$0xff] }
 0x1c7   : > { %3511 = vmatmul.msk.f32.gmra.mxu3 %vm432_vm0, %v2384_v0  ;;  %v5015_v0 = vld [vmem:[#allocation27_spill] sm:$0xff]  ;;  %v5020_v57 = vld [vmem:[#allocation18_spill] sm:$0xff] }
 0x1c8   : > { %3448 = vmatmul.msk.f32.gmra.mxu1 %vm432_vm0, %v5003_v40  ;;  %v5014_v40 = vld [vmem:[#allocation11_spill] sm:$0xff] }
 0x1c9   : > { %v1223_v44 = vpop.f32.mrf.mxu2 }
 0x1ca   : > { %v1271_v4 = vadd.f32 %v1223_v44, %v982_v6  ;;  %v1497_v19 = vpop.f32.mrf.mxu3  ;;  %v1774_v26 = vpop.f32.mrf.mxu0 }
 0x1cc   : > { %v1545_v7 = vadd.f32 %v1497_v19, %v1271_v4 }
 0x1cd   : > { %v987_v46 = vpop.f32.mrf.mxu1  ;;  %3544 = vmatmul.msk.f32.gmra.mxu0 %vm432_vm0, %v5009_v25 }
 0x1ce   : > { %v4565_v3 = vadd.f32 %v1771_v45, %v1545_v7  ;;  %3480 = vmatmul.msk.f32.gmra.mxu2 %vm432_vm0, %v5010_v56  ;;  %v988_v61 = vadd.f32 %v987_v46, %v5014_v40  ;;  %v2387_v45 = vld [vmem:[#allocation2 + $0xb1] sm:$0xff]  ;;  %v2388_v7 = vld [vmem:[#allocation2 + $0xc1] sm:$0xff] }
 0x1cf   : > { %3512 = vmatmul.msk.f32.gmra.mxu3 %vm432_vm0, %v2385_v35  ;;  %v5018_v46 = vld [vmem:[#allocation30_spill] sm:$0xff]  ;;  %v5019_v56 = vld [vmem:[#allocation24_spill] sm:$0xff] }
 0x1d0   : > { %3449 = vmatmul.msk.f32.gmra.mxu1 %vm432_vm0, %v5006_v42  ;;  %v5016_v42 = vld [vmem:[#allocation20_spill] sm:$0xff] }
 0x1d1   : > { %v1226_v28 = vpop.f32.mrf.mxu2 }
 0x1d2   : > { %v1272_v41 = vadd.f32 %v1226_v28, %v985_v33  ;;  %v1500_v34 = vpop.f32.mrf.mxu3  ;;  %v1777_v10 = vpop.f32.mrf.mxu0 }
 0x1d4   : > { %v1546_v58 = vadd.f32 %v1500_v34, %v1272_v41 }
 0x1d5   : > { %v990_v17 = vpop.f32.mrf.mxu1  ;;  %3545 = vmatmul.msk.f32.gmra.mxu0 %vm432_vm0, %v5012_v5 }
 0x1d6   : > { %v4575_v22 = vadd.f32 %v1774_v26, %v1546_v58  ;;  %3481 = vmatmul.msk.f32.gmra.mxu2 %vm432_vm0, %v5013_v51  ;;  %v991_v24 = vadd.f32 %v990_v17, %v5017_v47  ;;  %v5021_v51 = vld [vmem:[#allocation22_spill] sm:$0xff] }
 0x1d7   : > { %3513 = vmatmul.msk.f32.gmra.mxu3 %vm432_vm0, %v2386_v59  ;;  %v2389_v59 = vld [vmem:[#allocation2 + $0xc9] sm:$0xff] }
 0x1d8   : > { %3450 = vmatmul.msk.f32.gmra.mxu1 %vm432_vm0, %v5009_v25 }
 0x1d9   : > { %v1229_v2 = vpop.f32.mrf.mxu2 }
 0x1da   : > { %v1273_v27 = vadd.f32 %v1229_v2, %v988_v61  ;;  %v1503_v31 = vpop.f32.mrf.mxu3  ;;  %v1780_v39 = vpop.f32.mrf.mxu0 }
 0x1dc   : > { %v1547_v37 = vadd.f32 %v1503_v31, %v1273_v27 }
 0x1dd   : > { %v993_v62 = vpop.f32.mrf.mxu1  ;;  %3546 = vmatmul.msk.f32.gmra.mxu0 %vm432_vm0, %v5015_v0 }
 0x1de   : > { %v4585_v49 = vadd.f32 %v1777_v10, %v1547_v37  ;;  %3482 = vmatmul.msk.f32.gmra.mxu2 %vm432_vm0, %v5016_v42  ;;  %v994_v33 = vadd.f32 %v993_v62, %v5020_v57  ;;  %v2390_v37 = vld [vmem:[#allocation2 + $0xd9] sm:$0xff] }
 0x1df   : > { %3514 = vmatmul.msk.f32.gmra.mxu3 %vm432_vm0, %v2387_v45 }
 0x1e0   : > { %3451 = vmatmul.msk.f32.gmra.mxu1 %vm432_vm0, %v5012_v5 }
 0x1e1   : > { %v1232_v6 = vpop.f32.mrf.mxu2 }
 0x1e2   : > { %v1274_v44 = vadd.f32 %v1232_v6, %v991_v24  ;;  %v1506_v4 = vpop.f32.mrf.mxu3  ;;  %v1783_v19 = vpop.f32.mrf.mxu0 }
 0x1e4   : > { %v1548_v26 = vadd.f32 %v1506_v4, %v1274_v44  ;;  %v2391_v4 = vld [vmem:[#allocation2 + $0xe1] sm:$0xff] }
 0x1e5   : > { %v996_v35 = vpop.f32.mrf.mxu1  ;;  %3547 = vmatmul.msk.f32.gmra.mxu0 %vm432_vm0, %v5018_v46 }
 0x1e6   : > { %v4595_v25 = vadd.f32 %v1780_v39, %v1548_v26  ;;  %3483 = vmatmul.msk.f32.gmra.mxu2 %vm432_vm0, %v5019_v56  ;;  %v997_v40 = vadd.f32 %v996_v35, %v5021_v51  ;;  %v4646_v51 = vld [vmem:[%s4927_s4] ss:$0 sm:$0xff] }
 0x1e7   : > { %3515 = vmatmul.msk.f32.gmra.mxu3 %vm432_vm0, %v2388_v7 }
 0x1e8   : > { %3452 = vmatmul.msk.f32.gmra.mxu1 %vm432_vm0, %v5015_v0 }
 0x1e9   : > { %v1235_v28 = vpop.f32.mrf.mxu2 }
 0x1ea   : > { %v1275_v41 = vadd.f32 %v1235_v28, %v994_v33  ;;  %v1509_v34 = vpop.f32.mrf.mxu3  ;;  %v1786_v10 = vpop.f32.mrf.mxu0  ;;  %v2392_v33 = vld [vmem:[#allocation2 + $0xf1] sm:$0xff] }
 0x1ec   : > { %v1549_v58 = vadd.f32 %v1509_v34, %v1275_v41 }
 0x1ed   : > { %v999_v17 = vpop.f32.mrf.mxu1  ;;  %3548 = vmatmul.msk.f32.gmra.mxu0 %vm432_vm0, %v4298_v8 }
 0x1ee   : > { %v4605_v5 = vadd.f32 %v1783_v19, %v1549_v58  ;;  %3484 = vmatmul.msk.f32.gmra.mxu2 %vm432_vm0, %v4271_v13  ;;  %v5022_v13 = vld [vmem:[#allocation26_spill] sm:$0xff] }
 0x1ef   : > { %3516 = vmatmul.msk.f32.gmra.mxu3 %vm432_vm0, %v2389_v59  ;;  %v1000_v0 = vadd.f32 %v999_v17, %v5022_v13  ;;  %v2394_v13 = vld [vmem:[#allocation2 + $0x109] sm:$0xff] }
 0x1f0   : > { %3453 = vmatmul.msk.f32.gmra.mxu1 %vm432_vm0, %v5018_v46 }
 0x1f1   : > { %v1238_v61 = vpop.f32.mrf.mxu2 }
 0x1f2   : > { %v1276_v2 = vadd.f32 %v1238_v61, %v997_v40  ;;  %v1512_v27 = vpop.f32.mrf.mxu3  ;;  %v1789_v31 = vpop.f32.mrf.mxu0  ;;  %v2393_v40 = vld [vmem:[#allocation2 + $0xf9] sm:$0xff] }
 0x1f4   : > { %v1550_v39 = vadd.f32 %v1512_v27, %v1276_v2 }
 0x1f5   : > { %v1002_v45 = vpop.f32.mrf.mxu1  ;;  %3549 = vmatmul.msk.f32.gmra.mxu0 %vm432_vm0, %v4313_v38 }
 0x1f6   : > { %v4615_v62 = vadd.f32 %v1786_v10, %v1550_v39  ;;  %3485 = vmatmul.msk.f32.gmra.mxu2 %vm432_vm0, %v4287_v20  ;;  %v5023_v20 = vld [vmem:[#allocation29_spill] sm:$0xff] }
 0x1f7   : > { %3517 = vmatmul.msk.f32.gmra.mxu3 %vm432_vm0, %v2390_v37  ;;  %v1003_v7 = vadd.f32 %v1002_v45, %v5023_v20 }
 0x1f8   : > { %3454 = vmatmul.msk.f32.gmra.mxu1 %vm432_vm0, %v4298_v8 }
 0x1f9   : > { %v1241_v42 = vpop.f32.mrf.mxu2 }
 0x1fa   : > { %v1277_v47 = vadd.f32 %v1241_v42, %v1000_v0  ;;  %v1515_v24 = vpop.f32.mrf.mxu3  ;;  %v1792_v6 = vpop.f32.mrf.mxu0 }
 0x1fc   : > { %v1551_v44 = vadd.f32 %v1515_v24, %v1277_v47  ;;  %v5026_v47 = vld [vmem:[#allocation34_spill] sm:$0xff]  ;;  %v5027_v24 = vld [vmem:[#allocation33_spill] sm:$0xff] }
 0x1fd   : > { %v1973_v19 = vpop.f32.mrf.mxu1  ;;  %3550 = vmatmul.msk.f32.gmra.mxu0 %vm432_vm0, %v4328_v32 }
 0x1fe   : > { %v4625_v26 = vadd.f32 %v1789_v31, %v1551_v44  ;;  %3486 = vmatmul.msk.f32.gmra.mxu2 %vm432_vm0, %v4300_v54  ;;  %v5024_v54 = vld [vmem:[#allocation31_spill] sm:$0xff] }
 0x1ff   : > { %3518 = vmatmul.msk.f32.gmra.mxu3 %vm432_vm0, %v2391_v4 }
 0x200   : > { %3455 = vmatmul.msk.f32.gmra.mxu1 %vm432_vm0, %v4313_v38  ;;  %v2069_v38 = vadd.f32 %v1973_v19, %v5024_v54 }
 0x201   : > { %v1244_v8 = vpop.f32.mrf.mxu2 }
 0x202   : > { %v1278_v35 = vadd.f32 %v1244_v8, %v1003_v7  ;;  %v1518_v46 = vpop.f32.mrf.mxu3  ;;  %v2796_v56 = vpop.f32.mrf.mxu0 }
 0x204   : > { %v1552_v57 = vadd.f32 %v1518_v46, %v1278_v35 }
 0x205   : > { %v1976_v28 = vpop.f32.mrf.mxu1  ;;  %3551 = vmatmul.msk.f32.gmra.mxu0 %vm432_vm0, %v4343_v1 }
 0x206   : > { %v4635_v41 = vadd.f32 %v1792_v6, %v1552_v57  ;;  %3487 = vmatmul.msk.f32.gmra.mxu2 %vm432_vm0, %v4315_v15 }
 0x207   : > { %3519 = vmatmul.msk.f32.gmra.mxu3 %vm432_vm0, %v2392_v33 }
 0x208   : > { %3456 = vmatmul.msk.f32.gmra.mxu1 %vm432_vm0, %v4328_v32  ;;  %v5025_v32 = vld [vmem:[#allocation32_spill] sm:$0xff] }
 0x209   : > { %v2248_v34 = vpop.f32.mrf.mxu2  ;;  %v2070_v2 = vadd.f32 %v1976_v28, %v5025_v32  ;;  %v2395_v28 = vld [vmem:[#allocation2 + $0x111] sm:$0xff] }
 0x20a   : > { %v2344_v10 = vadd.f32 %v2248_v34, %v2069_v38  ;;  %v2522_v58 = vpop.f32.mrf.mxu3  ;;  %v2799_v59 = vpop.f32.mrf.mxu0  ;;  %v1847_v38 = vld [vmem:[#allocation2 + $0x10a] sm:$0xff] }
 0x20c   : > { %v2618_v17 = vadd.f32 %v2522_v58, %v2344_v10  ;;  %v5028_v10 = vld [vmem:[#allocation36_spill] sm:$0xff]  ;;  %v5029_v58 = vld [vmem:[#allocation35_spill] sm:$0xff] }
 0x20d   : > { %v1979_v61 = vpop.f32.mrf.mxu1  ;;  %3552 = vmatmul.msk.f32.gmra.mxu0 %vm432_vm0, %v4358_v50 }
 0x20e   : > { %v2892_v15 = vadd.f32 %v2796_v56, %v2618_v17  ;;  %3488 = vmatmul.msk.f32.gmra.mxu2 %vm432_vm0, %v4330_v53  ;;  %v2071_v6 = vadd.f32 %v1979_v61, %v5027_v24 }
 0x20f   : > { %3520 = vmatmul.msk.f32.gmra.mxu3 %vm432_vm0, %v2393_v40 }
 0x210   : > { %v2928_v27 = vadd.f32 %v4646_v51, %v2892_v15  ;;  %3457 = vmatmul.msk.f32.gmra.mxu1 %vm432_vm0, %v4343_v1 }
 0x211   : > { %v2251_v31 = vpop.f32.mrf.mxu2 }
 0x212   : > { %2960 = vst.msk [vmem:[%s4657_s17] sm:$0xff] %vm432_vm0, %v2928_v27  ;;  %v2345_v53 = vadd.f32 %v2251_v31, %v2070_v2  ;;  %v2525_v39 = vpop.f32.mrf.mxu3  ;;  %v2802_v37 = vpop.f32.mrf.mxu0  ;;  %v3063_v1 = vmul.f32 %v2928_v27, %v2928_v27  ;;  %v2992_v19 = vsel %vm432_vm0, %v2928_v27, 0.0  ;;  %v2670_v27 = vld [vmem:[#allocation2 + $0x122] sm:$0xff] }
 0x214   : > { %v2619_v45 = vadd.f32 %v2525_v39, %v2345_v53  ;;  %v3095_v56 = vsel %vm432_vm0, %v3063_v1, 0.0  ;;  %v2122_v53 = vld [vmem:[#allocation2 + $0x120] sm:$0xff] }
 0x215   : > { %v1982_v0 = vpop.f32.mrf.mxu1  ;;  %3553 = vmatmul.msk.f32.gmra.mxu0 %vm432_vm0, %v4373_v63  ;;  %v5030_v1 = vld [vmem:[#allocation37_spill] sm:$0xff] }
 0x216   : > { %v2893_v42 = vadd.f32 %v2799_v59, %v2619_v45  ;;  %3489 = vmatmul.msk.f32.gmra.mxu2 %vm432_vm0, %v5026_v47  ;;  %v2072_v59 = vadd.f32 %v1982_v0, %v5029_v58  ;;  %v2396_v45 = vld [vmem:[#allocation2 + $0x121] sm:$0xff] }
 0x217   : > { %3521 = vmatmul.msk.f32.gmra.mxu3 %vm432_vm0, %v2394_v13 }
 0x218   : > { %v2929_v44 = vadd.f32 %v4646_v51, %v2893_v42  ;;  %3458 = vmatmul.msk.f32.gmra.mxu1 %vm432_vm0, %v4358_v50  ;;  %v1848_v42 = vld [vmem:[#allocation2 + $0x112] sm:$0xff] }
 0x219   : > { %v2254_v4 = vpop.f32.mrf.mxu2 }
 0x21a   : > { %2961 = vst.msk [vmem:[%s4657_s17 + $0x8] sm:$0xff] %vm432_vm0, %v2929_v44  ;;  %v2993_v63 = vsel %vm432_vm0, %v2929_v44, 0.0  ;;  %v3064_v20 = vmul.f32 %v2929_v44, %v2929_v44  ;;  %v2346_v7 = vadd.f32 %v2254_v4, %v2071_v6  ;;  %v2528_v8 = vpop.f32.mrf.mxu3  ;;  %v2805_v35 = vpop.f32.mrf.mxu0 }
 0x21b   : > { %v2994_v46 = vadd.f32 %v2993_v63, %v2992_v19 }
 0x21c   : > { %v3096_v57 = vsel %vm432_vm0, %v3064_v20, 0.0  ;;  %v2620_v33 = vadd.f32 %v2528_v8, %v2346_v7  ;;  %v2671_v8 = vld [vmem:[#allocation2 + $0x12a] sm:$0xff] }
 0x21d   : > { %v3097_v50 = vadd.f32 %v3096_v57, %v3095_v56  ;;  %v1985_v54 = vpop.f32.mrf.mxu1  ;;  %3554 = vmatmul.msk.f32.gmra.mxu0 %vm432_vm0, %v4385_v52 }
 0x21e   : > { %v2894_v34 = vadd.f32 %v2802_v37, %v2620_v33  ;;  %3490 = vmatmul.msk.f32.gmra.mxu2 %vm432_vm0, %v5028_v10  ;;  %v2073_v24 = vadd.f32 %v1985_v54, %v5030_v1  ;;  %v2397_v33 = vld [vmem:[#allocation2 + $0x129] sm:$0xff] }
 0x21f   : > { %3522 = vmatmul.msk.f32.gmra.mxu3 %vm432_vm0, %v2395_v28 }
 0x220   : > { %v2930_v17 = vadd.f32 %v4646_v51, %v2894_v34  ;;  %3459 = vmatmul.msk.f32.gmra.mxu1 %vm432_vm0, %v1847_v38  ;;  %v5031_v38 = vld [vmem:[#allocation38_spill] sm:$0xff] }
 0x221   : > { %v2257_v40 = vpop.f32.mrf.mxu2 }
 0x222   : > { %2962 = vst.msk [vmem:[%s4657_s17 + $0x10] sm:$0xff] %vm432_vm0, %v2930_v17  ;;  %v2995_v61 = vsel %vm432_vm0, %v2930_v17, 0.0  ;;  %v3065_v15 = vmul.f32 %v2930_v17, %v2930_v17  ;;  %v2347_v32 = vadd.f32 %v2257_v40, %v2072_v59  ;;  %v2531_v52 = vpop.f32.mrf.mxu3  ;;  %v2808_v2 = vpop.f32.mrf.mxu0 }
 0x223   : > { %v2996_v31 = vadd.f32 %v2995_v61, %v2994_v46  ;;  %v2123_v46 = vld [vmem:[#allocation2 + $0x128] sm:$0xff] }
 0x224   : > { %v3098_v39 = vsel %vm432_vm0, %v3065_v15, 0.0  ;;  %v2621_v37 = vadd.f32 %v2531_v52, %v2347_v32  ;;  %v2672_v32 = vld [vmem:[#allocation2 + $0x13a] sm:$0xff] }
 0x225   : > { %v3099_v13 = vadd.f32 %v3098_v39, %v3097_v50  ;;  %v1988_v0 = vpop.f32.mrf.mxu1  ;;  %3555 = vmatmul.msk.f32.gmra.mxu0 %vm432_vm0, %v2670_v27  ;;  %v2398_v39 = vld [vmem:[#allocation2 + $0x139] sm:$0xff] }
 0x226   : > { %v2895_v47 = vadd.f32 %v2805_v35, %v2621_v37  ;;  %3491 = vmatmul.msk.f32.gmra.mxu2 %vm432_vm0, %v2122_v53  ;;  %v2074_v34 = vadd.f32 %v1988_v0, %v5031_v38 }
 0x227   : > { %3523 = vmatmul.msk.f32.gmra.mxu3 %vm432_vm0, %v2396_v45 }
 0x228   : > { %v2931_v6 = vadd.f32 %v4646_v51, %v2895_v47  ;;  %3460 = vmatmul.msk.f32.gmra.mxu1 %vm432_vm0, %v1848_v42 }
 0x229   : > { %v2260_v44 = vpop.f32.mrf.mxu2 }
 0x22a   : > { %2963 = vst.msk [vmem:[%s4657_s17 + $0x18] sm:$0xff] %vm432_vm0, %v2931_v6  ;;  %v2997_v4 = vsel %vm432_vm0, %v2931_v6, 0.0  ;;  %v3066_v19 = vmul.f32 %v2931_v6, %v2931_v6  ;;  %v2348_v63 = vadd.f32 %v2260_v44, %v2073_v24  ;;  %v2534_v20 = vpop.f32.mrf.mxu3  ;;  %v2811_v7 = vpop.f32.mrf.mxu0 }
 0x22b   : > { %v2998_v35 = vadd.f32 %v2997_v4, %v2996_v31 }
 0x22c   : > { %v3100_v56 = vsel %vm432_vm0, %v3066_v19, 0.0  ;;  %v2622_v57 = vadd.f32 %v2534_v20, %v2348_v63  ;;  %v2673_v19 = vld [vmem:[#allocation2 + $0x142] sm:$0xff] }
 0x22d   : > { %v3101_v28 = vadd.f32 %v3100_v56, %v3099_v13  ;;  %v1991_v50 = vpop.f32.mrf.mxu1  ;;  %3556 = vmatmul.msk.f32.gmra.mxu0 %vm432_vm0, %v2671_v8  ;;  %v5032_v13 = vld [vmem:[#allocation39_spill] sm:$0xff]  ;;  %v2125_v20 = vld [vmem:[#allocation2 + $0x140] sm:$0xff] }
 0x22e   : > { %v2896_v54 = vadd.f32 %v2808_v2, %v2622_v57  ;;  %3492 = vmatmul.msk.f32.gmra.mxu2 %vm432_vm0, %v2123_v46  ;;  %v2124_v2 = vld [vmem:[#allocation2 + $0x138] sm:$0xff]  ;;  %v2075_v0 = vadd.f32 %v1991_v50, %v5032_v13  ;;  %v2399_v46 = vld [vmem:[#allocation2 + $0x141] sm:$0xff] }
 0x22f   : > { %3524 = vmatmul.msk.f32.gmra.mxu3 %vm432_vm0, %v2397_v33  ;;  %v5033_v33 = vld [vmem:[#allocation40_spill] sm:$0xff] }
 0x230   : > { %v2932_v10 = vadd.f32 %v4646_v51, %v2896_v54  ;;  %3461 = vmatmul.msk.f32.gmra.mxu1 %vm432_vm0, %v2670_v27 }
 0x231   : > { %v2263_v58 = vpop.f32.mrf.mxu2 }
 0x232   : > { %2964 = vst.msk [vmem:[%s4657_s17 + $0x20] sm:$0xff] %vm432_vm0, %v2932_v10  ;;  %v2999_v59 = vsel %vm432_vm0, %v2932_v10, 0.0  ;;  %v3067_v17 = vmul.f32 %v2932_v10, %v2932_v10  ;;  %v2349_v40 = vadd.f32 %v2263_v58, %v2074_v34  ;;  %v2537_v61 = vpop.f32.mrf.mxu3  ;;  %v2814_v15 = vpop.f32.mrf.mxu0 }
 0x233   : > { %v3000_v52 = vadd.f32 %v2999_v59, %v2998_v35 }
 0x234   : > { %v3102_v31 = vsel %vm432_vm0, %v3067_v17, 0.0  ;;  %v2623_v53 = vadd.f32 %v2537_v61, %v2349_v40  ;;  %v2674_v17 = vld [vmem:[#allocation2 + $0x152] sm:$0xff] }
 0x235   : > { %v3103_v37 = vadd.f32 %v3102_v31, %v3101_v28  ;;  %v1994_v45 = vpop.f32.mrf.mxu1  ;;  %3557 = vmatmul.msk.f32.gmra.mxu0 %vm432_vm0, %v2672_v32  ;;  %v2126_v61 = vld [vmem:[#allocation2 + $0x150] sm:$0xff] }
 0x236   : > { %v2897_v27 = vadd.f32 %v2811_v7, %v2623_v53  ;;  %3493 = vmatmul.msk.f32.gmra.mxu2 %vm432_vm0, %v2124_v2  ;;  %v2076_v28 = vadd.f32 %v1994_v45, %v5033_v33  ;;  %v2400_v2 = vld [vmem:[#allocation2 + $0x151] sm:$0xff] }
 0x237   : > { %3525 = vmatmul.msk.f32.gmra.mxu3 %vm432_vm0, %v2398_v39  ;;  %v5034_v39 = vld [vmem:[#allocation41_spill] sm:$0xff] }
 0x238   : > { %v2933_v42 = vadd.f32 %v4646_v51, %v2897_v27  ;;  %3462 = vmatmul.msk.f32.gmra.mxu1 %vm432_vm0, %v2671_v8 }
 0x239   : > { %v2266_v47 = vpop.f32.mrf.mxu2 }
 0x23a   : > { %2965 = vst.msk [vmem:[%s4657_s17 + $0x28] sm:$0xff] %vm432_vm0, %v2933_v42  ;;  %v3001_v1 = vsel %vm432_vm0, %v2933_v42, 0.0  ;;  %v3068_v24 = vmul.f32 %v2933_v42, %v2933_v42  ;;  %v2350_v6 = vadd.f32 %v2266_v47, %v2075_v0  ;;  %v2540_v44 = vpop.f32.mrf.mxu3  ;;  %v2817_v4 = vpop.f32.mrf.mxu0 }
 0x23b   : > { %v3002_v63 = vadd.f32 %v3001_v1, %v3000_v52 }
 0x23c   : > { %v3104_v7 = vsel %vm432_vm0, %v3068_v24, 0.0  ;;  %v2624_v35 = vadd.f32 %v2540_v44, %v2350_v6  ;;  %v2675_v24 = vld [vmem:[#allocation2 + $0x15a] sm:$0xff] }
 0x23d   : > { %v3105_v56 = vadd.f32 %v3104_v7, %v3103_v37  ;;  %v1997_v57 = vpop.f32.mrf.mxu1  ;;  %3558 = vmatmul.msk.f32.gmra.mxu0 %vm432_vm0, %v2673_v19  ;;  %v2127_v44 = vld [vmem:[#allocation2 + $0x158] sm:$0xff] }
 0x23e   : > { %v2898_v8 = vadd.f32 %v2814_v15, %v2624_v35  ;;  %3494 = vmatmul.msk.f32.gmra.mxu2 %vm432_vm0, %v2125_v20  ;;  %v2077_v37 = vadd.f32 %v1997_v57, %v5034_v39  ;;  %v2401_v20 = vld [vmem:[#allocation2 + $0x159] sm:$0xff] }
 0x23f   : > { %3526 = vmatmul.msk.f32.gmra.mxu3 %vm432_vm0, %v2399_v46 }
 0x240   : > { %v2934_v50 = vadd.f32 %v4646_v51, %v2898_v8  ;;  %3463 = vmatmul.msk.f32.gmra.mxu1 %vm432_vm0, %v2672_v32 }
 0x241   : > { %v2269_v54 = vpop.f32.mrf.mxu2 }
 0x242   : > { %2966 = vst.msk [vmem:[%s4657_s17 + $0x30] sm:$0xff] %vm432_vm0, %v2934_v50  ;;  %v3003_v38 = vsel %vm432_vm0, %v2934_v50, 0.0  ;;  %v3069_v34 = vmul.f32 %v2934_v50, %v2934_v50  ;;  %v2351_v10 = vadd.f32 %v2269_v54, %v2076_v28  ;;  %v2543_v58 = vpop.f32.mrf.mxu3  ;;  %v2820_v59 = vpop.f32.mrf.mxu0 }
 0x243   : > { %v3004_v40 = vadd.f32 %v3003_v38, %v3002_v63  ;;  %v2676_v38 = vld [vmem:[#allocation2 + $0x16a] sm:$0xff] }
 0x244   : > { %v3106_v15 = vsel %vm432_vm0, %v3069_v34, 0.0  ;;  %v2625_v52 = vadd.f32 %v2543_v58, %v2351_v10  ;;  %v2128_v10 = vld [vmem:[#allocation2 + $0x168] sm:$0xff] }
 0x245   : > { %v3107_v31 = vadd.f32 %v3106_v15, %v3105_v56  ;;  %v2000_v53 = vpop.f32.mrf.mxu1  ;;  %3559 = vmatmul.msk.f32.gmra.mxu0 %vm432_vm0, %v2674_v17 }
 0x246   : > { %v2899_v32 = vadd.f32 %v2817_v4, %v2625_v52  ;;  %3495 = vmatmul.msk.f32.gmra.mxu2 %vm432_vm0, %v2126_v61  ;;  %v2078_v46 = vadd.f32 %v2000_v53, %v4423_v14 }
 0x247   : > { %3527 = vmatmul.msk.f32.gmra.mxu3 %vm432_vm0, %v2400_v2 }
 0x248   : > { %v2935_v45 = vadd.f32 %v4646_v51, %v2899_v32  ;;  %3464 = vmatmul.msk.f32.gmra.mxu1 %vm432_vm0, %v2673_v19 }
 0x249   : > { %v2272_v27 = vpop.f32.mrf.mxu2 }
 0x24a   : > { %2967 = vst.msk [vmem:[%s4657_s17 + $0x38] sm:$0xff] %vm432_vm0, %v2935_v45  ;;  %v3005_v13 = vsel %vm432_vm0, %v2935_v45, 0.0  ;;  %v3070_v0 = vmul.f32 %v2935_v45, %v2935_v45  ;;  %v2352_v42 = vadd.f32 %v2272_v27, %v2077_v37  ;;  %v2546_v47 = vpop.f32.mrf.mxu3  ;;  %v2823_v1 = vpop.f32.mrf.mxu0  ;;  %v2677_v45 = vld [vmem:[#allocation2 + $0x172] sm:$0xff] }
 0x24b   : > { %v3006_v6 = vadd.f32 %v3005_v13, %v3004_v40  ;;  %v2129_v13 = vld [vmem:[#allocation2 + $0x170] sm:$0xff] }
 0x24c   : > { %v3108_v4 = vsel %vm432_vm0, %v3070_v0, 0.0  ;;  %v2626_v63 = vadd.f32 %v2546_v47, %v2352_v42  ;;  %v2403_v42 = vld [vmem:[#allocation2 + $0x171] sm:$0xff] }
 0x24d   : > { %v3109_v7 = vadd.f32 %v3108_v4, %v3107_v31  ;;  %v2003_v35 = vpop.f32.mrf.mxu1  ;;  %3560 = vmatmul.msk.f32.gmra.mxu0 %vm432_vm0, %v2675_v24 }
 0x24e   : > { %v2900_v19 = vadd.f32 %v2820_v59, %v2626_v63  ;;  %3496 = vmatmul.msk.f32.gmra.mxu2 %vm432_vm0, %v2127_v44  ;;  %v2402_v59 = vld [vmem:[#allocation2 + $0x169] sm:$0xff]  ;;  %v2079_v15 = vadd.f32 %v2003_v35, %v4432_v21 }
 0x24f   : > { %3528 = vmatmul.msk.f32.gmra.mxu3 %vm432_vm0, %v2401_v20 }
 0x250   : > { %v2936_v56 = vadd.f32 %v4646_v51, %v2900_v19  ;;  %3465 = vmatmul.msk.f32.gmra.mxu1 %vm432_vm0, %v2674_v17 }
 0x251   : > { %v2275_v57 = vpop.f32.mrf.mxu2 }
 0x252   : > { %2968 = vst.msk [vmem:[%s4657_s17 + $0x40] sm:$0xff] %vm432_vm0, %v2936_v56  ;;  %v3007_v8 = vsel %vm432_vm0, %v2936_v56, 0.0  ;;  %v3071_v33 = vmul.f32 %v2936_v56, %v2936_v56  ;;  %v2353_v28 = vadd.f32 %v2275_v57, %v2078_v46  ;;  %v2549_v50 = vpop.f32.mrf.mxu3  ;;  %v2826_v54 = vpop.f32.mrf.mxu0  ;;  %v2678_v46 = vld [vmem:[#allocation2 + $0x182] sm:$0xff] }
 0x253   : > { %v3008_v34 = vadd.f32 %v3007_v8, %v3006_v6  ;;  %v2130_v57 = vld [vmem:[#allocation2 + $0x180] sm:$0xff] }
 0x254   : > { %v3110_v58 = vsel %vm432_vm0, %v3071_v33, 0.0  ;;  %v2627_v14 = vadd.f32 %v2549_v50, %v2353_v28  ;;  %v2404_v33 = vld [vmem:[#allocation2 + $0x181] sm:$0xff] }
 0x255   : > { %v3111_v40 = vadd.f32 %v3110_v58, %v3109_v7  ;;  %v2006_v61 = vpop.f32.mrf.mxu1  ;;  %3561 = vmatmul.msk.f32.gmra.mxu0 %vm432_vm0, %v2676_v38 }
 0x256   : > { %v2901_v17 = vadd.f32 %v2823_v1, %v2627_v14  ;;  %3497 = vmatmul.msk.f32.gmra.mxu2 %vm432_vm0, %v2128_v10  ;;  %v2080_v6 = vadd.f32 %v2006_v61, %v4440_v36 }
 0x257   : > { %3529 = vmatmul.msk.f32.gmra.mxu3 %vm432_vm0, %v2402_v59 }
 0x258   : > { %v2937_v52 = vadd.f32 %v4646_v51, %v2901_v17  ;;  %3466 = vmatmul.msk.f32.gmra.mxu1 %vm432_vm0, %v2675_v24  ;;  %v2679_v17 = vld [vmem:[#allocation2 + $0x18a] sm:$0xff] }
 0x259   : > { %v2278_v2 = vpop.f32.mrf.mxu2 }
 0x25a   : > { %2969 = vst.msk [vmem:[%s4657_s17 + $0x48] sm:$0xff] %vm432_vm0, %v2937_v52  ;;  %v3009_v31 = vsel %vm432_vm0, %v2937_v52, 0.0  ;;  %v3072_v53 = vmul.f32 %v2937_v52, %v2937_v52  ;;  %v2354_v32 = vadd.f32 %v2278_v2, %v2079_v15  ;;  %v2552_v39 = vpop.f32.mrf.mxu3  ;;  %v2829_v37 = vpop.f32.mrf.mxu0  ;;  %v2131_v52 = vld [vmem:[#allocation2 + $0x188] sm:$0xff] }
 0x25b   : > { %v3010_v27 = vadd.f32 %v3009_v31, %v3008_v34  ;;  %v2405_v31 = vld [vmem:[#allocation2 + $0x189] sm:$0xff] }
 0x25c   : > { %v3112_v0 = vsel %vm432_vm0, %v3072_v53, 0.0  ;;  %v2628_v21 = vadd.f32 %v2552_v39, %v2354_v32 }
 0x25d   : > { %v3113_v47 = vadd.f32 %v3112_v0, %v3111_v40  ;;  %v2009_v1 = vpop.f32.mrf.mxu1  ;;  %3562 = vmatmul.msk.f32.gmra.mxu0 %vm432_vm0, %v2677_v45 }
 0x25e   : > { %v2902_v24 = vadd.f32 %v2826_v54, %v2628_v21  ;;  %3498 = vmatmul.msk.f32.gmra.mxu2 %vm432_vm0, %v2129_v13 }
 0x25f   : > { %3530 = vmatmul.msk.f32.gmra.mxu3 %vm432_vm0, %v2403_v42 }
 0x260   : > { %v2938_v44 = vadd.f32 %v4646_v51, %v2902_v24  ;;  %3467 = vmatmul.msk.f32.gmra.mxu1 %vm432_vm0, %v2676_v38  ;;  %v2081_v38 = vadd.f32 %v2009_v1, %v4448_v43  ;;  %v2680_v1 = vld [vmem:[#allocation2 + $0x19a] sm:$0xff] }
 0x261   : > { %v2281_v4 = vpop.f32.mrf.mxu2 }
 0x262   : > { %2970 = vst.msk [vmem:[%s4657_s17 + $0x50] sm:$0xff] %vm432_vm0, %v2938_v44  ;;  %v3011_v63 = vsel %vm432_vm0, %v2938_v44, 0.0  ;;  %v3073_v20 = vmul.f32 %v2938_v44, %v2938_v44  ;;  %v2355_v7 = vadd.f32 %v2281_v4, %v2080_v6  ;;  %v2555_v35 = vpop.f32.mrf.mxu3  ;;  %v2832_v19 = vpop.f32.mrf.mxu0  ;;  %v2132_v6 = vld [vmem:[#allocation2 + $0x198] sm:$0xff] }
 0x263   : > { %v3012_v56 = vadd.f32 %v3011_v63, %v3010_v27  ;;  %v2406_v4 = vld [vmem:[#allocation2 + $0x199] sm:$0xff] }
 0x264   : > { %v3114_v8 = vsel %vm432_vm0, %v3073_v20, 0.0  ;;  %v2629_v36 = vadd.f32 %v2555_v35, %v2355_v7 }
 0x265   : > { %v3115_v28 = vadd.f32 %v3114_v8, %v3113_v47  ;;  %v2012_v50 = vpop.f32.mrf.mxu1  ;;  %3563 = vmatmul.msk.f32.gmra.mxu0 %vm432_vm0, %v2678_v46 }
 0x266   : > { %v2903_v54 = vadd.f32 %v2829_v37, %v2629_v36  ;;  %3499 = vmatmul.msk.f32.gmra.mxu2 %vm432_vm0, %v2130_v57  ;;  %v2082_v37 = vadd.f32 %v2012_v50, %v4455_v48 }
 0x267   : > { %3531 = vmatmul.msk.f32.gmra.mxu3 %vm432_vm0, %v2404_v33 }
 0x268   : > { %v2939_v34 = vadd.f32 %v4646_v51, %v2903_v54  ;;  %3468 = vmatmul.msk.f32.gmra.mxu1 %vm432_vm0, %v2677_v45  ;;  %v2133_v54 = vld [vmem:[#allocation2 + $0x1a0] sm:$0xff] }
 0x269   : > { %v2284_v10 = vpop.f32.mrf.mxu2 }
 0x26a   : > { %2971 = vst.msk [vmem:[%s4657_s17 + $0x58] sm:$0xff] %vm432_vm0, %v2939_v34  ;;  %v3013_v58 = vsel %vm432_vm0, %v2939_v34, 0.0  ;;  %v3074_v14 = vmul.f32 %v2939_v34, %v2939_v34  ;;  %v2356_v59 = vadd.f32 %v2284_v10, %v2081_v38  ;;  %v2558_v40 = vpop.f32.mrf.mxu3  ;;  %v2835_v61 = vpop.f32.mrf.mxu0  ;;  %v2407_v34 = vld [vmem:[#allocation2 + $0x1a1] sm:$0xff] }
 0x26b   : > { %v3014_v15 = vadd.f32 %v3013_v58, %v3012_v56 }
 0x26c   : > { %v3116_v2 = vsel %vm432_vm0, %v3074_v14, 0.0  ;;  %v2630_v43 = vadd.f32 %v2558_v40, %v2356_v59 }
 0x26d   : > { %v3117_v53 = vadd.f32 %v3116_v2, %v3115_v28  ;;  %v2015_v32 = vpop.f32.mrf.mxu1  ;;  %3564 = vmatmul.msk.f32.gmra.mxu0 %vm432_vm0, %v2679_v17  ;;  %v2681_v28 = vld [vmem:[#allocation2 + $0x1a2] sm:$0xff] }
 0x26e   : > { %v2904_v39 = vadd.f32 %v2832_v19, %v2630_v43  ;;  %3500 = vmatmul.msk.f32.gmra.mxu2 %vm432_vm0, %v2131_v52  ;;  %v2083_v35 = vadd.f32 %v2015_v32, %v4462_v12 }
 0x26f   : > { %3532 = vmatmul.msk.f32.gmra.mxu3 %vm432_vm0, %v2405_v31 }
 0x270   : > { %v2940_v45 = vadd.f32 %v4646_v51, %v2904_v39  ;;  %3469 = vmatmul.msk.f32.gmra.mxu1 %vm432_vm0, %v2678_v46 }
 0x271   : > { %v2287_v27 = vpop.f32.mrf.mxu2 }
 0x272   : > { %2972 = vst.msk [vmem:[%s4657_s17 + $0x60] sm:$0xff] %vm432_vm0, %v2940_v45  ;;  %v3015_v13 = vsel %vm432_vm0, %v2940_v45, 0.0  ;;  %v3075_v0 = vmul.f32 %v2940_v45, %v2940_v45  ;;  %v2357_v21 = vadd.f32 %v2287_v27, %v2082_v37  ;;  %v2561_v42 = vpop.f32.mrf.mxu3  ;;  %v2838_v47 = vpop.f32.mrf.mxu0 }
 0x273   : > { %v3016_v24 = vadd.f32 %v3015_v13, %v3014_v15 }
 0x274   : > { %v3118_v44 = vsel %vm432_vm0, %v3075_v0, 0.0  ;;  %v2631_v48 = vadd.f32 %v2561_v42, %v2357_v21 }
 0x275   : > { %v3119_v63 = vadd.f32 %v3118_v44, %v3117_v53  ;;  %v2018_v20 = vpop.f32.mrf.mxu1  ;;  %3565 = vmatmul.msk.f32.gmra.mxu0 %vm432_vm0, %v2680_v1 }
 0x276   : > { %v2905_v7 = vadd.f32 %v2835_v61, %v2631_v48  ;;  %3501 = vmatmul.msk.f32.gmra.mxu2 %vm432_vm0, %v2132_v6  ;;  %v2084_v59 = vadd.f32 %v2018_v20, %v4471_v18 }
 0x277   : > { %3533 = vmatmul.msk.f32.gmra.mxu3 %vm432_vm0, %v2406_v4 }
 0x278   : > { %v2941_v19 = vadd.f32 %v4646_v51, %v2905_v7  ;;  %3470 = vmatmul.msk.f32.gmra.mxu1 %vm432_vm0, %v2679_v17 }
 0x279   : > { %v2290_v46 = vpop.f32.mrf.mxu2 }
 0x27a   : > { %2973 = vst.msk [vmem:[%s4657_s17 + $0x68] sm:$0xff] %vm432_vm0, %v2941_v19  ;;  %v3017_v56 = vsel %vm432_vm0, %v2941_v19, 0.0  ;;  %v3076_v57 = vmul.f32 %v2941_v19, %v2941_v19  ;;  %v2358_v8 = vadd.f32 %v2290_v46, %v2083_v35  ;;  %v2564_v36 = vpop.f32.mrf.mxu3  ;;  %v2841_v33 = vpop.f32.mrf.mxu0 }
 0x27b   : > { %v3018_v50 = vadd.f32 %v3017_v56, %v3016_v24 }
 0x27c   : > { %v3120_v38 = vsel %vm432_vm0, %v3076_v57, 0.0  ;;  %v2632_v12 = vadd.f32 %v2564_v36, %v2358_v8 }
 0x27d   : > { %v3121_v10 = vadd.f32 %v3120_v38, %v3119_v63  ;;  %v2021_v58 = vpop.f32.mrf.mxu1  ;;  %3566 = vmatmul.msk.f32.gmra.mxu0 %vm432_vm0, %v2681_v28 }
 0x27e   : > { %v2906_v14 = vadd.f32 %v2838_v47, %v2632_v12  ;;  %3502 = vmatmul.msk.f32.gmra.mxu2 %vm432_vm0, %v2133_v54  ;;  %v2085_v18 = vadd.f32 %v2021_v58, %v4482_v29 }
 0x27f   : > { %3534 = vmatmul.msk.f32.gmra.mxu3 %vm432_vm0, %v2407_v34 }
 0x280   : > { %v2942_v40 = vadd.f32 %v4646_v51, %v2906_v14 }
 0x281   : > { %v2293_v61 = vpop.f32.mrf.mxu2 }
 0x282   : > { %2974 = vst.msk [vmem:[%s4657_s17 + $0x70] sm:$0xff] %vm432_vm0, %v2942_v40  ;;  %v3019_v17 = vsel %vm432_vm0, %v2942_v40, 0.0  ;;  %v3077_v15 = vmul.f32 %v2942_v40, %v2942_v40  ;;  %v2359_v52 = vadd.f32 %v2293_v61, %v2084_v59  ;;  %v2567_v2 = vpop.f32.mrf.mxu3  ;;  %v2844_v43 = vpop.f32.mrf.mxu0 }
 0x283   : > { %v3020_v31 = vadd.f32 %v3019_v17, %v3018_v50 }
 0x284   : > { %v3122_v53 = vsel %vm432_vm0, %v3077_v15, 0.0  ;;  %v2633_v32 = vadd.f32 %v2567_v2, %v2359_v52 }
 0x285   : > { %v3123_v39 = vadd.f32 %v3122_v53, %v3121_v10  ;;  %v2024_v37 = vpop.f32.mrf.mxu1 }
 0x286   : > { %v2907_v45 = vadd.f32 %v2841_v33, %v2633_v32  ;;  %v2086_v29 = vadd.f32 %v2024_v37, %v4493_v23 }
 0x288   : > { %v2943_v27 = vadd.f32 %v4646_v51, %v2907_v45 }
 0x289   : > { %v2296_v13 = vpop.f32.mrf.mxu2 }
 0x28a   : > { %2975 = vst.msk [vmem:[%s4657_s17 + $0x78] sm:$0xff] %vm432_vm0, %v2943_v27  ;;  %v3021_v0 = vsel %vm432_vm0, %v2943_v27, 0.0  ;;  %v3078_v21 = vmul.f32 %v2943_v27, %v2943_v27  ;;  %v2360_v42 = vadd.f32 %v2296_v13, %v2085_v18  ;;  %v2570_v47 = vpop.f32.mrf.mxu3  ;;  %v2847_v1 = vpop.f32.mrf.mxu0 }
 0x28b   : > { %v3022_v24 = vadd.f32 %v3021_v0, %v3020_v31 }
 0x28c   : > { %v3124_v6 = vsel %vm432_vm0, %v3078_v21, 0.0  ;;  %v2634_v44 = vadd.f32 %v2570_v47, %v2360_v42 }
 0x28d   : > { %v3125_v48 = vadd.f32 %v3124_v6, %v3123_v39  ;;  %v2027_v4 = vpop.f32.mrf.mxu1 }
 0x28e   : > { %v2908_v63 = vadd.f32 %v2844_v43, %v2634_v44  ;;  %v2087_v23 = vadd.f32 %v2027_v4, %v4504_v9 }
 0x290   : > { %v2944_v20 = vadd.f32 %v4646_v51, %v2908_v63 }
 0x291   : > { %v2299_v7 = vpop.f32.mrf.mxu2 }
 0x292   : > { %2976 = vst.msk [vmem:[%s4657_s17 + $0x80] sm:$0xff] %vm432_vm0, %v2944_v20  ;;  %v3023_v35 = vsel %vm432_vm0, %v2944_v20, 0.0  ;;  %v3079_v19 = vmul.f32 %v2944_v20, %v2944_v20  ;;  %v2361_v46 = vadd.f32 %v2299_v7, %v2086_v29  ;;  %v2573_v56 = vpop.f32.mrf.mxu3  ;;  %v2850_v57 = vpop.f32.mrf.mxu0 }
 0x293   : > { %v3024_v8 = vadd.f32 %v3023_v35, %v3022_v24 }
 0x294   : > { %v3126_v36 = vsel %vm432_vm0, %v3079_v19, 0.0  ;;  %v2635_v33 = vadd.f32 %v2573_v56, %v2361_v46 }
 0x295   : > { %v3127_v28 = vadd.f32 %v3126_v36, %v3125_v48  ;;  %v2030_v50 = vpop.f32.mrf.mxu1 }
 0x296   : > { %v2909_v54 = vadd.f32 %v2847_v1, %v2635_v33  ;;  %v2088_v9 = vadd.f32 %v2030_v50, %v4515_v16 }
 0x298   : > { %v2945_v38 = vadd.f32 %v4646_v51, %v2909_v54 }
 0x299   : > { %v2302_v12 = vpop.f32.mrf.mxu2 }
 0x29a   : > { %2977 = vst.msk [vmem:[%s4657_s17 + $0x88] sm:$0xff] %vm432_vm0, %v2945_v38  ;;  %v3025_v34 = vsel %vm432_vm0, %v2945_v38, 0.0  ;;  %v3080_v10 = vmul.f32 %v2945_v38, %v2945_v38  ;;  %v2362_v58 = vadd.f32 %v2302_v12, %v2087_v23  ;;  %v2576_v14 = vpop.f32.mrf.mxu3  ;;  %v2853_v59 = vpop.f32.mrf.mxu0 }
 0x29b   : > { %v3026_v40 = vadd.f32 %v3025_v34, %v3024_v8 }
 0x29c   : > { %v3128_v61 = vsel %vm432_vm0, %v3080_v10, 0.0  ;;  %v2636_v17 = vadd.f32 %v2576_v14, %v2362_v58 }
 0x29d   : > { %v3129_v15 = vadd.f32 %v3128_v61, %v3127_v28  ;;  %v2033_v52 = vpop.f32.mrf.mxu1 }
 0x29e   : > { %v2910_v2 = vadd.f32 %v2850_v57, %v2636_v17  ;;  %v2089_v16 = vadd.f32 %v2033_v52, %v4525_v55 }
 0x2a0   : > { %v2946_v43 = vadd.f32 %v4646_v51, %v2910_v2 }
 0x2a1   : > { %v2305_v31 = vpop.f32.mrf.mxu2 }
 0x2a2   : > { %2978 = vst.msk [vmem:[%s4657_s17 + $0x90] sm:$0xff] %vm432_vm0, %v2946_v43  ;;  %v3027_v53 = vsel %vm432_vm0, %v2946_v43, 0.0  ;;  %v3081_v32 = vmul.f32 %v2946_v43, %v2946_v43  ;;  %v2363_v39 = vadd.f32 %v2305_v31, %v2088_v9  ;;  %v2579_v37 = vpop.f32.mrf.mxu3  ;;  %v2856_v45 = vpop.f32.mrf.mxu0 }
 0x2a3   : > { %v3028_v18 = vadd.f32 %v3027_v53, %v3026_v40 }
 0x2a4   : > { %v3130_v27 = vsel %vm432_vm0, %v3081_v32, 0.0  ;;  %v2637_v13 = vadd.f32 %v2579_v37, %v2363_v39 }
 0x2a5   : > { %v3131_v0 = vadd.f32 %v3130_v27, %v3129_v15  ;;  %v2036_v21 = vpop.f32.mrf.mxu1 }
 0x2a6   : > { %v2911_v42 = vadd.f32 %v2853_v59, %v2637_v13  ;;  %v2090_v55 = vadd.f32 %v2036_v21, %v4535_v11 }
 0x2a8   : > { %v2947_v47 = vadd.f32 %v4646_v51, %v2911_v42 }
 0x2a9   : > { %v2308_v1 = vpop.f32.mrf.mxu2 }
 0x2aa   : > { %2979 = vst.msk [vmem:[%s4657_s17 + $0x98] sm:$0xff] %vm432_vm0, %v2947_v47  ;;  %v3029_v24 = vsel %vm432_vm0, %v2947_v47, 0.0  ;;  %v3082_v6 = vmul.f32 %v2947_v47, %v2947_v47  ;;  %v2364_v44 = vadd.f32 %v2308_v1, %v2089_v16  ;;  %v2582_v48 = vpop.f32.mrf.mxu3  ;;  %v2859_v4 = vpop.f32.mrf.mxu0 }
 0x2ab   : > { %v3030_v63 = vadd.f32 %v3029_v24, %v3028_v18 }
 0x2ac   : > { %v3132_v29 = vsel %vm432_vm0, %v3082_v6, 0.0  ;;  %v2638_v20 = vadd.f32 %v2582_v48, %v2364_v44 }
 0x2ad   : > { %v3133_v7 = vadd.f32 %v3132_v29, %v3131_v0  ;;  %v2039_v35 = vpop.f32.mrf.mxu1 }
 0x2ae   : > { %v2912_v19 = vadd.f32 %v2856_v45, %v2638_v20  ;;  %v2091_v11 = vadd.f32 %v2039_v35, %v4545_v60 }
 0x2b0   : > { %v2948_v46 = vadd.f32 %v4646_v51, %v2912_v19 }
 0x2b1   : > { %v2311_v56 = vpop.f32.mrf.mxu2 }
 0x2b2   : > { %2980 = vst.msk [vmem:[%s4657_s17 + $0xa0] sm:$0xff] %vm432_vm0, %v2948_v46  ;;  %v3031_v57 = vsel %vm432_vm0, %v2948_v46, 0.0  ;;  %v3083_v8 = vmul.f32 %v2948_v46, %v2948_v46  ;;  %v2365_v36 = vadd.f32 %v2311_v56, %v2090_v55  ;;  %v2585_v33 = vpop.f32.mrf.mxu3  ;;  %v2862_v28 = vpop.f32.mrf.mxu0 }
 0x2b3   : > { %v3032_v50 = vadd.f32 %v3031_v57, %v3030_v63 }
 0x2b4   : > { %v3134_v54 = vsel %vm432_vm0, %v3083_v8, 0.0  ;;  %v2639_v23 = vadd.f32 %v2585_v33, %v2365_v36 }
 0x2b5   : > { %v3135_v38 = vadd.f32 %v3134_v54, %v3133_v7  ;;  %v2042_v12 = vpop.f32.mrf.mxu1 }
 0x2b6   : > { %v2913_v34 = vadd.f32 %v2859_v4, %v2639_v23  ;;  %v2092_v60 = vadd.f32 %v2042_v12, %v4555_v30 }
 0x2b8   : > { %v2949_v10 = vadd.f32 %v4646_v51, %v2913_v34 }
 0x2b9   : > { %v2314_v58 = vpop.f32.mrf.mxu2 }
 0x2ba   : > { %2981 = vst.msk [vmem:[%s4657_s17 + $0xa8] sm:$0xff] %vm432_vm0, %v2949_v10  ;;  %v3033_v14 = vsel %vm432_vm0, %v2949_v10, 0.0  ;;  %v3084_v59 = vmul.f32 %v2949_v10, %v2949_v10  ;;  %v2366_v40 = vadd.f32 %v2314_v58, %v2091_v11  ;;  %v2588_v61 = vpop.f32.mrf.mxu3  ;;  %v2865_v17 = vpop.f32.mrf.mxu0 }
 0x2bb   : > { %v3034_v15 = vadd.f32 %v3033_v14, %v3032_v50 }
 0x2bc   : > { %v3136_v52 = vsel %vm432_vm0, %v3084_v59, 0.0  ;;  %v2640_v2 = vadd.f32 %v2588_v61, %v2366_v40 }
 0x2bd   : > { %v3137_v9 = vadd.f32 %v3136_v52, %v3135_v38  ;;  %v2045_v43 = vpop.f32.mrf.mxu1 }
 0x2be   : > { %v2914_v31 = vadd.f32 %v2862_v28, %v2640_v2  ;;  %v2093_v30 = vadd.f32 %v2045_v43, %v4565_v3 }
 0x2c0   : > { %v2950_v53 = vadd.f32 %v4646_v51, %v2914_v31 }
 0x2c1   : > { %v2317_v32 = vpop.f32.mrf.mxu2 }
 0x2c2   : > { %2982 = vst.msk [vmem:[%s4657_s17 + $0xb0] sm:$0xff] %vm432_vm0, %v2950_v53  ;;  %v3035_v39 = vsel %vm432_vm0, %v2950_v53, 0.0  ;;  %v3085_v37 = vmul.f32 %v2950_v53, %v2950_v53  ;;  %v2367_v45 = vadd.f32 %v2317_v32, %v2092_v60  ;;  %v2591_v18 = vpop.f32.mrf.mxu3  ;;  %v2868_v27 = vpop.f32.mrf.mxu0 }
 0x2c3   : > { %v3036_v13 = vadd.f32 %v3035_v39, %v3034_v15 }
 0x2c4   : > { %v3138_v0 = vsel %vm432_vm0, %v3085_v37, 0.0  ;;  %v2641_v21 = vadd.f32 %v2591_v18, %v2367_v45 }
 0x2c5   : > { %v3139_v42 = vadd.f32 %v3138_v0, %v3137_v9  ;;  %v2048_v16 = vpop.f32.mrf.mxu1 }
 0x2c6   : > { %v2915_v47 = vadd.f32 %v2865_v17, %v2641_v21  ;;  %v2094_v3 = vadd.f32 %v2048_v16, %v4575_v22 }
 0x2c8   : > { %v2951_v1 = vadd.f32 %v4646_v51, %v2915_v47 }
 0x2c9   : > { %v2320_v24 = vpop.f32.mrf.mxu2 }
 0x2ca   : > { %2983 = vst.msk [vmem:[%s4657_s17 + $0xb8] sm:$0xff] %vm432_vm0, %v2951_v1  ;;  %v3037_v6 = vsel %vm432_vm0, %v2951_v1, 0.0  ;;  %v3086_v44 = vmul.f32 %v2951_v1, %v2951_v1  ;;  %v2368_v48 = vadd.f32 %v2320_v24, %v2093_v30  ;;  %v2594_v4 = vpop.f32.mrf.mxu3  ;;  %v2871_v63 = vpop.f32.mrf.mxu0 }
 0x2cb   : > { %v3038_v29 = vadd.f32 %v3037_v6, %v3036_v13 }
 0x2cc   : > { %v3140_v20 = vsel %vm432_vm0, %v3086_v44, 0.0  ;;  %v2642_v7 = vadd.f32 %v2594_v4, %v2368_v48 }
 0x2cd   : > { %v3141_v35 = vadd.f32 %v3140_v20, %v3139_v42  ;;  %v2051_v19 = vpop.f32.mrf.mxu1 }
 0x2ce   : > { %v2916_v55 = vadd.f32 %v2868_v27, %v2642_v7  ;;  %v2095_v22 = vadd.f32 %v2051_v19, %v4585_v49 }
 0x2d0   : > { %v2952_v46 = vadd.f32 %v4646_v51, %v2916_v55 }
 0x2d1   : > { %v2323_v56 = vpop.f32.mrf.mxu2 }
 0x2d2   : > { %2984 = vst.msk [vmem:[%s4657_s17 + $0xc0] sm:$0xff] %vm432_vm0, %v2952_v46  ;;  %v3039_v57 = vsel %vm432_vm0, %v2952_v46, 0.0  ;;  %v3087_v8 = vmul.f32 %v2952_v46, %v2952_v46  ;;  %v2369_v36 = vadd.f32 %v2323_v56, %v2094_v3  ;;  %v2597_v33 = vpop.f32.mrf.mxu3  ;;  %v2874_v28 = vpop.f32.mrf.mxu0 }
 0x2d3   : > { %v3040_v50 = vadd.f32 %v3039_v57, %v3038_v29 }
 0x2d4   : > { %v3142_v54 = vsel %vm432_vm0, %v3087_v8, 0.0  ;;  %v2643_v23 = vadd.f32 %v2597_v33, %v2369_v36 }
 0x2d5   : > { %v3143_v38 = vadd.f32 %v3142_v54, %v3141_v35  ;;  %v2054_v12 = vpop.f32.mrf.mxu1 }
 0x2d6   : > { %v2917_v34 = vadd.f32 %v2871_v63, %v2643_v23  ;;  %v2096_v49 = vadd.f32 %v2054_v12, %v4595_v25 }
 0x2d8   : > { %v2953_v11 = vadd.f32 %v4646_v51, %v2917_v34 }
 0x2d9   : > { %v2326_v10 = vpop.f32.mrf.mxu2 }
 0x2da   : > { %2985 = vst.msk [vmem:[%s4657_s17 + $0xc8] sm:$0xff] %vm432_vm0, %v2953_v11  ;;  %v3041_v58 = vsel %vm432_vm0, %v2953_v11, 0.0  ;;  %v3088_v14 = vmul.f32 %v2953_v11, %v2953_v11  ;;  %v2370_v59 = vadd.f32 %v2326_v10, %v2095_v22  ;;  %v2600_v40 = vpop.f32.mrf.mxu3  ;;  %v2877_v17 = vpop.f32.mrf.mxu0 }
 0x2db   : > { %v3042_v61 = vadd.f32 %v3041_v58, %v3040_v50 }
 0x2dc   : > { %v3144_v15 = vsel %vm432_vm0, %v3088_v14, 0.0  ;;  %v2644_v52 = vadd.f32 %v2600_v40, %v2370_v59 }
 0x2dd   : > { %v3145_v2 = vadd.f32 %v3144_v15, %v3143_v38  ;;  %v2057_v43 = vpop.f32.mrf.mxu1 }
 0x2de   : > { %v2918_v9 = vadd.f32 %v2874_v28, %v2644_v52  ;;  %v2097_v25 = vadd.f32 %v2057_v43, %v4605_v5 }
 0x2e0   : > { %v2954_v31 = vadd.f32 %v4646_v51, %v2918_v9 }
 0x2e1   : > { %v2329_v60 = vpop.f32.mrf.mxu2 }
 0x2e2   : > { %2986 = vst.msk [vmem:[%s4657_s17 + $0xd0] sm:$0xff] %vm432_vm0, %v2954_v31  ;;  %v3043_v53 = vsel %vm432_vm0, %v2954_v31, 0.0  ;;  %v3089_v32 = vmul.f32 %v2954_v31, %v2954_v31  ;;  %v2371_v39 = vadd.f32 %v2329_v60, %v2096_v49  ;;  %v2603_v37 = vpop.f32.mrf.mxu3  ;;  %v2880_v0 = vpop.f32.mrf.mxu0 }
 0x2e3   : > { %v3044_v45 = vadd.f32 %v3043_v53, %v3042_v61 }
 0x2e4   : > { %v3146_v18 = vsel %vm432_vm0, %v3089_v32, 0.0  ;;  %v2645_v27 = vadd.f32 %v2603_v37, %v2371_v39 }
 0x2e5   : > { %v3147_v13 = vadd.f32 %v3146_v18, %v3145_v2  ;;  %v2060_v47 = vpop.f32.mrf.mxu1 }
 0x2e6   : > { %v2919_v21 = vadd.f32 %v2877_v17, %v2645_v27  ;;  %v2098_v5 = vadd.f32 %v2060_v47, %v4615_v62 }
 0x2e8   : > { %v2955_v42 = vadd.f32 %v4646_v51, %v2919_v21  ;;  %v3588_v51 = vld [vmem:[%s4927_s4] ss:$0 sm:$0xff] }
 0x2e9   : > { %v2332_v16 = vpop.f32.mrf.mxu2 }
 0x2ea   : > { %2987 = vst.msk [vmem:[%s4657_s17 + $0xd8] sm:$0xff] %vm432_vm0, %v2955_v42  ;;  %v3045_v30 = vsel %vm432_vm0, %v2955_v42, 0.0  ;;  %v3090_v1 = vmul.f32 %v2955_v42, %v2955_v42  ;;  %v2372_v24 = vadd.f32 %v2332_v16, %v2097_v25  ;;  %v2606_v6 = vpop.f32.mrf.mxu3  ;;  %v2883_v20 = vpop.f32.mrf.mxu0 }
 0x2eb   : > { %v3046_v44 = vadd.f32 %v3045_v30, %v3044_v45 }
 0x2ec   : > { %v3148_v48 = vsel %vm432_vm0, %v3090_v1, 0.0  ;;  %v2646_v4 = vadd.f32 %v2606_v6, %v2372_v24 }
 0x2ed   : > { %v3149_v63 = vadd.f32 %v3148_v48, %v3147_v13  ;;  %v2063_v57 = vpop.f32.mrf.mxu1 }
 0x2ee   : > { %v2920_v29 = vadd.f32 %v2880_v0, %v2646_v4  ;;  %v2099_v28 = vadd.f32 %v2063_v57, %v4625_v26 }
 0x2f0   : > { %v2956_v7 = vadd.f32 %v3588_v51, %v2920_v29 }
 0x2f1   : > { %v2335_v35 = vpop.f32.mrf.mxu2 }
 0x2f2   : > { %2988 = vst.msk [vmem:[%s4657_s17 + $0xe0] sm:$0xff] %vm432_vm0, %v2956_v7  ;;  %v3047_v19 = vsel %vm432_vm0, %v2956_v7, 0.0  ;;  %v3091_v55 = vmul.f32 %v2956_v7, %v2956_v7  ;;  %v2373_v3 = vadd.f32 %v2335_v35, %v2098_v5  ;;  %v2609_v46 = vpop.f32.mrf.mxu3  ;;  %v2886_v23 = vpop.f32.mrf.mxu0 }
 0x2f3   : > { %v3048_v56 = vadd.f32 %v3047_v19, %v3046_v44 }
 0x2f4   : > { %v3150_v8 = vsel %vm432_vm0, %v3091_v55, 0.0  ;;  %v2647_v36 = vadd.f32 %v2609_v46, %v2373_v3 }
 0x2f5   : > { %v3151_v62 = vadd.f32 %v3150_v8, %v3149_v63  ;;  %v2066_v59 = vpop.f32.mrf.mxu1 }
 0x2f6   : > { %v2921_v33 = vadd.f32 %v2883_v20, %v2647_v36  ;;  %v2100_v26 = vadd.f32 %v2066_v59, %v4635_v41 }
 0x2f8   : > { %v2957_v50 = vadd.f32 %v3588_v51, %v2921_v33 }
 0x2f9   : > { %v2338_v54 = vpop.f32.mrf.mxu2 }
 0x2fa   : > { %2989 = vst.msk [vmem:[%s4657_s17 + $0xe8] sm:$0xff] %vm432_vm0, %v2957_v50  ;;  %v3049_v38 = vsel %vm432_vm0, %v2957_v50, 0.0  ;;  %v3092_v12 = vmul.f32 %v2957_v50, %v2957_v50  ;;  %v2374_v34 = vadd.f32 %v2338_v54, %v2099_v28  ;;  %v2612_v22 = vpop.f32.mrf.mxu3  ;;  %v2889_v49 = vpop.f32.mrf.mxu0 }
 0x2fb   : > { %v3050_v11 = vadd.f32 %v3049_v38, %v3048_v56 }
 0x2fc   : > { %v3152_v10 = vsel %vm432_vm0, %v3092_v12, 0.0  ;;  %v2648_v58 = vadd.f32 %v2612_v22, %v2374_v34 }
 0x2fd   : > { %v3153_v14 = vadd.f32 %v3152_v10, %v3151_v62 }
 0x2fe   : > { %v2922_v40 = vadd.f32 %v2886_v23, %v2648_v58 }
 0x300   : > { %v2958_v61 = vadd.f32 %v3588_v51, %v2922_v40 }
 0x301   : > { %v2341_v17 = vpop.f32.mrf.mxu2 }
 0x302   : > { %2990 = vst.msk [vmem:[%s4657_s17 + $0xf0] sm:$0xff] %vm432_vm0, %v2958_v61  ;;  %v3051_v15 = vsel %vm432_vm0, %v2958_v61, 0.0  ;;  %v3093_v52 = vmul.f32 %v2958_v61, %v2958_v61  ;;  %v2375_v2 = vadd.f32 %v2341_v17, %v2100_v26  ;;  %v2615_v9 = vpop.f32.mrf.mxu3 }
 0x303   : > { %v3052_v43 = vadd.f32 %v3051_v15, %v3050_v11 }
 0x304   : > { %v3154_v31 = vsel %vm432_vm0, %v3093_v52, 0.0  ;;  %v2649_v60 = vadd.f32 %v2615_v9, %v2375_v2 }
 0x305   : > { %v3155_v53 = vadd.f32 %v3154_v31, %v3153_v14 }
 0x306   : > { %v2923_v32 = vadd.f32 %v2889_v49, %v2649_v60 }
 0x308   : > { %v2959_v39 = vadd.f32 %v3588_v51, %v2923_v32 }
 0x30a   : > { %2991 = vst.msk [vmem:[%s4657_s17 + $0xf8] sm:$0xff] %vm432_vm0, %v2959_v39  ;;  %v3053_v41 = vsel %vm432_vm0, %v2959_v39, 0.0  ;;  %v3094_v37 = vmul.f32 %v2959_v39, %v2959_v39 }
 0x30b   : > { %v3054_v45 = vadd.f32 %v3053_v41, %v3052_v43 }
 0x30c   : > { %v3156_v18 = vsel %vm432_vm0, %v3094_v37, 0.0 }
 0x30d   : > { %v3055_v27 = vrot.slane %v3054_v45, 4  ;;  %v3157_v13 = vadd.f32 %v3156_v18, %v3155_v53 }
 0x30f   : > { %v3056_v0 = vadd.f32 %v3055_v27, %v3054_v45  ;;  %v3158_v21 = vrot.slane %v3157_v13, 4 }
 0x311   : > { %v3057_v25 = vrot.slane %v3056_v0, 2  ;;  %v3159_v42 = vadd.f32 %v3158_v21, %v3157_v13 }
 0x313   : > { %v3058_v16 = vadd.f32 %v3057_v25, %v3056_v0  ;;  %v3160_v47 = vrot.slane %v3159_v42, 2 }
 0x315   : > { %v3059_v30 = vrot.slane %v3058_v16, 1  ;;  %v3161_v1 = vadd.f32 %v3160_v47, %v3159_v42 }
 0x317   : > { %v3060_v24 = vadd.f32 %v3059_v30, %v3058_v16  ;;  %v3162_v6 = vrot.slane %v3161_v1, 1 }
 0x319   : > { %3062 = vst.msk [vmem:[%s292_s21] sm:$0x1] %vm3061_vm2, %v3060_v24  ;;  %v3163_v44 = vadd.f32 %v3162_v6, %v3161_v1 }
 0x31b   : > { %3164 = vst.msk [vmem:[%s295_s26] sm:$0x1] %vm3061_vm2, %v3163_v44 }
 0x31c PF: > { %s18_s24 = sadd.s32 1, %s3595_s24  }
 0x31d   : > { %p15_p4 = scmp.ge.s32.totalorder %s18_s24, 4  }
 0x31f   :  { %17 = sbr.rel (!%p15_p4) target bundleno = 1 (0x1), region = 96 }

</bundles_post_ra>
